<compile_context>
chip_gen: v6e
topology: v6e:2x2x1
jax: 0.10.0
libtpu: 0.0.40
codegen_flags: <defaults>
</compile_context>

<pallas_src>
import functools
import math

import jax
import jax.numpy as jnp
from jax.experimental import pallas as pl
from jax.experimental.pallas import tpu as pltpu


# --------------------------------------------------------------------------
# Fused kernel: embedding gather + L decoder layers + fc_out, one batch per grid step.
# --------------------------------------------------------------------------
def _gpt_kernel(
    tok_ref,                                                   # (B*S,) int32, SMEM (prefetch)
    emb_ref,                                                   # (V, D) f32
    wq_s_ref, bq_s_ref, wk_s_ref, bk_s_ref, wv_s_ref, bv_s_ref, wo_s_ref, bo_s_ref,
    wq_c_ref, bq_c_ref, wk_c_ref, bk_c_ref, wv_c_ref, bv_c_ref, wo_c_ref, bo_c_ref,
    g1_ref, b1_ref, g2_ref, b2_ref, g3_ref, b3_ref,
    w1_ref, bf1_ref, w2_ref, bf2_ref,
    wout_ref, bout_ref,
    o_ref,                                                     # (1, S, V)
    x_scr,                                                     # VMEM scratch (S, D) f32
    *, S, H, ff_chunk,
):
    D = emb_ref.shape[1]
    L = w1_ref.shape[0]
    F = w1_ref.shape[2]
    hd = D // H
    scale = 1.0 / math.sqrt(hd)
    eps = 1e-5
    bf16 = jnp.bfloat16
    batch_idx = pl.program_id(0)

    def mm(x, w):
        # MXU path: bf16 operands, f32 accumulate.
        return jnp.dot(x.astype(bf16), w.astype(bf16), preferred_element_type=jnp.float32)

    def bdot(a, bm, dims):
        # (H,)-batched matmul on the MXU, bf16 operands / f32 accumulate.
        return jax.lax.dot_general(
            a.astype(bf16), bm.astype(bf16),
            dimension_numbers=(dims, ((0,), (0,))),
            preferred_element_type=jnp.float32)

    def add_ln(y, res, g, beta):
        # residual add + LayerNorm epilogue; stats in f32 (biased variance, eps=1e-5).
        h = y + res
        mu = jnp.mean(h, axis=-1, keepdims=True)
        var = jnp.mean(jnp.square(h - mu), axis=-1, keepdims=True)
        return (h - mu) * jax.lax.rsqrt(var + eps) * g + beta

    def mha(xq, xkv, wq, bq, wk, bk, wv, bv, wo, bo):
        # All heads at once as (H,)-batched dots: no per-head loop, no lane slicing,
        # no concatenates.  xq/xkv: (S, D) f32; weights head-major.
        xq_b = jnp.broadcast_to(xq.astype(bf16)[None], (H, S, D))
        xkv_b = jnp.broadcast_to(xkv.astype(bf16)[None], (H, S, D))
        q = bdot(xq_b, wq, ((2,), (1,))) + bq                  # (H, S, hd)
        k = bdot(xkv_b, wk, ((2,), (1,))) + bk                 # (H, S, hd)
        v = bdot(xkv_b, wv, ((2,), (1,))) + bv                 # (H, S, hd)
        s = bdot(q, k, ((2,), (2,))) * scale                   # (H, S, S)
        s = s - jnp.max(s, axis=-1, keepdims=True)             # softmax stays in f32
        p = jnp.exp(s)
        p = p * pl.reciprocal(jnp.sum(p, axis=-1, keepdims=True), approx=True)
        o = bdot(p, v, ((2,), (1,)))                           # (H, S, hd)
        y = bdot(o, wo, ((2,), (1,)))                          # (H, S, D)
        return jnp.sum(y, axis=0) + bo                         # (S, D)  == concat(heads) @ Wo

    # ---- embedding: direct row gather from the VMEM-resident table (no one-hot) ----
    for i in range(S):
        tok_i = tok_ref[batch_idx * S + i]
        x_scr[pl.ds(i, 1), :] = emb_ref[pl.ds(tok_i, 1), :]
    x = x_scr[...]                                             # (S, D) f32

    # ---- decoder layers (post-norm, block(x, x)) ----
    for l in range(L):
        mem = x  # cross-attention memory = this layer's input

        sa = mha(x, x,
                 wq_s_ref[l], bq_s_ref[l], wk_s_ref[l], bk_s_ref[l],
                 wv_s_ref[l], bv_s_ref[l], wo_s_ref[l], bo_s_ref[l:l + 1, :])
        x = add_ln(sa, x, g1_ref[l:l + 1, :], b1_ref[l:l + 1, :])

        ca = mha(x, mem,
                 wq_c_ref[l], bq_c_ref[l], wk_c_ref[l], bk_c_ref[l],
                 wv_c_ref[l], bv_c_ref[l], wo_c_ref[l], bo_c_ref[l:l + 1, :])
        x = add_ln(ca, x, g2_ref[l:l + 1, :], b2_ref[l:l + 1, :])

        # FFN chunked over dff: live ReLU intermediate is only (S, ff_chunk), bf16 for
        # the second matmul; per-chunk weight slices loaded from the ref inside the loop.
        xb = x.astype(bf16)
        y = jnp.zeros((S, D), jnp.float32)
        for c0 in range(0, F, ff_chunk):
            c1 = c0 + ff_chunk
            h = jnp.dot(xb, w1_ref[l, :, c0:c1], preferred_element_type=jnp.float32)
            h = jnp.maximum(h + bf1_ref[l:l + 1, c0:c1], 0.0).astype(bf16)
            y = y + jnp.dot(h, w2_ref[l, c0:c1, :], preferred_element_type=jnp.float32)
        y = y + bf2_ref[l:l + 1, :]
        x = add_ln(y, x, g3_ref[l:l + 1, :], b3_ref[l:l + 1, :])

    # ---- fc_out fused: logits never leave VMEM until the final lane-dense store ----
    logits = mm(x, wout_ref[...]) + bout_ref[...]              # (S, V) f32
    o_ref[0, :, :] = logits.astype(o_ref.dtype)


# --------------------------------------------------------------------------
# model glue
# --------------------------------------------------------------------------
def simple_gpt_forward(tokens, params, num_heads):
    """tokens: (S, B) int32 (seq-major, batch_first=False). Returns (S, B, V) f32 logits."""
    S, B = tokens.shape
    V, D = params["embedding"].shape
    F = params["ffn_w1"].shape[2]
    ff_chunk = 512 if F % 512 == 0 else F
    vocab = params["fc_out_w"].shape[1]

    # batch-major flat token ids; scalar-prefetched into SMEM for the in-kernel gather
    tok = tokens.T.reshape(B * S).astype(jnp.int32)

    names = [
        "embedding",
        "wq_self", "bq_self", "wk_self", "bk_self", "wv_self", "bv_self", "wo_self", "bo_self",
        "wq_cross", "bq_cross", "wk_cross", "bk_cross", "wv_cross", "bv_cross", "wo_cross", "bo_cross",
        "ln1_g", "ln1_b", "ln2_g", "ln2_b", "ln3_g", "ln3_b",
        "ffn_w1", "ffn_b1", "ffn_w2", "ffn_b2",
        "fc_out_w", "fc_out_b",
    ]
    arrays = [params[n] for n in names]
    # every weight is VMEM-resident for the whole call (constant index_map, full-shape block)
    in_specs = [pl.BlockSpec(a.shape, (lambda bi, tok_ref, n=a.ndim: (0,) * n)) for a in arrays]

    grid_spec = pltpu.PrefetchScalarGridSpec(
        num_scalar_prefetch=1,
        grid=(B,),                                    # one batch per grid step (v7x: 2 TCs)
        in_specs=in_specs,
        out_specs=pl.BlockSpec((1, S, vocab), lambda bi, tok_ref: (bi, 0, 0)),
        scratch_shapes=[pltpu.VMEM((S, D), jnp.float32)],
    )

    out = pl.pallas_call(
        functools.partial(_gpt_kernel, S=S, H=num_heads, ff_chunk=ff_chunk),
        out_shape=jax.ShapeDtypeStruct((B, S, vocab), jnp.float32),
        grid_spec=grid_spec,
        compiler_params=pltpu.CompilerParams(
            dimension_semantics=("parallel",),
            vmem_limit_bytes=32 * 1024 * 1024,        # explicit budget; safe on v5e/v6e/v7x
        ),
    )(tok, *arrays)                                   # (B, S, V)
    return out.transpose(1, 0, 2)                     # (S, B, V)


def init_params(key, vocab_size, hidden, num_layers, num_heads, dff):
    keys = iter(jax.random.split(key, 64))
    L, D, F, V, H = num_layers, hidden, dff, vocab_size, num_heads
    hd = D // H

    def w(shape, dtype=jnp.bfloat16, scale=0.02):
        # MXU weights stored bf16 (halves HBM/VMEM traffic); f32 accumulate in-kernel.
        return (scale * jax.random.normal(next(keys), shape, dtype=jnp.float32)).astype(dtype)

    def zeros(shape):
        return jnp.zeros(shape, jnp.float32)

    def ones(shape):
        return jnp.ones(shape, jnp.float32)

    return dict(
        embedding=w((V, D), dtype=jnp.float32),
        # attention weights head-major: (L, H, D, hd) in / (L, H, hd, D) out-proj;
        # per-head biases stored pre-broadcast as (L, H, 1, hd)
        wq_self=w((L, H, D, hd)), bq_self=zeros((L, H, 1, hd)),
        wk_self=w((L, H, D, hd)), bk_self=zeros((L, H, 1, hd)),
        wv_self=w((L, H, D, hd)), bv_self=zeros((L, H, 1, hd)),
        wo_self=w((L, H, hd, D)), bo_self=zeros((L, D)),
        wq_cross=w((L, H, D, hd)), bq_cross=zeros((L, H, 1, hd)),
        wk_cross=w((L, H, D, hd)), bk_cross=zeros((L, H, 1, hd)),
        wv_cross=w((L, H, D, hd)), bv_cross=zeros((L, H, 1, hd)),
        wo_cross=w((L, H, hd, D)), bo_cross=zeros((L, D)),
        ln1_g=ones((L, D)), ln1_b=zeros((L, D)),
        ln2_g=ones((L, D)), ln2_b=zeros((L, D)),
        ln3_g=ones((L, D)), ln3_b=zeros((L, D)),
        ffn_w1=w((L, D, F)), ffn_b1=zeros((L, F)),
        ffn_w2=w((L, F, D)), ffn_b2=zeros((L, D)),
        fc_out_w=w((D, V)), fc_out_b=zeros((1, V)),
    )


if __name__ == "__main__":
    # small, module-consistent shapes (hidden/vocab scaled down from 256 / GPT-2's 50257)
    vocab_size = 512
    hidden_size = 32
    num_heads = 4
    num_layers = 2
    dim_feedforward = 2048  # PyTorch nn.TransformerDecoderLayer default
    S, B = 8, 2             # (seq, batch), seq-major like batch_first=False

    key = jax.random.PRNGKey(0)
    pkey, tkey = jax.random.split(key)
    params = init_params(pkey, vocab_size, hidden_size, num_layers, num_heads, dim_feedforward)
    tokens = jax.random.randint(tkey, (S, B), 0, vocab_size, dtype=jnp.int32)

    logits = simple_gpt_forward(tokens, params, num_heads)
    jax.block_until_ready(logits)
    assert logits.shape == (S, B, vocab_size), logits.shape
    assert bool(jnp.all(jnp.isfinite(logits)))
    print("KERNEL_OK")
</pallas_src>

<mosaic_0001>
module attributes {stable_mosaic.version = 11 : i64} {
  func.func @_gpt_kernel(%arg0: i32, %arg1: memref<16xi32, #tpu.memory_space<smem>>, %arg2: memref<512x32xf32, #tpu.memory_space<vmem>>, %arg3: memref<2x4x32x8xbf16, #tpu.memory_space<vmem>>, %arg4: memref<2x4x1x8xf32, #tpu.memory_space<vmem>>, %arg5: memref<2x4x32x8xbf16, #tpu.memory_space<vmem>>, %arg6: memref<2x4x1x8xf32, #tpu.memory_space<vmem>>, %arg7: memref<2x4x32x8xbf16, #tpu.memory_space<vmem>>, %arg8: memref<2x4x1x8xf32, #tpu.memory_space<vmem>>, %arg9: memref<2x4x8x32xbf16, #tpu.memory_space<vmem>>, %arg10: memref<2x32xf32, #tpu.memory_space<vmem>>, %arg11: memref<2x4x32x8xbf16, #tpu.memory_space<vmem>>, %arg12: memref<2x4x1x8xf32, #tpu.memory_space<vmem>>, %arg13: memref<2x4x32x8xbf16, #tpu.memory_space<vmem>>, %arg14: memref<2x4x1x8xf32, #tpu.memory_space<vmem>>, %arg15: memref<2x4x32x8xbf16, #tpu.memory_space<vmem>>, %arg16: memref<2x4x1x8xf32, #tpu.memory_space<vmem>>, %arg17: memref<2x4x8x32xbf16, #tpu.memory_space<vmem>>, %arg18: memref<2x32xf32, #tpu.memory_space<vmem>>, %arg19: memref<2x32xf32, #tpu.memory_space<vmem>>, %arg20: memref<2x32xf32, #tpu.memory_space<vmem>>, %arg21: memref<2x32xf32, #tpu.memory_space<vmem>>, %arg22: memref<2x32xf32, #tpu.memory_space<vmem>>, %arg23: memref<2x32xf32, #tpu.memory_space<vmem>>, %arg24: memref<2x32xf32, #tpu.memory_space<vmem>>, %arg25: memref<2x32x2048xbf16, #tpu.memory_space<vmem>>, %arg26: memref<2x2048xf32, #tpu.memory_space<vmem>>, %arg27: memref<2x2048x32xbf16, #tpu.memory_space<vmem>>, %arg28: memref<2x32xf32, #tpu.memory_space<vmem>>, %arg29: memref<32x512xbf16, #tpu.memory_space<vmem>>, %arg30: memref<1x512xf32, #tpu.memory_space<vmem>>, %arg31: memref<1x8x512xf32, #tpu.memory_space<vmem>>, %arg32: memref<8x32xf32, #tpu.memory_space<vmem>>) attributes {dimension_semantics = [#tpu.dimension_semantics<parallel>], iteration_bounds = array<i64: 2>, scalar_prefetch = 1 : i64, scratch_operands = 1 : i64, tpu.core_type = #tpu.core_type<tc>, window_params = [{pipeline_mode = #tpu.pipeline_mode<synchronous>, transform_indices = @transform_0, window_bounds = array<i64: 512, 32>}, {pipeline_mode = #tpu.pipeline_mode<synchronous>, transform_indices = @transform_1, window_bounds = array<i64: 2, 4, 32, 8>}, {pipeline_mode = #tpu.pipeline_mode<synchronous>, transform_indices = @transform_2, window_bounds = array<i64: 2, 4, 1, 8>}, {pipeline_mode = #tpu.pipeline_mode<synchronous>, transform_indices = @transform_3, window_bounds = array<i64: 2, 4, 32, 8>}, {pipeline_mode = #tpu.pipeline_mode<synchronous>, transform_indices = @transform_4, window_bounds = array<i64: 2, 4, 1, 8>}, {pipeline_mode = #tpu.pipeline_mode<synchronous>, transform_indices = @transform_5, window_bounds = array<i64: 2, 4, 32, 8>}, {pipeline_mode = #tpu.pipeline_mode<synchronous>, transform_indices = @transform_6, window_bounds = array<i64: 2, 4, 1, 8>}, {pipeline_mode = #tpu.pipeline_mode<synchronous>, transform_indices = @transform_7, window_bounds = array<i64: 2, 4, 8, 32>}, {pipeline_mode = #tpu.pipeline_mode<synchronous>, transform_indices = @transform_8, window_bounds = array<i64: 2, 32>}, {pipeline_mode = #tpu.pipeline_mode<synchronous>, transform_indices = @transform_9, window_bounds = array<i64: 2, 4, 32, 8>}, {pipeline_mode = #tpu.pipeline_mode<synchronous>, transform_indices = @transform_10, window_bounds = array<i64: 2, 4, 1, 8>}, {pipeline_mode = #tpu.pipeline_mode<synchronous>, transform_indices = @transform_11, window_bounds = array<i64: 2, 4, 32, 8>}, {pipeline_mode = #tpu.pipeline_mode<synchronous>, transform_indices = @transform_12, window_bounds = array<i64: 2, 4, 1, 8>}, {pipeline_mode = #tpu.pipeline_mode<synchronous>, transform_indices = @transform_13, window_bounds = array<i64: 2, 4, 32, 8>}, {pipeline_mode = #tpu.pipeline_mode<synchronous>, transform_indices = @transform_14, window_bounds = array<i64: 2, 4, 1, 8>}, {pipeline_mode = #tpu.pipeline_mode<synchronous>, transform_indices = @transform_15, window_bounds = array<i64: 2, 4, 8, 32>}, {pipeline_mode = #tpu.pipeline_mode<synchronous>, transform_indices = @transform_16, window_bounds = array<i64: 2, 32>}, {pipeline_mode = #tpu.pipeline_mode<synchronous>, transform_indices = @transform_17, window_bounds = array<i64: 2, 32>}, {pipeline_mode = #tpu.pipeline_mode<synchronous>, transform_indices = @transform_18, window_bounds = array<i64: 2, 32>}, {pipeline_mode = #tpu.pipeline_mode<synchronous>, transform_indices = @transform_19, window_bounds = array<i64: 2, 32>}, {pipeline_mode = #tpu.pipeline_mode<synchronous>, transform_indices = @transform_20, window_bounds = array<i64: 2, 32>}, {pipeline_mode = #tpu.pipeline_mode<synchronous>, transform_indices = @transform_21, window_bounds = array<i64: 2, 32>}, {pipeline_mode = #tpu.pipeline_mode<synchronous>, transform_indices = @transform_22, window_bounds = array<i64: 2, 32>}, {pipeline_mode = #tpu.pipeline_mode<synchronous>, transform_indices = @transform_23, window_bounds = array<i64: 2, 32, 2048>}, {pipeline_mode = #tpu.pipeline_mode<synchronous>, transform_indices = @transform_24, window_bounds = array<i64: 2, 2048>}, {pipeline_mode = #tpu.pipeline_mode<synchronous>, transform_indices = @transform_25, window_bounds = array<i64: 2, 2048, 32>}, {pipeline_mode = #tpu.pipeline_mode<synchronous>, transform_indices = @transform_26, window_bounds = array<i64: 2, 32>}, {pipeline_mode = #tpu.pipeline_mode<synchronous>, transform_indices = @transform_27, window_bounds = array<i64: 32, 512>}, {pipeline_mode = #tpu.pipeline_mode<synchronous>, transform_indices = @transform_28, window_bounds = array<i64: 1, 512>}, {transform_indices = @transform_29, window_bounds = array<i64: 1, 8, 512>}]} {
    %c8_i32 = arith.constant 8 : i32
    %0 = arith.muli %arg0, %c8_i32 : i32
    %c0_i32 = arith.constant 0 : i32
    %1 = arith.addi %0, %c0_i32 : i32
    %2 = arith.index_cast %1 : i32 to index
    %3 = memref.load %arg1[%2] : memref<16xi32, #tpu.memory_space<smem>>
    %4 = arith.index_cast %3 : i32 to index
    %c0 = arith.constant 0 : index
    %5 = vector.load %arg2[%4, %c0] : memref<512x32xf32, #tpu.memory_space<vmem>>, vector<1x32xf32>
    %c0_0 = arith.constant 0 : index
    %c0_1 = arith.constant 0 : index
    %6 = vector.load %arg32[%c0_0, %c0_1] : memref<8x32xf32, #tpu.memory_space<vmem>>, vector<1x32xf32>
    tpu.vector_store %arg32[%c0_0, %c0_1], %5 {strides = array<i32>} : memref<8x32xf32, #tpu.memory_space<vmem>>, vector<1x32xf32>,
    %c8_i32_2 = arith.constant 8 : i32
    %7 = arith.muli %arg0, %c8_i32_2 : i32
    %c1_i32 = arith.constant 1 : i32
    %8 = arith.addi %7, %c1_i32 : i32
    %9 = arith.index_cast %8 : i32 to index
    %10 = memref.load %arg1[%9] : memref<16xi32, #tpu.memory_space<smem>>
    %11 = arith.index_cast %10 : i32 to index
    %c0_3 = arith.constant 0 : index
    %12 = vector.load %arg2[%11, %c0_3] : memref<512x32xf32, #tpu.memory_space<vmem>>, vector<1x32xf32>
    %c1 = arith.constant 1 : index
    %c0_4 = arith.constant 0 : index
    %13 = vector.load %arg32[%c1, %c0_4] : memref<8x32xf32, #tpu.memory_space<vmem>>, vector<1x32xf32>
    tpu.vector_store %arg32[%c1, %c0_4], %12 {strides = array<i32>} : memref<8x32xf32, #tpu.memory_space<vmem>>, vector<1x32xf32>,
    %c8_i32_5 = arith.constant 8 : i32
    %14 = arith.muli %arg0, %c8_i32_5 : i32
    %c2_i32 = arith.constant 2 : i32
    %15 = arith.addi %14, %c2_i32 : i32
    %16 = arith.index_cast %15 : i32 to index
    %17 = memref.load %arg1[%16] : memref<16xi32, #tpu.memory_space<smem>>
    %18 = arith.index_cast %17 : i32 to index
    %c0_6 = arith.constant 0 : index
    %19 = vector.load %arg2[%18, %c0_6] : memref<512x32xf32, #tpu.memory_space<vmem>>, vector<1x32xf32>
    %c2 = arith.constant 2 : index
    %c0_7 = arith.constant 0 : index
    %20 = vector.load %arg32[%c2, %c0_7] : memref<8x32xf32, #tpu.memory_space<vmem>>, vector<1x32xf32>
    tpu.vector_store %arg32[%c2, %c0_7], %19 {strides = array<i32>} : memref<8x32xf32, #tpu.memory_space<vmem>>, vector<1x32xf32>,
    %c8_i32_8 = arith.constant 8 : i32
    %21 = arith.muli %arg0, %c8_i32_8 : i32
    %c3_i32 = arith.constant 3 : i32
    %22 = arith.addi %21, %c3_i32 : i32
    %23 = arith.index_cast %22 : i32 to index
    %24 = memref.load %arg1[%23] : memref<16xi32, #tpu.memory_space<smem>>
    %25 = arith.index_cast %24 : i32 to index
    %c0_9 = arith.constant 0 : index
    %26 = vector.load %arg2[%25, %c0_9] : memref<512x32xf32, #tpu.memory_space<vmem>>, vector<1x32xf32>
    %c3 = arith.constant 3 : index
    %c0_10 = arith.constant 0 : index
    %27 = vector.load %arg32[%c3, %c0_10] : memref<8x32xf32, #tpu.memory_space<vmem>>, vector<1x32xf32>
    tpu.vector_store %arg32[%c3, %c0_10], %26 {strides = array<i32>} : memref<8x32xf32, #tpu.memory_space<vmem>>, vector<1x32xf32>,
    %c8_i32_11 = arith.constant 8 : i32
    %28 = arith.muli %arg0, %c8_i32_11 : i32
    %c4_i32 = arith.constant 4 : i32
    %29 = arith.addi %28, %c4_i32 : i32
    %30 = arith.index_cast %29 : i32 to index
    %31 = memref.load %arg1[%30] : memref<16xi32, #tpu.memory_space<smem>>
    %32 = arith.index_cast %31 : i32 to index
    %c0_12 = arith.constant 0 : index
    %33 = vector.load %arg2[%32, %c0_12] : memref<512x32xf32, #tpu.memory_space<vmem>>, vector<1x32xf32>
    %c4 = arith.constant 4 : index
    %c0_13 = arith.constant 0 : index
    %34 = vector.load %arg32[%c4, %c0_13] : memref<8x32xf32, #tpu.memory_space<vmem>>, vector<1x32xf32>
    tpu.vector_store %arg32[%c4, %c0_13], %33 {strides = array<i32>} : memref<8x32xf32, #tpu.memory_space<vmem>>, vector<1x32xf32>,
    %c8_i32_14 = arith.constant 8 : i32
    %35 = arith.muli %arg0, %c8_i32_14 : i32
    %c5_i32 = arith.constant 5 : i32
    %36 = arith.addi %35, %c5_i32 : i32
    %37 = arith.index_cast %36 : i32 to index
    %38 = memref.load %arg1[%37] : memref<16xi32, #tpu.memory_space<smem>>
    %39 = arith.index_cast %38 : i32 to index
    %c0_15 = arith.constant 0 : index
    %40 = vector.load %arg2[%39, %c0_15] : memref<512x32xf32, #tpu.memory_space<vmem>>, vector<1x32xf32>
    %c5 = arith.constant 5 : index
    %c0_16 = arith.constant 0 : index
    %41 = vector.load %arg32[%c5, %c0_16] : memref<8x32xf32, #tpu.memory_space<vmem>>, vector<1x32xf32>
    tpu.vector_store %arg32[%c5, %c0_16], %40 {strides = array<i32>} : memref<8x32xf32, #tpu.memory_space<vmem>>, vector<1x32xf32>,
    %c8_i32_17 = arith.constant 8 : i32
    %42 = arith.muli %arg0, %c8_i32_17 : i32
    %c6_i32 = arith.constant 6 : i32
    %43 = arith.addi %42, %c6_i32 : i32
    %44 = arith.index_cast %43 : i32 to index
    %45 = memref.load %arg1[%44] : memref<16xi32, #tpu.memory_space<smem>>
    %46 = arith.index_cast %45 : i32 to index
    %c0_18 = arith.constant 0 : index
    %47 = vector.load %arg2[%46, %c0_18] : memref<512x32xf32, #tpu.memory_space<vmem>>, vector<1x32xf32>
    %c6 = arith.constant 6 : index
    %c0_19 = arith.constant 0 : index
    %48 = vector.load %arg32[%c6, %c0_19] : memref<8x32xf32, #tpu.memory_space<vmem>>, vector<1x32xf32>
    tpu.vector_store %arg32[%c6, %c0_19], %47 {strides = array<i32>} : memref<8x32xf32, #tpu.memory_space<vmem>>, vector<1x32xf32>,
    %c8_i32_20 = arith.constant 8 : i32
    %49 = arith.muli %arg0, %c8_i32_20 : i32
    %c7_i32 = arith.constant 7 : i32
    %50 = arith.addi %49, %c7_i32 : i32
    %51 = arith.index_cast %50 : i32 to index
    %52 = memref.load %arg1[%51] : memref<16xi32, #tpu.memory_space<smem>>
    %53 = arith.index_cast %52 : i32 to index
    %c0_21 = arith.constant 0 : index
    %54 = vector.load %arg2[%53, %c0_21] : memref<512x32xf32, #tpu.memory_space<vmem>>, vector<1x32xf32>
    %c7 = arith.constant 7 : index
    %c0_22 = arith.constant 0 : index
    %55 = vector.load %arg32[%c7, %c0_22] : memref<8x32xf32, #tpu.memory_space<vmem>>, vector<1x32xf32>
    tpu.vector_store %arg32[%c7, %c0_22], %54 {strides = array<i32>} : memref<8x32xf32, #tpu.memory_space<vmem>>, vector<1x32xf32>,
    %c0_23 = arith.constant 0 : index
    %c0_24 = arith.constant 0 : index
    %56 = vector.load %arg32[%c0_23, %c0_24] : memref<8x32xf32, #tpu.memory_space<vmem>>, vector<8x32xf32>
    %c0_25 = arith.constant 0 : index
    %c0_26 = arith.constant 0 : index
    %c0_27 = arith.constant 0 : index
    %c0_28 = arith.constant 0 : index
    %57 = vector.load %arg3[%c0_25, %c0_26, %c0_27, %c0_28] : memref<2x4x32x8xbf16, #tpu.memory_space<vmem>>, vector<1x4x32x8xbf16>
    %58 = vector.shape_cast %57 : vector<1x4x32x8xbf16> to vector<4x32x8xbf16>
    %c0_29 = arith.constant 0 : index
    %c0_30 = arith.constant 0 : index
    %c0_31 = arith.constant 0 : index
    %c0_32 = arith.constant 0 : index
    %59 = vector.load %arg4[%c0_29, %c0_30, %c0_31, %c0_32] : memref<2x4x1x8xf32, #tpu.memory_space<vmem>>, vector<1x4x1x8xf32>
    %60 = vector.shape_cast %59 : vector<1x4x1x8xf32> to vector<4x1x8xf32>
    %c0_33 = arith.constant 0 : index
    %c0_34 = arith.constant 0 : index
    %c0_35 = arith.constant 0 : index
    %c0_36 = arith.constant 0 : index
    %61 = vector.load %arg5[%c0_33, %c0_34, %c0_35, %c0_36] : memref<2x4x32x8xbf16, #tpu.memory_space<vmem>>, vector<1x4x32x8xbf16>
    %62 = vector.shape_cast %61 : vector<1x4x32x8xbf16> to vector<4x32x8xbf16>
    %c0_37 = arith.constant 0 : index
    %c0_38 = arith.constant 0 : index
    %c0_39 = arith.constant 0 : index
    %c0_40 = arith.constant 0 : index
    %63 = vector.load %arg6[%c0_37, %c0_38, %c0_39, %c0_40] : memref<2x4x1x8xf32, #tpu.memory_space<vmem>>, vector<1x4x1x8xf32>
    %64 = vector.shape_cast %63 : vector<1x4x1x8xf32> to vector<4x1x8xf32>
    %c0_41 = arith.constant 0 : index
    %c0_42 = arith.constant 0 : index
    %c0_43 = arith.constant 0 : index
    %c0_44 = arith.constant 0 : index
    %65 = vector.load %arg7[%c0_41, %c0_42, %c0_43, %c0_44] : memref<2x4x32x8xbf16, #tpu.memory_space<vmem>>, vector<1x4x32x8xbf16>
    %66 = vector.shape_cast %65 : vector<1x4x32x8xbf16> to vector<4x32x8xbf16>
    %c0_45 = arith.constant 0 : index
    %c0_46 = arith.constant 0 : index
    %c0_47 = arith.constant 0 : index
    %c0_48 = arith.constant 0 : index
    %67 = vector.load %arg8[%c0_45, %c0_46, %c0_47, %c0_48] : memref<2x4x1x8xf32, #tpu.memory_space<vmem>>, vector<1x4x1x8xf32>
    %68 = vector.shape_cast %67 : vector<1x4x1x8xf32> to vector<4x1x8xf32>
    %c0_49 = arith.constant 0 : index
    %c0_50 = arith.constant 0 : index
    %c0_51 = arith.constant 0 : index
    %c0_52 = arith.constant 0 : index
    %69 = vector.load %arg9[%c0_49, %c0_50, %c0_51, %c0_52] : memref<2x4x8x32xbf16, #tpu.memory_space<vmem>>, vector<1x4x8x32xbf16>
    %70 = vector.shape_cast %69 : vector<1x4x8x32xbf16> to vector<4x8x32xbf16>
    %c0_53 = arith.constant 0 : index
    %c0_54 = arith.constant 0 : index
    %71 = vector.load %arg10[%c0_53, %c0_54] : memref<2x32xf32, #tpu.memory_space<vmem>>, vector<1x32xf32>
    %72 = arith.truncf %56 : vector<8x32xf32> to vector<8x32xbf16>
    %73 = vector.shape_cast %72 : vector<8x32xbf16> to vector<1x8x32xbf16>
    %74 = vector.shape_cast %73 : vector<1x8x32xbf16> to vector<1x8x32xbf16>
    %75 = vector.broadcast %74 : vector<1x8x32xbf16> to vector<4x8x32xbf16>
    %76 = arith.truncf %56 : vector<8x32xf32> to vector<8x32xbf16>
    %77 = vector.shape_cast %76 : vector<8x32xbf16> to vector<1x8x32xbf16>
    %78 = vector.shape_cast %77 : vector<1x8x32xbf16> to vector<1x8x32xbf16>
    %79 = vector.broadcast %78 : vector<1x8x32xbf16> to vector<4x8x32xbf16>
    %cst = arith.constant dense<0.000000e+00> : vector<4x8x8xf32>
    %80 = tpu.matmul %75, %58, %cst {dimension_numbers = #tpu.dot_dimension_numbers<[2], [1], [1], [2], [0, 0, 0, 1, 1, 2], [0], [0]>} : vector<4x8x32xbf16>, vector<4x32x8xbf16>, vector<4x8x8xf32> -> vector<4x8x8xf32>
    %81 = vector.broadcast %60 : vector<4x1x8xf32> to vector<4x8x8xf32>
    %82 = arith.addf %80, %81 : vector<4x8x8xf32>
    %cst_55 = arith.constant dense<0.000000e+00> : vector<4x8x8xf32>
    %83 = tpu.matmul %79, %62, %cst_55 {dimension_numbers = #tpu.dot_dimension_numbers<[2], [1], [1], [2], [0, 0, 0, 1, 1, 2], [0], [0]>} : vector<4x8x32xbf16>, vector<4x32x8xbf16>, vector<4x8x8xf32> -> vector<4x8x8xf32>
    %84 = vector.broadcast %64 : vector<4x1x8xf32> to vector<4x8x8xf32>
    %85 = arith.addf %83, %84 : vector<4x8x8xf32>
    %cst_56 = arith.constant dense<0.000000e+00> : vector<4x8x8xf32>
    %86 = tpu.matmul %79, %66, %cst_56 {dimension_numbers = #tpu.dot_dimension_numbers<[2], [1], [1], [2], [0, 0, 0, 1, 1, 2], [0], [0]>} : vector<4x8x32xbf16>, vector<4x32x8xbf16>, vector<4x8x8xf32> -> vector<4x8x8xf32>
    %87 = vector.broadcast %68 : vector<4x1x8xf32> to vector<4x8x8xf32>
    %88 = arith.addf %86, %87 : vector<4x8x8xf32>
    %89 = arith.truncf %82 : vector<4x8x8xf32> to vector<4x8x8xbf16>
    %90 = arith.truncf %85 : vector<4x8x8xf32> to vector<4x8x8xbf16>
    %cst_57 = arith.constant dense<0.000000e+00> : vector<4x8x8xf32>
    %91 = tpu.matmul %89, %90, %cst_57 {dimension_numbers = #tpu.dot_dimension_numbers<[2], [2], [1], [1], [0, 0, 0, 1, 1, 1], [0], [0]>} : vector<4x8x8xbf16>, vector<4x8x8xbf16>, vector<4x8x8xf32> -> vector<4x8x8xf32>
    %cst_58 = arith.constant 0.353553385 : f32
    %92 = vector.broadcast %cst_58 : f32 to vector<4x8x8xf32>
    %93 = arith.mulf %91, %92 : vector<4x8x8xf32>
    %cst_59 = arith.constant dense<0xFF800000> : vector<4x8xf32>
    %94 = vector.multi_reduction <maximumf>, %93, %cst_59 [2] : vector<4x8x8xf32> to vector<4x8xf32>
    %95 = vector.shape_cast %94 : vector<4x8xf32> to vector<4x8x1xf32>
    %96 = vector.broadcast %95 : vector<4x8x1xf32> to vector<4x8x8xf32>
    %97 = arith.subf %93, %96 : vector<4x8x8xf32>
    %98 = math.exp %97 : vector<4x8x8xf32>
    %cst_60 = arith.constant dense<0.000000e+00> : vector<4x8xf32>
    %99 = vector.multi_reduction <add>, %98, %cst_60 [2] : vector<4x8x8xf32> to vector<4x8xf32>
    %100 = vector.shape_cast %99 : vector<4x8xf32> to vector<4x8x1xf32>
    %101 = tpu.reciprocal %100 {approx = true} : vector<4x8x1xf32> -> vector<4x8x1xf32>
    %102 = vector.broadcast %101 : vector<4x8x1xf32> to vector<4x8x8xf32>
    %103 = arith.mulf %98, %102 : vector<4x8x8xf32>
    %104 = arith.truncf %103 : vector<4x8x8xf32> to vector<4x8x8xbf16>
    %105 = arith.truncf %88 : vector<4x8x8xf32> to vector<4x8x8xbf16>
    %cst_61 = arith.constant dense<0.000000e+00> : vector<4x8x8xf32>
    %106 = tpu.matmul %104, %105, %cst_61 {dimension_numbers = #tpu.dot_dimension_numbers<[2], [1], [1], [2], [0, 0, 0, 1, 1, 2], [0], [0]>} : vector<4x8x8xbf16>, vector<4x8x8xbf16>, vector<4x8x8xf32> -> vector<4x8x8xf32>
    %107 = arith.truncf %106 : vector<4x8x8xf32> to vector<4x8x8xbf16>
    %cst_62 = arith.constant dense<0.000000e+00> : vector<4x8x32xf32>
    %108 = tpu.matmul %107, %70, %cst_62 {dimension_numbers = #tpu.dot_dimension_numbers<[2], [1], [1], [2], [0, 0, 0, 1, 1, 2], [0], [0]>} : vector<4x8x8xbf16>, vector<4x8x32xbf16>, vector<4x8x32xf32> -> vector<4x8x32xf32>
    %cst_63 = arith.constant dense<0.000000e+00> : vector<8x32xf32>
    %109 = vector.multi_reduction <add>, %108, %cst_63 [0] : vector<4x8x32xf32> to vector<8x32xf32>
    %110 = vector.broadcast %71 : vector<1x32xf32> to vector<8x32xf32>
    %111 = arith.addf %109, %110 : vector<8x32xf32>
    %c0_64 = arith.constant 0 : index
    %c0_65 = arith.constant 0 : index
    %112 = vector.load %arg19[%c0_64, %c0_65] : memref<2x32xf32, #tpu.memory_space<vmem>>, vector<1x32xf32>
    %c0_66 = arith.constant 0 : index
    %c0_67 = arith.constant 0 : index
    %113 = vector.load %arg20[%c0_66, %c0_67] : memref<2x32xf32, #tpu.memory_space<vmem>>, vector<1x32xf32>
    %114 = arith.addf %111, %56 : vector<8x32xf32>
    %cst_68 = arith.constant dense<0.000000e+00> : vector<8xf32>
    %115 = vector.multi_reduction <add>, %114, %cst_68 [1] : vector<8x32xf32> to vector<8xf32>
    %116 = vector.shape_cast %115 : vector<8xf32> to vector<8x1xf32>
    %cst_69 = arith.constant 3.200000e+01 : f32
    %117 = vector.broadcast %cst_69 : f32 to vector<8x1xf32>
    %118 = arith.divf %116, %117 : vector<8x1xf32>
    %119 = vector.broadcast %118 : vector<8x1xf32> to vector<8x32xf32>
    %120 = arith.subf %114, %119 : vector<8x32xf32>
    %121 = arith.mulf %120, %120 : vector<8x32xf32>
    %cst_70 = arith.constant dense<0.000000e+00> : vector<8xf32>
    %122 = vector.multi_reduction <add>, %121, %cst_70 [1] : vector<8x32xf32> to vector<8xf32>
    %123 = vector.shape_cast %122 : vector<8xf32> to vector<8x1xf32>
    %cst_71 = arith.constant 3.200000e+01 : f32
    %124 = vector.broadcast %cst_71 : f32 to vector<8x1xf32>
    %125 = arith.divf %123, %124 : vector<8x1xf32>
    %126 = vector.broadcast %118 : vector<8x1xf32> to vector<8x32xf32>
    %127 = arith.subf %114, %126 : vector<8x32xf32>
    %cst_72 = arith.constant 9.99999974E-6 : f32
    %128 = vector.broadcast %cst_72 : f32 to vector<8x1xf32>
    %129 = arith.addf %125, %128 : vector<8x1xf32>
    %130 = math.rsqrt %129 : vector<8x1xf32>
    %131 = vector.broadcast %130 : vector<8x1xf32> to vector<8x32xf32>
    %132 = arith.mulf %127, %131 : vector<8x32xf32>
    %133 = vector.broadcast %112 : vector<1x32xf32> to vector<8x32xf32>
    %134 = arith.mulf %132, %133 : vector<8x32xf32>
    %135 = vector.broadcast %113 : vector<1x32xf32> to vector<8x32xf32>
    %136 = arith.addf %134, %135 : vector<8x32xf32>
    %c0_73 = arith.constant 0 : index
    %c0_74 = arith.constant 0 : index
    %c0_75 = arith.constant 0 : index
    %c0_76 = arith.constant 0 : index
    %137 = vector.load %arg11[%c0_73, %c0_74, %c0_75, %c0_76] : memref<2x4x32x8xbf16, #tpu.memory_space<vmem>>, vector<1x4x32x8xbf16>
    %138 = vector.shape_cast %137 : vector<1x4x32x8xbf16> to vector<4x32x8xbf16>
    %c0_77 = arith.constant 0 : index
    %c0_78 = arith.constant 0 : index
    %c0_79 = arith.constant 0 : index
    %c0_80 = arith.constant 0 : index
    %139 = vector.load %arg12[%c0_77, %c0_78, %c0_79, %c0_80] : memref<2x4x1x8xf32, #tpu.memory_space<vmem>>, vector<1x4x1x8xf32>
    %140 = vector.shape_cast %139 : vector<1x4x1x8xf32> to vector<4x1x8xf32>
    %c0_81 = arith.constant 0 : index
    %c0_82 = arith.constant 0 : index
    %c0_83 = arith.constant 0 : index
    %c0_84 = arith.constant 0 : index
    %141 = vector.load %arg13[%c0_81, %c0_82, %c0_83, %c0_84] : memref<2x4x32x8xbf16, #tpu.memory_space<vmem>>, vector<1x4x32x8xbf16>
    %142 = vector.shape_cast %141 : vector<1x4x32x8xbf16> to vector<4x32x8xbf16>
    %c0_85 = arith.constant 0 : index
    %c0_86 = arith.constant 0 : index
    %c0_87 = arith.constant 0 : index
    %c0_88 = arith.constant 0 : index
    %143 = vector.load %arg14[%c0_85, %c0_86, %c0_87, %c0_88] : memref<2x4x1x8xf32, #tpu.memory_space<vmem>>, vector<1x4x1x8xf32>
    %144 = vector.shape_cast %143 : vector<1x4x1x8xf32> to vector<4x1x8xf32>
    %c0_89 = arith.constant 0 : index
    %c0_90 = arith.constant 0 : index
    %c0_91 = arith.constant 0 : index
    %c0_92 = arith.constant 0 : index
    %145 = vector.load %arg15[%c0_89, %c0_90, %c0_91, %c0_92] : memref<2x4x32x8xbf16, #tpu.memory_space<vmem>>, vector<1x4x32x8xbf16>
    %146 = vector.shape_cast %145 : vector<1x4x32x8xbf16> to vector<4x32x8xbf16>
    %c0_93 = arith.constant 0 : index
    %c0_94 = arith.constant 0 : index
    %c0_95 = arith.constant 0 : index
    %c0_96 = arith.constant 0 : index
    %147 = vector.load %arg16[%c0_93, %c0_94, %c0_95, %c0_96] : memref<2x4x1x8xf32, #tpu.memory_space<vmem>>, vector<1x4x1x8xf32>
    %148 = vector.shape_cast %147 : vector<1x4x1x8xf32> to vector<4x1x8xf32>
    %c0_97 = arith.constant 0 : index
    %c0_98 = arith.constant 0 : index
    %c0_99 = arith.constant 0 : index
    %c0_100 = arith.constant 0 : index
    %149 = vector.load %arg17[%c0_97, %c0_98, %c0_99, %c0_100] : memref<2x4x8x32xbf16, #tpu.memory_space<vmem>>, vector<1x4x8x32xbf16>
    %150 = vector.shape_cast %149 : vector<1x4x8x32xbf16> to vector<4x8x32xbf16>
    %c0_101 = arith.constant 0 : index
    %c0_102 = arith.constant 0 : index
    %151 = vector.load %arg18[%c0_101, %c0_102] : memref<2x32xf32, #tpu.memory_space<vmem>>, vector<1x32xf32>
    %152 = arith.truncf %136 : vector<8x32xf32> to vector<8x32xbf16>
    %153 = vector.shape_cast %152 : vector<8x32xbf16> to vector<1x8x32xbf16>
    %154 = vector.shape_cast %153 : vector<1x8x32xbf16> to vector<1x8x32xbf16>
    %155 = vector.broadcast %154 : vector<1x8x32xbf16> to vector<4x8x32xbf16>
    %156 = arith.truncf %56 : vector<8x32xf32> to vector<8x32xbf16>
    %157 = vector.shape_cast %156 : vector<8x32xbf16> to vector<1x8x32xbf16>
    %158 = vector.shape_cast %157 : vector<1x8x32xbf16> to vector<1x8x32xbf16>
    %159 = vector.broadcast %158 : vector<1x8x32xbf16> to vector<4x8x32xbf16>
    %cst_103 = arith.constant dense<0.000000e+00> : vector<4x8x8xf32>
    %160 = tpu.matmul %155, %138, %cst_103 {dimension_numbers = #tpu.dot_dimension_numbers<[2], [1], [1], [2], [0, 0, 0, 1, 1, 2], [0], [0]>} : vector<4x8x32xbf16>, vector<4x32x8xbf16>, vector<4x8x8xf32> -> vector<4x8x8xf32>
    %161 = vector.broadcast %140 : vector<4x1x8xf32> to vector<4x8x8xf32>
    %162 = arith.addf %160, %161 : vector<4x8x8xf32>
    %cst_104 = arith.constant dense<0.000000e+00> : vector<4x8x8xf32>
    %163 = tpu.matmul %159, %142, %cst_104 {dimension_numbers = #tpu.dot_dimension_numbers<[2], [1], [1], [2], [0, 0, 0, 1, 1, 2], [0], [0]>} : vector<4x8x32xbf16>, vector<4x32x8xbf16>, vector<4x8x8xf32> -> vector<4x8x8xf32>
    %164 = vector.broadcast %144 : vector<4x1x8xf32> to vector<4x8x8xf32>
    %165 = arith.addf %163, %164 : vector<4x8x8xf32>
    %cst_105 = arith.constant dense<0.000000e+00> : vector<4x8x8xf32>
    %166 = tpu.matmul %159, %146, %cst_105 {dimension_numbers = #tpu.dot_dimension_numbers<[2], [1], [1], [2], [0, 0, 0, 1, 1, 2], [0], [0]>} : vector<4x8x32xbf16>, vector<4x32x8xbf16>, vector<4x8x8xf32> -> vector<4x8x8xf32>
    %167 = vector.broadcast %148 : vector<4x1x8xf32> to vector<4x8x8xf32>
    %168 = arith.addf %166, %167 : vector<4x8x8xf32>
    %169 = arith.truncf %162 : vector<4x8x8xf32> to vector<4x8x8xbf16>
    %170 = arith.truncf %165 : vector<4x8x8xf32> to vector<4x8x8xbf16>
    %cst_106 = arith.constant dense<0.000000e+00> : vector<4x8x8xf32>
    %171 = tpu.matmul %169, %170, %cst_106 {dimension_numbers = #tpu.dot_dimension_numbers<[2], [2], [1], [1], [0, 0, 0, 1, 1, 1], [0], [0]>} : vector<4x8x8xbf16>, vector<4x8x8xbf16>, vector<4x8x8xf32> -> vector<4x8x8xf32>
    %cst_107 = arith.constant 0.353553385 : f32
    %172 = vector.broadcast %cst_107 : f32 to vector<4x8x8xf32>
    %173 = arith.mulf %171, %172 : vector<4x8x8xf32>
    %cst_108 = arith.constant dense<0xFF800000> : vector<4x8xf32>
    %174 = vector.multi_reduction <maximumf>, %173, %cst_108 [2] : vector<4x8x8xf32> to vector<4x8xf32>
    %175 = vector.shape_cast %174 : vector<4x8xf32> to vector<4x8x1xf32>
    %176 = vector.broadcast %175 : vector<4x8x1xf32> to vector<4x8x8xf32>
    %177 = arith.subf %173, %176 : vector<4x8x8xf32>
    %178 = math.exp %177 : vector<4x8x8xf32>
    %cst_109 = arith.constant dense<0.000000e+00> : vector<4x8xf32>
    %179 = vector.multi_reduction <add>, %178, %cst_109 [2] : vector<4x8x8xf32> to vector<4x8xf32>
    %180 = vector.shape_cast %179 : vector<4x8xf32> to vector<4x8x1xf32>
    %181 = tpu.reciprocal %180 {approx = true} : vector<4x8x1xf32> -> vector<4x8x1xf32>
    %182 = vector.broadcast %181 : vector<4x8x1xf32> to vector<4x8x8xf32>
    %183 = arith.mulf %178, %182 : vector<4x8x8xf32>
    %184 = arith.truncf %183 : vector<4x8x8xf32> to vector<4x8x8xbf16>
    %185 = arith.truncf %168 : vector<4x8x8xf32> to vector<4x8x8xbf16>
    %cst_110 = arith.constant dense<0.000000e+00> : vector<4x8x8xf32>
    %186 = tpu.matmul %184, %185, %cst_110 {dimension_numbers = #tpu.dot_dimension_numbers<[2], [1], [1], [2], [0, 0, 0, 1, 1, 2], [0], [0]>} : vector<4x8x8xbf16>, vector<4x8x8xbf16>, vector<4x8x8xf32> -> vector<4x8x8xf32>
    %187 = arith.truncf %186 : vector<4x8x8xf32> to vector<4x8x8xbf16>
    %cst_111 = arith.constant dense<0.000000e+00> : vector<4x8x32xf32>
    %188 = tpu.matmul %187, %150, %cst_111 {dimension_numbers = #tpu.dot_dimension_numbers<[2], [1], [1], [2], [0, 0, 0, 1, 1, 2], [0], [0]>} : vector<4x8x8xbf16>, vector<4x8x32xbf16>, vector<4x8x32xf32> -> vector<4x8x32xf32>
    %cst_112 = arith.constant dense<0.000000e+00> : vector<8x32xf32>
    %189 = vector.multi_reduction <add>, %188, %cst_112 [0] : vector<4x8x32xf32> to vector<8x32xf32>
    %190 = vector.broadcast %151 : vector<1x32xf32> to vector<8x32xf32>
    %191 = arith.addf %189, %190 : vector<8x32xf32>
    %c0_113 = arith.constant 0 : index
    %c0_114 = arith.constant 0 : index
    %192 = vector.load %arg21[%c0_113, %c0_114] : memref<2x32xf32, #tpu.memory_space<vmem>>, vector<1x32xf32>
    %c0_115 = arith.constant 0 : index
    %c0_116 = arith.constant 0 : index
    %193 = vector.load %arg22[%c0_115, %c0_116] : memref<2x32xf32, #tpu.memory_space<vmem>>, vector<1x32xf32>
    %194 = arith.addf %191, %136 : vector<8x32xf32>
    %cst_117 = arith.constant dense<0.000000e+00> : vector<8xf32>
    %195 = vector.multi_reduction <add>, %194, %cst_117 [1] : vector<8x32xf32> to vector<8xf32>
    %196 = vector.shape_cast %195 : vector<8xf32> to vector<8x1xf32>
    %cst_118 = arith.constant 3.200000e+01 : f32
    %197 = vector.broadcast %cst_118 : f32 to vector<8x1xf32>
    %198 = arith.divf %196, %197 : vector<8x1xf32>
    %199 = vector.broadcast %198 : vector<8x1xf32> to vector<8x32xf32>
    %200 = arith.subf %194, %199 : vector<8x32xf32>
    %201 = arith.mulf %200, %200 : vector<8x32xf32>
    %cst_119 = arith.constant dense<0.000000e+00> : vector<8xf32>
    %202 = vector.multi_reduction <add>, %201, %cst_119 [1] : vector<8x32xf32> to vector<8xf32>
    %203 = vector.shape_cast %202 : vector<8xf32> to vector<8x1xf32>
    %cst_120 = arith.constant 3.200000e+01 : f32
    %204 = vector.broadcast %cst_120 : f32 to vector<8x1xf32>
    %205 = arith.divf %203, %204 : vector<8x1xf32>
    %206 = vector.broadcast %198 : vector<8x1xf32> to vector<8x32xf32>
    %207 = arith.subf %194, %206 : vector<8x32xf32>
    %cst_121 = arith.constant 9.99999974E-6 : f32
    %208 = vector.broadcast %cst_121 : f32 to vector<8x1xf32>
    %209 = arith.addf %205, %208 : vector<8x1xf32>
    %210 = math.rsqrt %209 : vector<8x1xf32>
    %211 = vector.broadcast %210 : vector<8x1xf32> to vector<8x32xf32>
    %212 = arith.mulf %207, %211 : vector<8x32xf32>
    %213 = vector.broadcast %192 : vector<1x32xf32> to vector<8x32xf32>
    %214 = arith.mulf %212, %213 : vector<8x32xf32>
    %215 = vector.broadcast %193 : vector<1x32xf32> to vector<8x32xf32>
    %216 = arith.addf %214, %215 : vector<8x32xf32>
    %217 = arith.truncf %216 : vector<8x32xf32> to vector<8x32xbf16>
    %cst_122 = arith.constant 0.000000e+00 : f32
    %218 = vector.broadcast %cst_122 : f32 to vector<8x32xf32>
    %c0_123 = arith.constant 0 : index
    %c0_124 = arith.constant 0 : index
    %c0_125 = arith.constant 0 : index
    %219 = vector.load %arg25[%c0_123, %c0_124, %c0_125] : memref<2x32x2048xbf16, #tpu.memory_space<vmem>>, vector<1x32x512xbf16>
    %220 = vector.shape_cast %219 : vector<1x32x512xbf16> to vector<32x512xbf16>
    %cst_126 = arith.constant dense<0.000000e+00> : vector<8x512xf32>
    %221 = tpu.matmul %217, %220, %cst_126 {dimension_numbers = #tpu.dot_dimension_numbers<[1], [0], [0], [1], [0, 0, 1, 1], [], []>} : vector<8x32xbf16>, vector<32x512xbf16>, vector<8x512xf32> -> vector<8x512xf32>
    %c0_127 = arith.constant 0 : index
    %c0_128 = arith.constant 0 : index
    %222 = vector.load %arg26[%c0_127, %c0_128] : memref<2x2048xf32, #tpu.memory_space<vmem>>, vector<1x512xf32>
    %223 = vector.broadcast %222 : vector<1x512xf32> to vector<8x512xf32>
    %224 = arith.addf %221, %223 : vector<8x512xf32>
    %cst_129 = arith.constant 0.000000e+00 : f32
    %225 = vector.broadcast %cst_129 : f32 to vector<8x512xf32>
    %226 = arith.maximumf %224, %225 : vector<8x512xf32>
    %227 = arith.truncf %226 : vector<8x512xf32> to vector<8x512xbf16>
    %c0_130 = arith.constant 0 : index
    %c0_131 = arith.constant 0 : index
    %c0_132 = arith.constant 0 : index
    %228 = vector.load %arg27[%c0_130, %c0_131, %c0_132] : memref<2x2048x32xbf16, #tpu.memory_space<vmem>>, vector<1x512x32xbf16>
    %229 = vector.shape_cast %228 : vector<1x512x32xbf16> to vector<512x32xbf16>
    %cst_133 = arith.constant dense<0.000000e+00> : vector<8x32xf32>
    %230 = tpu.matmul %227, %229, %cst_133 {dimension_numbers = #tpu.dot_dimension_numbers<[1], [0], [0], [1], [0, 0, 1, 1], [], []>} : vector<8x512xbf16>, vector<512x32xbf16>, vector<8x32xf32> -> vector<8x32xf32>
    %231 = arith.addf %218, %230 : vector<8x32xf32>
    %c0_134 = arith.constant 0 : index
    %c0_135 = arith.constant 0 : index
    %c512 = arith.constant 512 : index
    %232 = vector.load %arg25[%c0_134, %c0_135, %c512] : memref<2x32x2048xbf16, #tpu.memory_space<vmem>>, vector<1x32x512xbf16>
    %233 = vector.shape_cast %232 : vector<1x32x512xbf16> to vector<32x512xbf16>
    %cst_136 = arith.constant dense<0.000000e+00> : vector<8x512xf32>
    %234 = tpu.matmul %217, %233, %cst_136 {dimension_numbers = #tpu.dot_dimension_numbers<[1], [0], [0], [1], [0, 0, 1, 1], [], []>} : vector<8x32xbf16>, vector<32x512xbf16>, vector<8x512xf32> -> vector<8x512xf32>
    %c0_137 = arith.constant 0 : index
    %c512_138 = arith.constant 512 : index
    %235 = vector.load %arg26[%c0_137, %c512_138] : memref<2x2048xf32, #tpu.memory_space<vmem>>, vector<1x512xf32>
    %236 = vector.broadcast %235 : vector<1x512xf32> to vector<8x512xf32>
    %237 = arith.addf %234, %236 : vector<8x512xf32>
    %cst_139 = arith.constant 0.000000e+00 : f32
    %238 = vector.broadcast %cst_139 : f32 to vector<8x512xf32>
    %239 = arith.maximumf %237, %238 : vector<8x512xf32>
    %240 = arith.truncf %239 : vector<8x512xf32> to vector<8x512xbf16>
    %c0_140 = arith.constant 0 : index
    %c512_141 = arith.constant 512 : index
    %c0_142 = arith.constant 0 : index
    %241 = vector.load %arg27[%c0_140, %c512_141, %c0_142] : memref<2x2048x32xbf16, #tpu.memory_space<vmem>>, vector<1x512x32xbf16>
    %242 = vector.shape_cast %241 : vector<1x512x32xbf16> to vector<512x32xbf16>
    %cst_143 = arith.constant dense<0.000000e+00> : vector<8x32xf32>
    %243 = tpu.matmul %240, %242, %cst_143 {dimension_numbers = #tpu.dot_dimension_numbers<[1], [0], [0], [1], [0, 0, 1, 1], [], []>} : vector<8x512xbf16>, vector<512x32xbf16>, vector<8x32xf32> -> vector<8x32xf32>
    %244 = arith.addf %231, %243 : vector<8x32xf32>
    %c0_144 = arith.constant 0 : index
    %c0_145 = arith.constant 0 : index
    %c1024 = arith.constant 1024 : index
    %245 = vector.load %arg25[%c0_144, %c0_145, %c1024] : memref<2x32x2048xbf16, #tpu.memory_space<vmem>>, vector<1x32x512xbf16>
    %246 = vector.shape_cast %245 : vector<1x32x512xbf16> to vector<32x512xbf16>
    %cst_146 = arith.constant dense<0.000000e+00> : vector<8x512xf32>
    %247 = tpu.matmul %217, %246, %cst_146 {dimension_numbers = #tpu.dot_dimension_numbers<[1], [0], [0], [1], [0, 0, 1, 1], [], []>} : vector<8x32xbf16>, vector<32x512xbf16>, vector<8x512xf32> -> vector<8x512xf32>
    %c0_147 = arith.constant 0 : index
    %c1024_148 = arith.constant 1024 : index
    %248 = vector.load %arg26[%c0_147, %c1024_148] : memref<2x2048xf32, #tpu.memory_space<vmem>>, vector<1x512xf32>
    %249 = vector.broadcast %248 : vector<1x512xf32> to vector<8x512xf32>
    %250 = arith.addf %247, %249 : vector<8x512xf32>
    %cst_149 = arith.constant 0.000000e+00 : f32
    %251 = vector.broadcast %cst_149 : f32 to vector<8x512xf32>
    %252 = arith.maximumf %250, %251 : vector<8x512xf32>
    %253 = arith.truncf %252 : vector<8x512xf32> to vector<8x512xbf16>
    %c0_150 = arith.constant 0 : index
    %c1024_151 = arith.constant 1024 : index
    %c0_152 = arith.constant 0 : index
    %254 = vector.load %arg27[%c0_150, %c1024_151, %c0_152] : memref<2x2048x32xbf16, #tpu.memory_space<vmem>>, vector<1x512x32xbf16>
    %255 = vector.shape_cast %254 : vector<1x512x32xbf16> to vector<512x32xbf16>
    %cst_153 = arith.constant dense<0.000000e+00> : vector<8x32xf32>
    %256 = tpu.matmul %253, %255, %cst_153 {dimension_numbers = #tpu.dot_dimension_numbers<[1], [0], [0], [1], [0, 0, 1, 1], [], []>} : vector<8x512xbf16>, vector<512x32xbf16>, vector<8x32xf32> -> vector<8x32xf32>
    %257 = arith.addf %244, %256 : vector<8x32xf32>
    %c0_154 = arith.constant 0 : index
    %c0_155 = arith.constant 0 : index
    %c1536 = arith.constant 1536 : index
    %258 = vector.load %arg25[%c0_154, %c0_155, %c1536] : memref<2x32x2048xbf16, #tpu.memory_space<vmem>>, vector<1x32x512xbf16>
    %259 = vector.shape_cast %258 : vector<1x32x512xbf16> to vector<32x512xbf16>
    %cst_156 = arith.constant dense<0.000000e+00> : vector<8x512xf32>
    %260 = tpu.matmul %217, %259, %cst_156 {dimension_numbers = #tpu.dot_dimension_numbers<[1], [0], [0], [1], [0, 0, 1, 1], [], []>} : vector<8x32xbf16>, vector<32x512xbf16>, vector<8x512xf32> -> vector<8x512xf32>
    %c0_157 = arith.constant 0 : index
    %c1536_158 = arith.constant 1536 : index
    %261 = vector.load %arg26[%c0_157, %c1536_158] : memref<2x2048xf32, #tpu.memory_space<vmem>>, vector<1x512xf32>
    %262 = vector.broadcast %261 : vector<1x512xf32> to vector<8x512xf32>
    %263 = arith.addf %260, %262 : vector<8x512xf32>
    %cst_159 = arith.constant 0.000000e+00 : f32
    %264 = vector.broadcast %cst_159 : f32 to vector<8x512xf32>
    %265 = arith.maximumf %263, %264 : vector<8x512xf32>
    %266 = arith.truncf %265 : vector<8x512xf32> to vector<8x512xbf16>
    %c0_160 = arith.constant 0 : index
    %c1536_161 = arith.constant 1536 : index
    %c0_162 = arith.constant 0 : index
    %267 = vector.load %arg27[%c0_160, %c1536_161, %c0_162] : memref<2x2048x32xbf16, #tpu.memory_space<vmem>>, vector<1x512x32xbf16>
    %268 = vector.shape_cast %267 : vector<1x512x32xbf16> to vector<512x32xbf16>
    %cst_163 = arith.constant dense<0.000000e+00> : vector<8x32xf32>
    %269 = tpu.matmul %266, %268, %cst_163 {dimension_numbers = #tpu.dot_dimension_numbers<[1], [0], [0], [1], [0, 0, 1, 1], [], []>} : vector<8x512xbf16>, vector<512x32xbf16>, vector<8x32xf32> -> vector<8x32xf32>
    %270 = arith.addf %257, %269 : vector<8x32xf32>
    %c0_164 = arith.constant 0 : index
    %c0_165 = arith.constant 0 : index
    %271 = vector.load %arg28[%c0_164, %c0_165] : memref<2x32xf32, #tpu.memory_space<vmem>>, vector<1x32xf32>
    %272 = vector.broadcast %271 : vector<1x32xf32> to vector<8x32xf32>
    %273 = arith.addf %270, %272 : vector<8x32xf32>
    %c0_166 = arith.constant 0 : index
    %c0_167 = arith.constant 0 : index
    %274 = vector.load %arg23[%c0_166, %c0_167] : memref<2x32xf32, #tpu.memory_space<vmem>>, vector<1x32xf32>
    %c0_168 = arith.constant 0 : index
    %c0_169 = arith.constant 0 : index
    %275 = vector.load %arg24[%c0_168, %c0_169] : memref<2x32xf32, #tpu.memory_space<vmem>>, vector<1x32xf32>
    %276 = arith.addf %273, %216 : vector<8x32xf32>
    %cst_170 = arith.constant dense<0.000000e+00> : vector<8xf32>
    %277 = vector.multi_reduction <add>, %276, %cst_170 [1] : vector<8x32xf32> to vector<8xf32>
    %278 = vector.shape_cast %277 : vector<8xf32> to vector<8x1xf32>
    %cst_171 = arith.constant 3.200000e+01 : f32
    %279 = vector.broadcast %cst_171 : f32 to vector<8x1xf32>
    %280 = arith.divf %278, %279 : vector<8x1xf32>
    %281 = vector.broadcast %280 : vector<8x1xf32> to vector<8x32xf32>
    %282 = arith.subf %276, %281 : vector<8x32xf32>
    %283 = arith.mulf %282, %282 : vector<8x32xf32>
    %cst_172 = arith.constant dense<0.000000e+00> : vector<8xf32>
    %284 = vector.multi_reduction <add>, %283, %cst_172 [1] : vector<8x32xf32> to vector<8xf32>
    %285 = vector.shape_cast %284 : vector<8xf32> to vector<8x1xf32>
    %cst_173 = arith.constant 3.200000e+01 : f32
    %286 = vector.broadcast %cst_173 : f32 to vector<8x1xf32>
    %287 = arith.divf %285, %286 : vector<8x1xf32>
    %288 = vector.broadcast %280 : vector<8x1xf32> to vector<8x32xf32>
    %289 = arith.subf %276, %288 : vector<8x32xf32>
    %cst_174 = arith.constant 9.99999974E-6 : f32
    %290 = vector.broadcast %cst_174 : f32 to vector<8x1xf32>
    %291 = arith.addf %287, %290 : vector<8x1xf32>
    %292 = math.rsqrt %291 : vector<8x1xf32>
    %293 = vector.broadcast %292 : vector<8x1xf32> to vector<8x32xf32>
    %294 = arith.mulf %289, %293 : vector<8x32xf32>
    %295 = vector.broadcast %274 : vector<1x32xf32> to vector<8x32xf32>
    %296 = arith.mulf %294, %295 : vector<8x32xf32>
    %297 = vector.broadcast %275 : vector<1x32xf32> to vector<8x32xf32>
    %298 = arith.addf %296, %297 : vector<8x32xf32>
    %c1_175 = arith.constant 1 : index
    %c0_176 = arith.constant 0 : index
    %c0_177 = arith.constant 0 : index
    %c0_178 = arith.constant 0 : index
    %299 = vector.load %arg3[%c1_175, %c0_176, %c0_177, %c0_178] : memref<2x4x32x8xbf16, #tpu.memory_space<vmem>>, vector<1x4x32x8xbf16>
    %300 = vector.shape_cast %299 : vector<1x4x32x8xbf16> to vector<4x32x8xbf16>
    %c1_179 = arith.constant 1 : index
    %c0_180 = arith.constant 0 : index
    %c0_181 = arith.constant 0 : index
    %c0_182 = arith.constant 0 : index
    %301 = vector.load %arg4[%c1_179, %c0_180, %c0_181, %c0_182] : memref<2x4x1x8xf32, #tpu.memory_space<vmem>>, vector<1x4x1x8xf32>
    %302 = vector.shape_cast %301 : vector<1x4x1x8xf32> to vector<4x1x8xf32>
    %c1_183 = arith.constant 1 : index
    %c0_184 = arith.constant 0 : index
    %c0_185 = arith.constant 0 : index
    %c0_186 = arith.constant 0 : index
    %303 = vector.load %arg5[%c1_183, %c0_184, %c0_185, %c0_186] : memref<2x4x32x8xbf16, #tpu.memory_space<vmem>>, vector<1x4x32x8xbf16>
    %304 = vector.shape_cast %303 : vector<1x4x32x8xbf16> to vector<4x32x8xbf16>
    %c1_187 = arith.constant 1 : index
    %c0_188 = arith.constant 0 : index
    %c0_189 = arith.constant 0 : index
    %c0_190 = arith.constant 0 : index
    %305 = vector.load %arg6[%c1_187, %c0_188, %c0_189, %c0_190] : memref<2x4x1x8xf32, #tpu.memory_space<vmem>>, vector<1x4x1x8xf32>
    %306 = vector.shape_cast %305 : vector<1x4x1x8xf32> to vector<4x1x8xf32>
    %c1_191 = arith.constant 1 : index
    %c0_192 = arith.constant 0 : index
    %c0_193 = arith.constant 0 : index
    %c0_194 = arith.constant 0 : index
    %307 = vector.load %arg7[%c1_191, %c0_192, %c0_193, %c0_194] : memref<2x4x32x8xbf16, #tpu.memory_space<vmem>>, vector<1x4x32x8xbf16>
    %308 = vector.shape_cast %307 : vector<1x4x32x8xbf16> to vector<4x32x8xbf16>
    %c1_195 = arith.constant 1 : index
    %c0_196 = arith.constant 0 : index
    %c0_197 = arith.constant 0 : index
    %c0_198 = arith.constant 0 : index
    %309 = vector.load %arg8[%c1_195, %c0_196, %c0_197, %c0_198] : memref<2x4x1x8xf32, #tpu.memory_space<vmem>>, vector<1x4x1x8xf32>
    %310 = vector.shape_cast %309 : vector<1x4x1x8xf32> to vector<4x1x8xf32>
    %c1_199 = arith.constant 1 : index
    %c0_200 = arith.constant 0 : index
    %c0_201 = arith.constant 0 : index
    %c0_202 = arith.constant 0 : index
    %311 = vector.load %arg9[%c1_199, %c0_200, %c0_201, %c0_202] : memref<2x4x8x32xbf16, #tpu.memory_space<vmem>>, vector<1x4x8x32xbf16>
    %312 = vector.shape_cast %311 : vector<1x4x8x32xbf16> to vector<4x8x32xbf16>
    %c1_203 = arith.constant 1 : index
    %c0_204 = arith.constant 0 : index
    %313 = vector.load %arg10[%c1_203, %c0_204] : memref<2x32xf32, #tpu.memory_space<vmem>>, vector<1x32xf32>
    %314 = arith.truncf %298 : vector<8x32xf32> to vector<8x32xbf16>
    %315 = vector.shape_cast %314 : vector<8x32xbf16> to vector<1x8x32xbf16>
    %316 = vector.shape_cast %315 : vector<1x8x32xbf16> to vector<1x8x32xbf16>
    %317 = vector.broadcast %316 : vector<1x8x32xbf16> to vector<4x8x32xbf16>
    %318 = arith.truncf %298 : vector<8x32xf32> to vector<8x32xbf16>
    %319 = vector.shape_cast %318 : vector<8x32xbf16> to vector<1x8x32xbf16>
    %320 = vector.shape_cast %319 : vector<1x8x32xbf16> to vector<1x8x32xbf16>
    %321 = vector.broadcast %320 : vector<1x8x32xbf16> to vector<4x8x32xbf16>
    %cst_205 = arith.constant dense<0.000000e+00> : vector<4x8x8xf32>
    %322 = tpu.matmul %317, %300, %cst_205 {dimension_numbers = #tpu.dot_dimension_numbers<[2], [1], [1], [2], [0, 0, 0, 1, 1, 2], [0], [0]>} : vector<4x8x32xbf16>, vector<4x32x8xbf16>, vector<4x8x8xf32> -> vector<4x8x8xf32>
    %323 = vector.broadcast %302 : vector<4x1x8xf32> to vector<4x8x8xf32>
    %324 = arith.addf %322, %323 : vector<4x8x8xf32>
    %cst_206 = arith.constant dense<0.000000e+00> : vector<4x8x8xf32>
    %325 = tpu.matmul %321, %304, %cst_206 {dimension_numbers = #tpu.dot_dimension_numbers<[2], [1], [1], [2], [0, 0, 0, 1, 1, 2], [0], [0]>} : vector<4x8x32xbf16>, vector<4x32x8xbf16>, vector<4x8x8xf32> -> vector<4x8x8xf32>
    %326 = vector.broadcast %306 : vector<4x1x8xf32> to vector<4x8x8xf32>
    %327 = arith.addf %325, %326 : vector<4x8x8xf32>
    %cst_207 = arith.constant dense<0.000000e+00> : vector<4x8x8xf32>
    %328 = tpu.matmul %321, %308, %cst_207 {dimension_numbers = #tpu.dot_dimension_numbers<[2], [1], [1], [2], [0, 0, 0, 1, 1, 2], [0], [0]>} : vector<4x8x32xbf16>, vector<4x32x8xbf16>, vector<4x8x8xf32> -> vector<4x8x8xf32>
    %329 = vector.broadcast %310 : vector<4x1x8xf32> to vector<4x8x8xf32>
    %330 = arith.addf %328, %329 : vector<4x8x8xf32>
    %331 = arith.truncf %324 : vector<4x8x8xf32> to vector<4x8x8xbf16>
    %332 = arith.truncf %327 : vector<4x8x8xf32> to vector<4x8x8xbf16>
    %cst_208 = arith.constant dense<0.000000e+00> : vector<4x8x8xf32>
    %333 = tpu.matmul %331, %332, %cst_208 {dimension_numbers = #tpu.dot_dimension_numbers<[2], [2], [1], [1], [0, 0, 0, 1, 1, 1], [0], [0]>} : vector<4x8x8xbf16>, vector<4x8x8xbf16>, vector<4x8x8xf32> -> vector<4x8x8xf32>
    %cst_209 = arith.constant 0.353553385 : f32
    %334 = vector.broadcast %cst_209 : f32 to vector<4x8x8xf32>
    %335 = arith.mulf %333, %334 : vector<4x8x8xf32>
    %cst_210 = arith.constant dense<0xFF800000> : vector<4x8xf32>
    %336 = vector.multi_reduction <maximumf>, %335, %cst_210 [2] : vector<4x8x8xf32> to vector<4x8xf32>
    %337 = vector.shape_cast %336 : vector<4x8xf32> to vector<4x8x1xf32>
    %338 = vector.broadcast %337 : vector<4x8x1xf32> to vector<4x8x8xf32>
    %339 = arith.subf %335, %338 : vector<4x8x8xf32>
    %340 = math.exp %339 : vector<4x8x8xf32>
    %cst_211 = arith.constant dense<0.000000e+00> : vector<4x8xf32>
    %341 = vector.multi_reduction <add>, %340, %cst_211 [2] : vector<4x8x8xf32> to vector<4x8xf32>
    %342 = vector.shape_cast %341 : vector<4x8xf32> to vector<4x8x1xf32>
    %343 = tpu.reciprocal %342 {approx = true} : vector<4x8x1xf32> -> vector<4x8x1xf32>
    %344 = vector.broadcast %343 : vector<4x8x1xf32> to vector<4x8x8xf32>
    %345 = arith.mulf %340, %344 : vector<4x8x8xf32>
    %346 = arith.truncf %345 : vector<4x8x8xf32> to vector<4x8x8xbf16>
    %347 = arith.truncf %330 : vector<4x8x8xf32> to vector<4x8x8xbf16>
    %cst_212 = arith.constant dense<0.000000e+00> : vector<4x8x8xf32>
    %348 = tpu.matmul %346, %347, %cst_212 {dimension_numbers = #tpu.dot_dimension_numbers<[2], [1], [1], [2], [0, 0, 0, 1, 1, 2], [0], [0]>} : vector<4x8x8xbf16>, vector<4x8x8xbf16>, vector<4x8x8xf32> -> vector<4x8x8xf32>
    %349 = arith.truncf %348 : vector<4x8x8xf32> to vector<4x8x8xbf16>
    %cst_213 = arith.constant dense<0.000000e+00> : vector<4x8x32xf32>
    %350 = tpu.matmul %349, %312, %cst_213 {dimension_numbers = #tpu.dot_dimension_numbers<[2], [1], [1], [2], [0, 0, 0, 1, 1, 2], [0], [0]>} : vector<4x8x8xbf16>, vector<4x8x32xbf16>, vector<4x8x32xf32> -> vector<4x8x32xf32>
    %cst_214 = arith.constant dense<0.000000e+00> : vector<8x32xf32>
    %351 = vector.multi_reduction <add>, %350, %cst_214 [0] : vector<4x8x32xf32> to vector<8x32xf32>
    %352 = vector.broadcast %313 : vector<1x32xf32> to vector<8x32xf32>
    %353 = arith.addf %351, %352 : vector<8x32xf32>
    %c1_215 = arith.constant 1 : index
    %c0_216 = arith.constant 0 : index
    %354 = vector.load %arg19[%c1_215, %c0_216] : memref<2x32xf32, #tpu.memory_space<vmem>>, vector<1x32xf32>
    %c1_217 = arith.constant 1 : index
    %c0_218 = arith.constant 0 : index
    %355 = vector.load %arg20[%c1_217, %c0_218] : memref<2x32xf32, #tpu.memory_space<vmem>>, vector<1x32xf32>
    %356 = arith.addf %353, %298 : vector<8x32xf32>
    %cst_219 = arith.constant dense<0.000000e+00> : vector<8xf32>
    %357 = vector.multi_reduction <add>, %356, %cst_219 [1] : vector<8x32xf32> to vector<8xf32>
    %358 = vector.shape_cast %357 : vector<8xf32> to vector<8x1xf32>
    %cst_220 = arith.constant 3.200000e+01 : f32
    %359 = vector.broadcast %cst_220 : f32 to vector<8x1xf32>
    %360 = arith.divf %358, %359 : vector<8x1xf32>
    %361 = vector.broadcast %360 : vector<8x1xf32> to vector<8x32xf32>
    %362 = arith.subf %356, %361 : vector<8x32xf32>
    %363 = arith.mulf %362, %362 : vector<8x32xf32>
    %cst_221 = arith.constant dense<0.000000e+00> : vector<8xf32>
    %364 = vector.multi_reduction <add>, %363, %cst_221 [1] : vector<8x32xf32> to vector<8xf32>
    %365 = vector.shape_cast %364 : vector<8xf32> to vector<8x1xf32>
    %cst_222 = arith.constant 3.200000e+01 : f32
    %366 = vector.broadcast %cst_222 : f32 to vector<8x1xf32>
    %367 = arith.divf %365, %366 : vector<8x1xf32>
    %368 = vector.broadcast %360 : vector<8x1xf32> to vector<8x32xf32>
    %369 = arith.subf %356, %368 : vector<8x32xf32>
    %cst_223 = arith.constant 9.99999974E-6 : f32
    %370 = vector.broadcast %cst_223 : f32 to vector<8x1xf32>
    %371 = arith.addf %367, %370 : vector<8x1xf32>
    %372 = math.rsqrt %371 : vector<8x1xf32>
    %373 = vector.broadcast %372 : vector<8x1xf32> to vector<8x32xf32>
    %374 = arith.mulf %369, %373 : vector<8x32xf32>
    %375 = vector.broadcast %354 : vector<1x32xf32> to vector<8x32xf32>
    %376 = arith.mulf %374, %375 : vector<8x32xf32>
    %377 = vector.broadcast %355 : vector<1x32xf32> to vector<8x32xf32>
    %378 = arith.addf %376, %377 : vector<8x32xf32>
    %c1_224 = arith.constant 1 : index
    %c0_225 = arith.constant 0 : index
    %c0_226 = arith.constant 0 : index
    %c0_227 = arith.constant 0 : index
    %379 = vector.load %arg11[%c1_224, %c0_225, %c0_226, %c0_227] : memref<2x4x32x8xbf16, #tpu.memory_space<vmem>>, vector<1x4x32x8xbf16>
    %380 = vector.shape_cast %379 : vector<1x4x32x8xbf16> to vector<4x32x8xbf16>
    %c1_228 = arith.constant 1 : index
    %c0_229 = arith.constant 0 : index
    %c0_230 = arith.constant 0 : index
    %c0_231 = arith.constant 0 : index
    %381 = vector.load %arg12[%c1_228, %c0_229, %c0_230, %c0_231] : memref<2x4x1x8xf32, #tpu.memory_space<vmem>>, vector<1x4x1x8xf32>
    %382 = vector.shape_cast %381 : vector<1x4x1x8xf32> to vector<4x1x8xf32>
    %c1_232 = arith.constant 1 : index
    %c0_233 = arith.constant 0 : index
    %c0_234 = arith.constant 0 : index
    %c0_235 = arith.constant 0 : index
    %383 = vector.load %arg13[%c1_232, %c0_233, %c0_234, %c0_235] : memref<2x4x32x8xbf16, #tpu.memory_space<vmem>>, vector<1x4x32x8xbf16>
    %384 = vector.shape_cast %383 : vector<1x4x32x8xbf16> to vector<4x32x8xbf16>
    %c1_236 = arith.constant 1 : index
    %c0_237 = arith.constant 0 : index
    %c0_238 = arith.constant 0 : index
    %c0_239 = arith.constant 0 : index
    %385 = vector.load %arg14[%c1_236, %c0_237, %c0_238, %c0_239] : memref<2x4x1x8xf32, #tpu.memory_space<vmem>>, vector<1x4x1x8xf32>
    %386 = vector.shape_cast %385 : vector<1x4x1x8xf32> to vector<4x1x8xf32>
    %c1_240 = arith.constant 1 : index
    %c0_241 = arith.constant 0 : index
    %c0_242 = arith.constant 0 : index
    %c0_243 = arith.constant 0 : index
    %387 = vector.load %arg15[%c1_240, %c0_241, %c0_242, %c0_243] : memref<2x4x32x8xbf16, #tpu.memory_space<vmem>>, vector<1x4x32x8xbf16>
    %388 = vector.shape_cast %387 : vector<1x4x32x8xbf16> to vector<4x32x8xbf16>
    %c1_244 = arith.constant 1 : index
    %c0_245 = arith.constant 0 : index
    %c0_246 = arith.constant 0 : index
    %c0_247 = arith.constant 0 : index
    %389 = vector.load %arg16[%c1_244, %c0_245, %c0_246, %c0_247] : memref<2x4x1x8xf32, #tpu.memory_space<vmem>>, vector<1x4x1x8xf32>
    %390 = vector.shape_cast %389 : vector<1x4x1x8xf32> to vector<4x1x8xf32>
    %c1_248 = arith.constant 1 : index
    %c0_249 = arith.constant 0 : index
    %c0_250 = arith.constant 0 : index
    %c0_251 = arith.constant 0 : index
    %391 = vector.load %arg17[%c1_248, %c0_249, %c0_250, %c0_251] : memref<2x4x8x32xbf16, #tpu.memory_space<vmem>>, vector<1x4x8x32xbf16>
    %392 = vector.shape_cast %391 : vector<1x4x8x32xbf16> to vector<4x8x32xbf16>
    %c1_252 = arith.constant 1 : index
    %c0_253 = arith.constant 0 : index
    %393 = vector.load %arg18[%c1_252, %c0_253] : memref<2x32xf32, #tpu.memory_space<vmem>>, vector<1x32xf32>
    %394 = arith.truncf %378 : vector<8x32xf32> to vector<8x32xbf16>
    %395 = vector.shape_cast %394 : vector<8x32xbf16> to vector<1x8x32xbf16>
    %396 = vector.shape_cast %395 : vector<1x8x32xbf16> to vector<1x8x32xbf16>
    %397 = vector.broadcast %396 : vector<1x8x32xbf16> to vector<4x8x32xbf16>
    %398 = arith.truncf %298 : vector<8x32xf32> to vector<8x32xbf16>
    %399 = vector.shape_cast %398 : vector<8x32xbf16> to vector<1x8x32xbf16>
    %400 = vector.shape_cast %399 : vector<1x8x32xbf16> to vector<1x8x32xbf16>
    %401 = vector.broadcast %400 : vector<1x8x32xbf16> to vector<4x8x32xbf16>
    %cst_254 = arith.constant dense<0.000000e+00> : vector<4x8x8xf32>
    %402 = tpu.matmul %397, %380, %cst_254 {dimension_numbers = #tpu.dot_dimension_numbers<[2], [1], [1], [2], [0, 0, 0, 1, 1, 2], [0], [0]>} : vector<4x8x32xbf16>, vector<4x32x8xbf16>, vector<4x8x8xf32> -> vector<4x8x8xf32>
    %403 = vector.broadcast %382 : vector<4x1x8xf32> to vector<4x8x8xf32>
    %404 = arith.addf %402, %403 : vector<4x8x8xf32>
    %cst_255 = arith.constant dense<0.000000e+00> : vector<4x8x8xf32>
    %405 = tpu.matmul %401, %384, %cst_255 {dimension_numbers = #tpu.dot_dimension_numbers<[2], [1], [1], [2], [0, 0, 0, 1, 1, 2], [0], [0]>} : vector<4x8x32xbf16>, vector<4x32x8xbf16>, vector<4x8x8xf32> -> vector<4x8x8xf32>
    %406 = vector.broadcast %386 : vector<4x1x8xf32> to vector<4x8x8xf32>
    %407 = arith.addf %405, %406 : vector<4x8x8xf32>
    %cst_256 = arith.constant dense<0.000000e+00> : vector<4x8x8xf32>
    %408 = tpu.matmul %401, %388, %cst_256 {dimension_numbers = #tpu.dot_dimension_numbers<[2], [1], [1], [2], [0, 0, 0, 1, 1, 2], [0], [0]>} : vector<4x8x32xbf16>, vector<4x32x8xbf16>, vector<4x8x8xf32> -> vector<4x8x8xf32>
    %409 = vector.broadcast %390 : vector<4x1x8xf32> to vector<4x8x8xf32>
    %410 = arith.addf %408, %409 : vector<4x8x8xf32>
    %411 = arith.truncf %404 : vector<4x8x8xf32> to vector<4x8x8xbf16>
    %412 = arith.truncf %407 : vector<4x8x8xf32> to vector<4x8x8xbf16>
    %cst_257 = arith.constant dense<0.000000e+00> : vector<4x8x8xf32>
    %413 = tpu.matmul %411, %412, %cst_257 {dimension_numbers = #tpu.dot_dimension_numbers<[2], [2], [1], [1], [0, 0, 0, 1, 1, 1], [0], [0]>} : vector<4x8x8xbf16>, vector<4x8x8xbf16>, vector<4x8x8xf32> -> vector<4x8x8xf32>
    %cst_258 = arith.constant 0.353553385 : f32
    %414 = vector.broadcast %cst_258 : f32 to vector<4x8x8xf32>
    %415 = arith.mulf %413, %414 : vector<4x8x8xf32>
    %cst_259 = arith.constant dense<0xFF800000> : vector<4x8xf32>
    %416 = vector.multi_reduction <maximumf>, %415, %cst_259 [2] : vector<4x8x8xf32> to vector<4x8xf32>
    %417 = vector.shape_cast %416 : vector<4x8xf32> to vector<4x8x1xf32>
    %418 = vector.broadcast %417 : vector<4x8x1xf32> to vector<4x8x8xf32>
    %419 = arith.subf %415, %418 : vector<4x8x8xf32>
    %420 = math.exp %419 : vector<4x8x8xf32>
    %cst_260 = arith.constant dense<0.000000e+00> : vector<4x8xf32>
    %421 = vector.multi_reduction <add>, %420, %cst_260 [2] : vector<4x8x8xf32> to vector<4x8xf32>
    %422 = vector.shape_cast %421 : vector<4x8xf32> to vector<4x8x1xf32>
    %423 = tpu.reciprocal %422 {approx = true} : vector<4x8x1xf32> -> vector<4x8x1xf32>
    %424 = vector.broadcast %423 : vector<4x8x1xf32> to vector<4x8x8xf32>
    %425 = arith.mulf %420, %424 : vector<4x8x8xf32>
    %426 = arith.truncf %425 : vector<4x8x8xf32> to vector<4x8x8xbf16>
    %427 = arith.truncf %410 : vector<4x8x8xf32> to vector<4x8x8xbf16>
    %cst_261 = arith.constant dense<0.000000e+00> : vector<4x8x8xf32>
    %428 = tpu.matmul %426, %427, %cst_261 {dimension_numbers = #tpu.dot_dimension_numbers<[2], [1], [1], [2], [0, 0, 0, 1, 1, 2], [0], [0]>} : vector<4x8x8xbf16>, vector<4x8x8xbf16>, vector<4x8x8xf32> -> vector<4x8x8xf32>
    %429 = arith.truncf %428 : vector<4x8x8xf32> to vector<4x8x8xbf16>
    %cst_262 = arith.constant dense<0.000000e+00> : vector<4x8x32xf32>
    %430 = tpu.matmul %429, %392, %cst_262 {dimension_numbers = #tpu.dot_dimension_numbers<[2], [1], [1], [2], [0, 0, 0, 1, 1, 2], [0], [0]>} : vector<4x8x8xbf16>, vector<4x8x32xbf16>, vector<4x8x32xf32> -> vector<4x8x32xf32>
    %cst_263 = arith.constant dense<0.000000e+00> : vector<8x32xf32>
    %431 = vector.multi_reduction <add>, %430, %cst_263 [0] : vector<4x8x32xf32> to vector<8x32xf32>
    %432 = vector.broadcast %393 : vector<1x32xf32> to vector<8x32xf32>
    %433 = arith.addf %431, %432 : vector<8x32xf32>
    %c1_264 = arith.constant 1 : index
    %c0_265 = arith.constant 0 : index
    %434 = vector.load %arg21[%c1_264, %c0_265] : memref<2x32xf32, #tpu.memory_space<vmem>>, vector<1x32xf32>
    %c1_266 = arith.constant 1 : index
    %c0_267 = arith.constant 0 : index
    %435 = vector.load %arg22[%c1_266, %c0_267] : memref<2x32xf32, #tpu.memory_space<vmem>>, vector<1x32xf32>
    %436 = arith.addf %433, %378 : vector<8x32xf32>
    %cst_268 = arith.constant dense<0.000000e+00> : vector<8xf32>
    %437 = vector.multi_reduction <add>, %436, %cst_268 [1] : vector<8x32xf32> to vector<8xf32>
    %438 = vector.shape_cast %437 : vector<8xf32> to vector<8x1xf32>
    %cst_269 = arith.constant 3.200000e+01 : f32
    %439 = vector.broadcast %cst_269 : f32 to vector<8x1xf32>
    %440 = arith.divf %438, %439 : vector<8x1xf32>
    %441 = vector.broadcast %440 : vector<8x1xf32> to vector<8x32xf32>
    %442 = arith.subf %436, %441 : vector<8x32xf32>
    %443 = arith.mulf %442, %442 : vector<8x32xf32>
    %cst_270 = arith.constant dense<0.000000e+00> : vector<8xf32>
    %444 = vector.multi_reduction <add>, %443, %cst_270 [1] : vector<8x32xf32> to vector<8xf32>
    %445 = vector.shape_cast %444 : vector<8xf32> to vector<8x1xf32>
    %cst_271 = arith.constant 3.200000e+01 : f32
    %446 = vector.broadcast %cst_271 : f32 to vector<8x1xf32>
    %447 = arith.divf %445, %446 : vector<8x1xf32>
    %448 = vector.broadcast %440 : vector<8x1xf32> to vector<8x32xf32>
    %449 = arith.subf %436, %448 : vector<8x32xf32>
    %cst_272 = arith.constant 9.99999974E-6 : f32
    %450 = vector.broadcast %cst_272 : f32 to vector<8x1xf32>
    %451 = arith.addf %447, %450 : vector<8x1xf32>
    %452 = math.rsqrt %451 : vector<8x1xf32>
    %453 = vector.broadcast %452 : vector<8x1xf32> to vector<8x32xf32>
    %454 = arith.mulf %449, %453 : vector<8x32xf32>
    %455 = vector.broadcast %434 : vector<1x32xf32> to vector<8x32xf32>
    %456 = arith.mulf %454, %455 : vector<8x32xf32>
    %457 = vector.broadcast %435 : vector<1x32xf32> to vector<8x32xf32>
    %458 = arith.addf %456, %457 : vector<8x32xf32>
    %459 = arith.truncf %458 : vector<8x32xf32> to vector<8x32xbf16>
    %cst_273 = arith.constant 0.000000e+00 : f32
    %460 = vector.broadcast %cst_273 : f32 to vector<8x32xf32>
    %c1_274 = arith.constant 1 : index
    %c0_275 = arith.constant 0 : index
    %c0_276 = arith.constant 0 : index
    %461 = vector.load %arg25[%c1_274, %c0_275, %c0_276] : memref<2x32x2048xbf16, #tpu.memory_space<vmem>>, vector<1x32x512xbf16>
    %462 = vector.shape_cast %461 : vector<1x32x512xbf16> to vector<32x512xbf16>
    %cst_277 = arith.constant dense<0.000000e+00> : vector<8x512xf32>
    %463 = tpu.matmul %459, %462, %cst_277 {dimension_numbers = #tpu.dot_dimension_numbers<[1], [0], [0], [1], [0, 0, 1, 1], [], []>} : vector<8x32xbf16>, vector<32x512xbf16>, vector<8x512xf32> -> vector<8x512xf32>
    %c1_278 = arith.constant 1 : index
    %c0_279 = arith.constant 0 : index
    %464 = vector.load %arg26[%c1_278, %c0_279] : memref<2x2048xf32, #tpu.memory_space<vmem>>, vector<1x512xf32>
    %465 = vector.broadcast %464 : vector<1x512xf32> to vector<8x512xf32>
    %466 = arith.addf %463, %465 : vector<8x512xf32>
    %cst_280 = arith.constant 0.000000e+00 : f32
    %467 = vector.broadcast %cst_280 : f32 to vector<8x512xf32>
    %468 = arith.maximumf %466, %467 : vector<8x512xf32>
    %469 = arith.truncf %468 : vector<8x512xf32> to vector<8x512xbf16>
    %c1_281 = arith.constant 1 : index
    %c0_282 = arith.constant 0 : index
    %c0_283 = arith.constant 0 : index
    %470 = vector.load %arg27[%c1_281, %c0_282, %c0_283] : memref<2x2048x32xbf16, #tpu.memory_space<vmem>>, vector<1x512x32xbf16>
    %471 = vector.shape_cast %470 : vector<1x512x32xbf16> to vector<512x32xbf16>
    %cst_284 = arith.constant dense<0.000000e+00> : vector<8x32xf32>
    %472 = tpu.matmul %469, %471, %cst_284 {dimension_numbers = #tpu.dot_dimension_numbers<[1], [0], [0], [1], [0, 0, 1, 1], [], []>} : vector<8x512xbf16>, vector<512x32xbf16>, vector<8x32xf32> -> vector<8x32xf32>
    %473 = arith.addf %460, %472 : vector<8x32xf32>
    %c1_285 = arith.constant 1 : index
    %c0_286 = arith.constant 0 : index
    %c512_287 = arith.constant 512 : index
    %474 = vector.load %arg25[%c1_285, %c0_286, %c512_287] : memref<2x32x2048xbf16, #tpu.memory_space<vmem>>, vector<1x32x512xbf16>
    %475 = vector.shape_cast %474 : vector<1x32x512xbf16> to vector<32x512xbf16>
    %cst_288 = arith.constant dense<0.000000e+00> : vector<8x512xf32>
    %476 = tpu.matmul %459, %475, %cst_288 {dimension_numbers = #tpu.dot_dimension_numbers<[1], [0], [0], [1], [0, 0, 1, 1], [], []>} : vector<8x32xbf16>, vector<32x512xbf16>, vector<8x512xf32> -> vector<8x512xf32>
    %c1_289 = arith.constant 1 : index
    %c512_290 = arith.constant 512 : index
    %477 = vector.load %arg26[%c1_289, %c512_290] : memref<2x2048xf32, #tpu.memory_space<vmem>>, vector<1x512xf32>
    %478 = vector.broadcast %477 : vector<1x512xf32> to vector<8x512xf32>
    %479 = arith.addf %476, %478 : vector<8x512xf32>
    %cst_291 = arith.constant 0.000000e+00 : f32
    %480 = vector.broadcast %cst_291 : f32 to vector<8x512xf32>
    %481 = arith.maximumf %479, %480 : vector<8x512xf32>
    %482 = arith.truncf %481 : vector<8x512xf32> to vector<8x512xbf16>
    %c1_292 = arith.constant 1 : index
    %c512_293 = arith.constant 512 : index
    %c0_294 = arith.constant 0 : index
    %483 = vector.load %arg27[%c1_292, %c512_293, %c0_294] : memref<2x2048x32xbf16, #tpu.memory_space<vmem>>, vector<1x512x32xbf16>
    %484 = vector.shape_cast %483 : vector<1x512x32xbf16> to vector<512x32xbf16>
    %cst_295 = arith.constant dense<0.000000e+00> : vector<8x32xf32>
    %485 = tpu.matmul %482, %484, %cst_295 {dimension_numbers = #tpu.dot_dimension_numbers<[1], [0], [0], [1], [0, 0, 1, 1], [], []>} : vector<8x512xbf16>, vector<512x32xbf16>, vector<8x32xf32> -> vector<8x32xf32>
    %486 = arith.addf %473, %485 : vector<8x32xf32>
    %c1_296 = arith.constant 1 : index
    %c0_297 = arith.constant 0 : index
    %c1024_298 = arith.constant 1024 : index
    %487 = vector.load %arg25[%c1_296, %c0_297, %c1024_298] : memref<2x32x2048xbf16, #tpu.memory_space<vmem>>, vector<1x32x512xbf16>
    %488 = vector.shape_cast %487 : vector<1x32x512xbf16> to vector<32x512xbf16>
    %cst_299 = arith.constant dense<0.000000e+00> : vector<8x512xf32>
    %489 = tpu.matmul %459, %488, %cst_299 {dimension_numbers = #tpu.dot_dimension_numbers<[1], [0], [0], [1], [0, 0, 1, 1], [], []>} : vector<8x32xbf16>, vector<32x512xbf16>, vector<8x512xf32> -> vector<8x512xf32>
    %c1_300 = arith.constant 1 : index
    %c1024_301 = arith.constant 1024 : index
    %490 = vector.load %arg26[%c1_300, %c1024_301] : memref<2x2048xf32, #tpu.memory_space<vmem>>, vector<1x512xf32>
    %491 = vector.broadcast %490 : vector<1x512xf32> to vector<8x512xf32>
    %492 = arith.addf %489, %491 : vector<8x512xf32>
    %cst_302 = arith.constant 0.000000e+00 : f32
    %493 = vector.broadcast %cst_302 : f32 to vector<8x512xf32>
    %494 = arith.maximumf %492, %493 : vector<8x512xf32>
    %495 = arith.truncf %494 : vector<8x512xf32> to vector<8x512xbf16>
    %c1_303 = arith.constant 1 : index
    %c1024_304 = arith.constant 1024 : index
    %c0_305 = arith.constant 0 : index
    %496 = vector.load %arg27[%c1_303, %c1024_304, %c0_305] : memref<2x2048x32xbf16, #tpu.memory_space<vmem>>, vector<1x512x32xbf16>
    %497 = vector.shape_cast %496 : vector<1x512x32xbf16> to vector<512x32xbf16>
    %cst_306 = arith.constant dense<0.000000e+00> : vector<8x32xf32>
    %498 = tpu.matmul %495, %497, %cst_306 {dimension_numbers = #tpu.dot_dimension_numbers<[1], [0], [0], [1], [0, 0, 1, 1], [], []>} : vector<8x512xbf16>, vector<512x32xbf16>, vector<8x32xf32> -> vector<8x32xf32>
    %499 = arith.addf %486, %498 : vector<8x32xf32>
    %c1_307 = arith.constant 1 : index
    %c0_308 = arith.constant 0 : index
    %c1536_309 = arith.constant 1536 : index
    %500 = vector.load %arg25[%c1_307, %c0_308, %c1536_309] : memref<2x32x2048xbf16, #tpu.memory_space<vmem>>, vector<1x32x512xbf16>
    %501 = vector.shape_cast %500 : vector<1x32x512xbf16> to vector<32x512xbf16>
    %cst_310 = arith.constant dense<0.000000e+00> : vector<8x512xf32>
    %502 = tpu.matmul %459, %501, %cst_310 {dimension_numbers = #tpu.dot_dimension_numbers<[1], [0], [0], [1], [0, 0, 1, 1], [], []>} : vector<8x32xbf16>, vector<32x512xbf16>, vector<8x512xf32> -> vector<8x512xf32>
    %c1_311 = arith.constant 1 : index
    %c1536_312 = arith.constant 1536 : index
    %503 = vector.load %arg26[%c1_311, %c1536_312] : memref<2x2048xf32, #tpu.memory_space<vmem>>, vector<1x512xf32>
    %504 = vector.broadcast %503 : vector<1x512xf32> to vector<8x512xf32>
    %505 = arith.addf %502, %504 : vector<8x512xf32>
    %cst_313 = arith.constant 0.000000e+00 : f32
    %506 = vector.broadcast %cst_313 : f32 to vector<8x512xf32>
    %507 = arith.maximumf %505, %506 : vector<8x512xf32>
    %508 = arith.truncf %507 : vector<8x512xf32> to vector<8x512xbf16>
    %c1_314 = arith.constant 1 : index
    %c1536_315 = arith.constant 1536 : index
    %c0_316 = arith.constant 0 : index
    %509 = vector.load %arg27[%c1_314, %c1536_315, %c0_316] : memref<2x2048x32xbf16, #tpu.memory_space<vmem>>, vector<1x512x32xbf16>
    %510 = vector.shape_cast %509 : vector<1x512x32xbf16> to vector<512x32xbf16>
    %cst_317 = arith.constant dense<0.000000e+00> : vector<8x32xf32>
    %511 = tpu.matmul %508, %510, %cst_317 {dimension_numbers = #tpu.dot_dimension_numbers<[1], [0], [0], [1], [0, 0, 1, 1], [], []>} : vector<8x512xbf16>, vector<512x32xbf16>, vector<8x32xf32> -> vector<8x32xf32>
    %512 = arith.addf %499, %511 : vector<8x32xf32>
    %c1_318 = arith.constant 1 : index
    %c0_319 = arith.constant 0 : index
    %513 = vector.load %arg28[%c1_318, %c0_319] : memref<2x32xf32, #tpu.memory_space<vmem>>, vector<1x32xf32>
    %514 = vector.broadcast %513 : vector<1x32xf32> to vector<8x32xf32>
    %515 = arith.addf %512, %514 : vector<8x32xf32>
    %c1_320 = arith.constant 1 : index
    %c0_321 = arith.constant 0 : index
    %516 = vector.load %arg23[%c1_320, %c0_321] : memref<2x32xf32, #tpu.memory_space<vmem>>, vector<1x32xf32>
    %c1_322 = arith.constant 1 : index
    %c0_323 = arith.constant 0 : index
    %517 = vector.load %arg24[%c1_322, %c0_323] : memref<2x32xf32, #tpu.memory_space<vmem>>, vector<1x32xf32>
    %518 = arith.addf %515, %458 : vector<8x32xf32>
    %cst_324 = arith.constant dense<0.000000e+00> : vector<8xf32>
    %519 = vector.multi_reduction <add>, %518, %cst_324 [1] : vector<8x32xf32> to vector<8xf32>
    %520 = vector.shape_cast %519 : vector<8xf32> to vector<8x1xf32>
    %cst_325 = arith.constant 3.200000e+01 : f32
    %521 = vector.broadcast %cst_325 : f32 to vector<8x1xf32>
    %522 = arith.divf %520, %521 : vector<8x1xf32>
    %523 = vector.broadcast %522 : vector<8x1xf32> to vector<8x32xf32>
    %524 = arith.subf %518, %523 : vector<8x32xf32>
    %525 = arith.mulf %524, %524 : vector<8x32xf32>
    %cst_326 = arith.constant dense<0.000000e+00> : vector<8xf32>
    %526 = vector.multi_reduction <add>, %525, %cst_326 [1] : vector<8x32xf32> to vector<8xf32>
    %527 = vector.shape_cast %526 : vector<8xf32> to vector<8x1xf32>
    %cst_327 = arith.constant 3.200000e+01 : f32
    %528 = vector.broadcast %cst_327 : f32 to vector<8x1xf32>
    %529 = arith.divf %527, %528 : vector<8x1xf32>
    %530 = vector.broadcast %522 : vector<8x1xf32> to vector<8x32xf32>
    %531 = arith.subf %518, %530 : vector<8x32xf32>
    %cst_328 = arith.constant 9.99999974E-6 : f32
    %532 = vector.broadcast %cst_328 : f32 to vector<8x1xf32>
    %533 = arith.addf %529, %532 : vector<8x1xf32>
    %534 = math.rsqrt %533 : vector<8x1xf32>
    %535 = vector.broadcast %534 : vector<8x1xf32> to vector<8x32xf32>
    %536 = arith.mulf %531, %535 : vector<8x32xf32>
    %537 = vector.broadcast %516 : vector<1x32xf32> to vector<8x32xf32>
    %538 = arith.mulf %536, %537 : vector<8x32xf32>
    %539 = vector.broadcast %517 : vector<1x32xf32> to vector<8x32xf32>
    %540 = arith.addf %538, %539 : vector<8x32xf32>
    %c0_329 = arith.constant 0 : index
    %c0_330 = arith.constant 0 : index
    %541 = vector.load %arg29[%c0_329, %c0_330] : memref<32x512xbf16, #tpu.memory_space<vmem>>, vector<32x512xbf16>
    %542 = arith.truncf %540 : vector<8x32xf32> to vector<8x32xbf16>
    %cst_331 = arith.constant dense<0.000000e+00> : vector<8x512xf32>
    %543 = tpu.matmul %542, %541, %cst_331 {dimension_numbers = #tpu.dot_dimension_numbers<[1], [0], [0], [1], [0, 0, 1, 1], [], []>} : vector<8x32xbf16>, vector<32x512xbf16>, vector<8x512xf32> -> vector<8x512xf32>
    %c0_332 = arith.constant 0 : index
    %c0_333 = arith.constant 0 : index
    %544 = vector.load %arg30[%c0_332, %c0_333] : memref<1x512xf32, #tpu.memory_space<vmem>>, vector<1x512xf32>
    %545 = vector.broadcast %544 : vector<1x512xf32> to vector<8x512xf32>
    %546 = arith.addf %543, %545 : vector<8x512xf32>
    %c0_334 = arith.constant 0 : index
    %c0_335 = arith.constant 0 : index
    %c0_336 = arith.constant 0 : index
    %547 = vector.load %arg31[%c0_334, %c0_335, %c0_336] : memref<1x8x512xf32, #tpu.memory_space<vmem>>, vector<1x8x512xf32>
    %548 = vector.shape_cast %547 : vector<1x8x512xf32> to vector<8x512xf32>
    %549 = vector.shape_cast %546 : vector<8x512xf32> to vector<1x8x512xf32>
    tpu.vector_store %arg31[%c0_334, %c0_335, %c0_336], %549 {strides = array<i32>} : memref<1x8x512xf32, #tpu.memory_space<vmem>>, vector<1x8x512xf32>,
    return
  }
  func.func @transform_0(%arg0: i32, %arg1: memref<16xi32, #tpu.memory_space<smem>>) -> (i32, i32) {
    %c0_i32 = arith.constant 0 : i32
    %c0_i32_0 = arith.constant 0 : i32
    %c0_i32_1 = arith.constant 0 : i32
    return %c0_i32, %c0_i32_0 : i32, i32
  }
  func.func @transform_1(%arg0: i32, %arg1: memref<16xi32, #tpu.memory_space<smem>>) -> (i32, i32, i32, i32) {
    %c0_i32 = arith.constant 0 : i32
    %c0_i32_0 = arith.constant 0 : i32
    %c0_i32_1 = arith.constant 0 : i32
    %c0_i32_2 = arith.constant 0 : i32
    %c0_i32_3 = arith.constant 0 : i32
    return %c0_i32, %c0_i32_0, %c0_i32_1, %c0_i32_2 : i32, i32, i32, i32
  }
  func.func @transform_2(%arg0: i32, %arg1: memref<16xi32, #tpu.memory_space<smem>>) -> (i32, i32, i32, i32) {
    %c0_i32 = arith.constant 0 : i32
    %c0_i32_0 = arith.constant 0 : i32
    %c0_i32_1 = arith.constant 0 : i32
    %c0_i32_2 = arith.constant 0 : i32
    %c0_i32_3 = arith.constant 0 : i32
    return %c0_i32, %c0_i32_0, %c0_i32_1, %c0_i32_2 : i32, i32, i32, i32
  }
  func.func @transform_3(%arg0: i32, %arg1: memref<16xi32, #tpu.memory_space<smem>>) -> (i32, i32, i32, i32) {
    %c0_i32 = arith.constant 0 : i32
    %c0_i32_0 = arith.constant 0 : i32
    %c0_i32_1 = arith.constant 0 : i32
    %c0_i32_2 = arith.constant 0 : i32
    %c0_i32_3 = arith.constant 0 : i32
    return %c0_i32, %c0_i32_0, %c0_i32_1, %c0_i32_2 : i32, i32, i32, i32
  }
  func.func @transform_4(%arg0: i32, %arg1: memref<16xi32, #tpu.memory_space<smem>>) -> (i32, i32, i32, i32) {
    %c0_i32 = arith.constant 0 : i32
    %c0_i32_0 = arith.constant 0 : i32
    %c0_i32_1 = arith.constant 0 : i32
    %c0_i32_2 = arith.constant 0 : i32
    %c0_i32_3 = arith.constant 0 : i32
    return %c0_i32, %c0_i32_0, %c0_i32_1, %c0_i32_2 : i32, i32, i32, i32
  }
  func.func @transform_5(%arg0: i32, %arg1: memref<16xi32, #tpu.memory_space<smem>>) -> (i32, i32, i32, i32) {
    %c0_i32 = arith.constant 0 : i32
    %c0_i32_0 = arith.constant 0 : i32
    %c0_i32_1 = arith.constant 0 : i32
    %c0_i32_2 = arith.constant 0 : i32
    %c0_i32_3 = arith.constant 0 : i32
    return %c0_i32, %c0_i32_0, %c0_i32_1, %c0_i32_2 : i32, i32, i32, i32
  }
  func.func @transform_6(%arg0: i32, %arg1: memref<16xi32, #tpu.memory_space<smem>>) -> (i32, i32, i32, i32) {
    %c0_i32 = arith.constant 0 : i32
    %c0_i32_0 = arith.constant 0 : i32
    %c0_i32_1 = arith.constant 0 : i32
    %c0_i32_2 = arith.constant 0 : i32
    %c0_i32_3 = arith.constant 0 : i32
    return %c0_i32, %c0_i32_0, %c0_i32_1, %c0_i32_2 : i32, i32, i32, i32
  }
  func.func @transform_7(%arg0: i32, %arg1: memref<16xi32, #tpu.memory_space<smem>>) -> (i32, i32, i32, i32) {
    %c0_i32 = arith.constant 0 : i32
    %c0_i32_0 = arith.constant 0 : i32
    %c0_i32_1 = arith.constant 0 : i32
    %c0_i32_2 = arith.constant 0 : i32
    %c0_i32_3 = arith.constant 0 : i32
    return %c0_i32, %c0_i32_0, %c0_i32_1, %c0_i32_2 : i32, i32, i32, i32
  }
  func.func @transform_8(%arg0: i32, %arg1: memref<16xi32, #tpu.memory_space<smem>>) -> (i32, i32) {
    %c0_i32 = arith.constant 0 : i32
    %c0_i32_0 = arith.constant 0 : i32
    %c0_i32_1 = arith.constant 0 : i32
    return %c0_i32, %c0_i32_0 : i32, i32
  }
  func.func @transform_9(%arg0: i32, %arg1: memref<16xi32, #tpu.memory_space<smem>>) -> (i32, i32, i32, i32) {
    %c0_i32 = arith.constant 0 : i32
    %c0_i32_0 = arith.constant 0 : i32
    %c0_i32_1 = arith.constant 0 : i32
    %c0_i32_2 = arith.constant 0 : i32
    %c0_i32_3 = arith.constant 0 : i32
    return %c0_i32, %c0_i32_0, %c0_i32_1, %c0_i32_2 : i32, i32, i32, i32
  }
  func.func @transform_10(%arg0: i32, %arg1: memref<16xi32, #tpu.memory_space<smem>>) -> (i32, i32, i32, i32) {
    %c0_i32 = arith.constant 0 : i32
    %c0_i32_0 = arith.constant 0 : i32
    %c0_i32_1 = arith.constant 0 : i32
    %c0_i32_2 = arith.constant 0 : i32
    %c0_i32_3 = arith.constant 0 : i32
    return %c0_i32, %c0_i32_0, %c0_i32_1, %c0_i32_2 : i32, i32, i32, i32
  }
  func.func @transform_11(%arg0: i32, %arg1: memref<16xi32, #tpu.memory_space<smem>>) -> (i32, i32, i32, i32) {
    %c0_i32 = arith.constant 0 : i32
    %c0_i32_0 = arith.constant 0 : i32
    %c0_i32_1 = arith.constant 0 : i32
    %c0_i32_2 = arith.constant 0 : i32
    %c0_i32_3 = arith.constant 0 : i32
    return %c0_i32, %c0_i32_0, %c0_i32_1, %c0_i32_2 : i32, i32, i32, i32
  }
  func.func @transform_12(%arg0: i32, %arg1: memref<16xi32, #tpu.memory_space<smem>>) -> (i32, i32, i32, i32) {
    %c0_i32 = arith.constant 0 : i32
    %c0_i32_0 = arith.constant 0 : i32
    %c0_i32_1 = arith.constant 0 : i32
    %c0_i32_2 = arith.constant 0 : i32
    %c0_i32_3 = arith.constant 0 : i32
    return %c0_i32, %c0_i32_0, %c0_i32_1, %c0_i32_2 : i32, i32, i32, i32
  }
  func.func @transform_13(%arg0: i32, %arg1: memref<16xi32, #tpu.memory_space<smem>>) -> (i32, i32, i32, i32) {
    %c0_i32 = arith.constant 0 : i32
    %c0_i32_0 = arith.constant 0 : i32
    %c0_i32_1 = arith.constant 0 : i32
    %c0_i32_2 = arith.constant 0 : i32
    %c0_i32_3 = arith.constant 0 : i32
    return %c0_i32, %c0_i32_0, %c0_i32_1, %c0_i32_2 : i32, i32, i32, i32
  }
  func.func @transform_14(%arg0: i32, %arg1: memref<16xi32, #tpu.memory_space<smem>>) -> (i32, i32, i32, i32) {
    %c0_i32 = arith.constant 0 : i32
    %c0_i32_0 = arith.constant 0 : i32
    %c0_i32_1 = arith.constant 0 : i32
    %c0_i32_2 = arith.constant 0 : i32
    %c0_i32_3 = arith.constant 0 : i32
    return %c0_i32, %c0_i32_0, %c0_i32_1, %c0_i32_2 : i32, i32, i32, i32
  }
  func.func @transform_15(%arg0: i32, %arg1: memref<16xi32, #tpu.memory_space<smem>>) -> (i32, i32, i32, i32) {
    %c0_i32 = arith.constant 0 : i32
    %c0_i32_0 = arith.constant 0 : i32
    %c0_i32_1 = arith.constant 0 : i32
    %c0_i32_2 = arith.constant 0 : i32
    %c0_i32_3 = arith.constant 0 : i32
    return %c0_i32, %c0_i32_0, %c0_i32_1, %c0_i32_2 : i32, i32, i32, i32
  }
  func.func @transform_16(%arg0: i32, %arg1: memref<16xi32, #tpu.memory_space<smem>>) -> (i32, i32) {
    %c0_i32 = arith.constant 0 : i32
    %c0_i32_0 = arith.constant 0 : i32
    %c0_i32_1 = arith.constant 0 : i32
    return %c0_i32, %c0_i32_0 : i32, i32
  }
  func.func @transform_17(%arg0: i32, %arg1: memref<16xi32, #tpu.memory_space<smem>>) -> (i32, i32) {
    %c0_i32 = arith.constant 0 : i32
    %c0_i32_0 = arith.constant 0 : i32
    %c0_i32_1 = arith.constant 0 : i32
    return %c0_i32, %c0_i32_0 : i32, i32
  }
  func.func @transform_18(%arg0: i32, %arg1: memref<16xi32, #tpu.memory_space<smem>>) -> (i32, i32) {
    %c0_i32 = arith.constant 0 : i32
    %c0_i32_0 = arith.constant 0 : i32
    %c0_i32_1 = arith.constant 0 : i32
    return %c0_i32, %c0_i32_0 : i32, i32
  }
  func.func @transform_19(%arg0: i32, %arg1: memref<16xi32, #tpu.memory_space<smem>>) -> (i32, i32) {
    %c0_i32 = arith.constant 0 : i32
    %c0_i32_0 = arith.constant 0 : i32
    %c0_i32_1 = arith.constant 0 : i32
    return %c0_i32, %c0_i32_0 : i32, i32
  }
  func.func @transform_20(%arg0: i32, %arg1: memref<16xi32, #tpu.memory_space<smem>>) -> (i32, i32) {
    %c0_i32 = arith.constant 0 : i32
    %c0_i32_0 = arith.constant 0 : i32
    %c0_i32_1 = arith.constant 0 : i32
    return %c0_i32, %c0_i32_0 : i32, i32
  }
  func.func @transform_21(%arg0: i32, %arg1: memref<16xi32, #tpu.memory_space<smem>>) -> (i32, i32) {
    %c0_i32 = arith.constant 0 : i32
    %c0_i32_0 = arith.constant 0 : i32
    %c0_i32_1 = arith.constant 0 : i32
    return %c0_i32, %c0_i32_0 : i32, i32
  }
  func.func @transform_22(%arg0: i32, %arg1: memref<16xi32, #tpu.memory_space<smem>>) -> (i32, i32) {
    %c0_i32 = arith.constant 0 : i32
    %c0_i32_0 = arith.constant 0 : i32
    %c0_i32_1 = arith.constant 0 : i32
    return %c0_i32, %c0_i32_0 : i32, i32
  }
  func.func @transform_23(%arg0: i32, %arg1: memref<16xi32, #tpu.memory_space<smem>>) -> (i32, i32, i32) {
    %c0_i32 = arith.constant 0 : i32
    %c0_i32_0 = arith.constant 0 : i32
    %c0_i32_1 = arith.constant 0 : i32
    %c0_i32_2 = arith.constant 0 : i32
    return %c0_i32, %c0_i32_0, %c0_i32_1 : i32, i32, i32
  }
  func.func @transform_24(%arg0: i32, %arg1: memref<16xi32, #tpu.memory_space<smem>>) -> (i32, i32) {
    %c0_i32 = arith.constant 0 : i32
    %c0_i32_0 = arith.constant 0 : i32
    %c0_i32_1 = arith.constant 0 : i32
    return %c0_i32, %c0_i32_0 : i32, i32
  }
  func.func @transform_25(%arg0: i32, %arg1: memref<16xi32, #tpu.memory_space<smem>>) -> (i32, i32, i32) {
    %c0_i32 = arith.constant 0 : i32
    %c0_i32_0 = arith.constant 0 : i32
    %c0_i32_1 = arith.constant 0 : i32
    %c0_i32_2 = arith.constant 0 : i32
    return %c0_i32, %c0_i32_0, %c0_i32_1 : i32, i32, i32
  }
  func.func @transform_26(%arg0: i32, %arg1: memref<16xi32, #tpu.memory_space<smem>>) -> (i32, i32) {
    %c0_i32 = arith.constant 0 : i32
    %c0_i32_0 = arith.constant 0 : i32
    %c0_i32_1 = arith.constant 0 : i32
    return %c0_i32, %c0_i32_0 : i32, i32
  }
  func.func @transform_27(%arg0: i32, %arg1: memref<16xi32, #tpu.memory_space<smem>>) -> (i32, i32) {
    %c0_i32 = arith.constant 0 : i32
    %c0_i32_0 = arith.constant 0 : i32
    %c0_i32_1 = arith.constant 0 : i32
    return %c0_i32, %c0_i32_0 : i32, i32
  }
  func.func @transform_28(%arg0: i32, %arg1: memref<16xi32, #tpu.memory_space<smem>>) -> (i32, i32) {
    %c0_i32 = arith.constant 0 : i32
    %c0_i32_0 = arith.constant 0 : i32
    %c0_i32_1 = arith.constant 0 : i32
    return %c0_i32, %c0_i32_0 : i32, i32
  }
  func.func @transform_29(%arg0: i32, %arg1: memref<16xi32, #tpu.memory_space<smem>>) -> (i32, i32, i32) {
    %c0_i32 = arith.constant 0 : i32
    %c0_i32_0 = arith.constant 0 : i32
    %c0_i32_1 = arith.constant 0 : i32
    return %arg0, %c0_i32, %c0_i32_0 : i32, i32, i32
  }
}

</mosaic_0001>

<bundles_post_ra>
// kernel: tpu_custom_call.1
= control target key start
LH: loop header
LB: loop body
LE: loop exit
PB: predicated region body
PF: predicated region fallthrough
CT: control target
= control target key end

     0   :  { %s13847_s6 = smov 1   ;;  %s13848_s10 = smov 2   ;;  %s15468_s0 = inlined_call_operand.smem [shape: u32[31], index: -1, kind: input, shape index: {}] }
   0x1   :  { %s13890_s5 = sld [smem:[%s15468_s0]]   ;;  %s13849_s14 = smov 3  }
   0x2   :  { %s13895_s9 = sld [smem:[%s15468_s0 + %s13847_s6]]   ;;  %s13850_s18 = smov 4  }
   0x3   :  { %s13900_s13 = sld [smem:[%s15468_s0 + %s13848_s10]]   ;;  %s13851_s22 = smov 5  }
   0x4   :  { %s13905_s17 = sld [smem:[%s15468_s0 + %s13849_s14]]   ;;  %s13852_s26 = smov 6  }
   0x5   :  { %s13910_s21 = sld [smem:[%s15468_s0 + %s13850_s18]]   ;;  %s13853_s30 = smov 7  }
   0x6   :  { %s13915_s25 = sld [smem:[%s15468_s0 + %s13851_s22]]   ;;  %s13854_s4 = smov 8  }
   0x7   :  { %s13920_s29 = sld [smem:[%s15468_s0 + %s13852_s26]]   ;;  %s13855_s10 = smov 9  }
   0x8   :  { %15502 = sst [smem:[#allocation9_spill]] %s13895_s9  ;;  %s13856_s15 = smov 10  }
   0x9   :  { %s13925_s3 = sld [smem:[%s15468_s0 + %s13853_s30]]   ;;  %s13857_s20 = smov 11  }
   0xa   :  { %s13930_s8 = sld [smem:[%s15468_s0 + %s13854_s4]]   ;;  %s13858_s26 = smov 12  }
   0xb   :  { %s13935_s14 = sld [smem:[%s15468_s0 + %s13855_s10]]   ;;  %s13859_s1 = smov 13  }
   0xc   :  { %s13940_s19 = sld [smem:[%s15468_s0 + %s13856_s15]]   ;;  %s13860_s7 = smov 14  }
   0xd   :  { %s13945_s24 = sld [smem:[%s15468_s0 + %s13857_s20]]   ;;  %s13861_s15 = smov 15  }
   0xe   :  { %s13950_s30 = sld [smem:[%s15468_s0 + %s13858_s26]]   ;;  %s13862_s22 = smov 16  }
   0xf   :  { %15503 = sst [smem:[#allocation10_spill]] %s13925_s3  ;;  %s13863_s28 = smov 17  }
  0x10   :  { %15504 = sst [smem:[#allocation11_spill]] %s13930_s8 }
  0x11   :  { %s13955_s6 = sld [smem:[%s15468_s0 + %s13859_s1]]  }
  0x12   :  { %s13960_s12 = sld [smem:[%s15468_s0 + %s13860_s7]]   ;;  %s13864_s7 = smov 18  }
  0x13   :  { %15505 = sst [smem:[#allocation12_spill]] %s13945_s24 }
  0x14   :  { %s13965_s20 = sld [smem:[%s15468_s0 + %s13861_s15]]   ;;  %s13865_s15 = smov 19  }
  0x15   :  { %s13970_s27 = sld [smem:[%s15468_s0 + %s13862_s22]]   ;;  %s13866_s22 = smov 20  }
  0x16   :  { %s13975_s4 = sld [smem:[%s15468_s0 + %s13863_s28]]   ;;  %s13867_s28 = smov 21  }
  0x17   :  { %15506 = sst [smem:[#allocation13_spill]] %s13955_s6  ;;  %s13873_s6 = smov 27  }
  0x18   :  { %15507 = sst [smem:[#allocation14_spill]] %s13960_s12 }
  0x19   :  { %s13980_s24 = sld [smem:[%s15468_s0 + %s13864_s7]]   ;;  %s13868_s7 = smov 22  }
  0x1a   :  { %15508 = sst [smem:[#allocation15_spill]] %s13965_s20 }
  0x1b   :  { %15509 = sst [smem:[#allocation16_spill]] %s13970_s27 }
  0x1c   :  { %15510 = sst [smem:[#allocation17_spill]] %s13975_s4  ;;  %s13872_s4 = smov 26  }
  0x1d   :  { %s13985_s20 = sld [smem:[%s15468_s0 + %s13865_s15]]   ;;  %s13869_s15 = smov 23  }
  0x1e   :  { %s13990_s27 = sld [smem:[%s15468_s0 + %s13866_s22]]   ;;  %s13870_s22 = smov 24  }
  0x1f   :  { %s13995_s10 = sld [smem:[%s15468_s0 + %s13867_s28]]   ;;  %s13871_s28 = smov 25  }
  0x20   :  { %s14000_s16 = sld [smem:[%s15468_s0 + %s13868_s7]]  }
  0x21   :  { %s14005_s23 = sld [smem:[%s15468_s0 + %s13869_s15]]  }
  0x22   :  { %s14010_s1 = sld [smem:[%s15468_s0 + %s13870_s22]]  }
  0x23   :  { %s14015_s12 = sld [smem:[%s15468_s0 + %s13871_s28]]   ;;  %s13875_s28 = smov 29  }
  0x24   :  { %15511 = sst [smem:[#allocation18_spill]] %s13990_s27  ;;  %s13874_s27 = smov 28  }
  0x25   :  { %15512 = sst [smem:[#allocation19_spill]] %s13995_s10  ;;  %s66_s10 = sshll.u32 %s13890_s5, 4  ;;  %s67_s10 = int_to_ptr.vmem [resolvable:$true] %s66_s10 }
  0x26   :  { %15513 = sst [smem:[#allocation20_spill]] %s14000_s16  ;;  %s13771_s15 = scalar_lea.vmem %s67_s10, 16 }
  0x27   :  { %15514 = sst [smem:[#allocation21_spill]] %s14005_s23  ;;  %p13772_p0 = scmp.ne.s32.totalorder %s67_s10, %s13771_s15 }
  0x28   :  { %15515 = sst [smem:[#allocation22_spill]] %s14010_s1  ;;  %p13776_p1 = scmp.lt.s32.totalorder %s67_s10, %s67_s10 }
  0x29   :  { %15516 = sst [smem:[#allocation23_spill]] %s14015_s12  ;;  %p13777_p2 = scmp.lt.s32.totalorder %s13771_s15, %s13771_s15 }
  0x2a   :  { %s14020_s16 = sld [smem:[%s15468_s0 + %s13872_s4]]   ;;  %s13876_s4 = smov 30  }
  0x2b   :  { %s14025_s23 = sld [smem:[%s15468_s0 + %s13873_s6]]   ;;  %p13778_p3 = por %p13777_p2, %p13776_p1 }
  0x2c   :  { %s14030_s1 = sld [smem:[%s15468_s0 + %s13874_s27]]  }
  0x2d   :  { %s14036_s7 = sld [smem:[%s15468_s0 + %s13875_s28]]   ;;  %p13779_p4 = pnand %p13778_p3, %p13772_p0 }
  0x2e   :  { %s14041_s6 = sld [smem:[%s15468_s0 + %s13876_s4]]  }
  0x30   :  { %15517 = sst [smem:[#allocation24_spill]] %s14020_s16 }
  0x32   :  { %15518 = sst [smem:[#allocation25_spill]] %s14030_s1 }
  0x33   :  { %15519 = sst [smem:[#allocation26_spill]] %s14036_s7 }
  0x34   :  { %15520 = sst [smem:[#allocation27_spill]] %s14041_s6 }
  0x35   :  { %13782 = shalt.err (!%p13779_p4)  }
  0x36   :  { %s13877_s5 = smov [#allocation4]  }
  0x37   :  { %69 = dma.vmem_to_smem %s67_s10, 16, %s13877_s5, [#allocation3] }
  0x38   :  { %13825 = dma.done.wait [#allocation3], 16 }
  0x39   :  { %13826 = vsyncadd [#allocation3], 4294967280 }
  0x3a   :  { %71 = sfence }
  0x3b   :  { %72 = vsyncpa [#allocation6], 0 }
  0x3c   :  { %74 = vsyncpa [#allocation6 + $0x1], 0  ;;  %s14043_s12 = smov 0   ;;  %s14045_s18 = smov 0  }
  0x3d   :  { %s14047_s0 = smov 0   ;;  %s14049_s16 = smov 0  }
  0x3e LB: > { %s15521_s8 = sld [smem:[#allocation11_spill]]  ;;  %s14064_s27 = sadd.s32 4294967295, %s13845_s16   ;;  %s13845_s16 = sphi %s14049_s16, %s15560_s16   ;;  %s13841_s0 = sphi %s14047_s0, %s15563_s0   ;;  %s13837_s18 = sphi %s14045_s18, %s15562_s18   ;;  %s13833_s12 = sphi %s14043_s12, %s15561_s12  }
  0x3f   : > { %s15522_s3 = sld [smem:[#allocation10_spill]]  ;;  %s10955_s22 = sadd.s32 4294967294, %s13845_s16  }
  0x40   : > { %s15523_s1 = sld [smem:[#allocation25_spill]]  ;;  %s14068_s26 = sadd.s32 1, %s13845_s16  }
  0x41   : > { %s15524_s9 = sld [smem:[#allocation9_spill]]  ;;  %s696_s10 = sadd.s32 1, %s13841_s0 }
  0x42   : > { %15525 = sst [smem:[#allocation28_spill]] %s13833_s12  ;;  %s693_s28 = ssub.s32 %s13845_s16, %s14068_s26 }
  0x43   : > { %15526 = sst [smem:[#allocation29_spill]] %s13837_s18  ;;  %p706_p5 = scmp.ne.s32.totalorder %s13841_s0, %s13837_s18 }
  0x44   : > { %15527 = sst [smem:[#allocation30_spill]] %s13841_s0  ;;  %p694_p6 = scmp.eq.s32.totalorder %s693_s28, 0 }
  0x45   : > { %15528 = sst [smem:[#allocation31_spill]] %s13845_s16  ;;  %p707_p7 = scmp.eq.s32.totalorder %s14064_s27, 1 }
  0x46   : > { %15529 = sst [smem:[#allocation32_spill]] %s14064_s27  ;;  %p712_p8 = scmp.ne.s32.totalorder %s13837_s18, %s13833_s12 }
  0x47   : > { %15530 = sst [smem:[#allocation33_spill]] %s14068_s26  ;;  %p713_p9 = scmp.eq.s32.totalorder %s10955_s22, 1 }
  0x48   : > { %s14079_s2 = scalar_select %p694_p6, %s13841_s0, %s696_s10  }
  0x49   : > { %p14081_p10 = por %p707_p7, %p706_p5  ;;  %p14085_p11 = por %p713_p9, %p712_p8 }
  0x4a   : > { %15531 = sst [smem:[#allocation34_spill]] %s14079_s2  ;;  %p10957_p12 = scmp.ge.s32.totalorder %s13845_s16, 1 }
  0x4b   : > { %s15532_s4 = scalar_select %p14081_p10, 1, 0 }
  0x4c   : > { %s15534_s11 = scalar_select %p14085_p11, 1, 0 }
  0x4d   : > { %15533 = sst [smem:[#allocation35_spill]] %s15532_s4  ;;  %p818_p13 = scmp.lt.s32.totalorder %s13845_s16, 3 }
  0x4e   : > { %15535 = sst [smem:[#allocation36_spill]] %s15534_s11 }
  0x4f   : > { %p819_p0 = pnand %p10957_p12, %p818_p13 }
  0x50   : > { %s14099_s15 = sshll.u32 (!%p819_p0), %s14064_s27, 3 }
  0x51   : > { %822 = sbr.rel (%p819_p0) target bundleno = 8458 (0x210a), region = 136  ;;  %s891_s5 = sld [smem:[#allocation4 + %s14099_s15]] (!%p819_p0) }
  0x52   : > { %s896_s22 = sadd.s32 (!%p819_p0), 1, %s14099_s15  ;;  %s901_s10 = sadd.s32 (!%p819_p0), 2, %s14099_s15 }
  0x53   : > { %s897_s28 = sld [smem:[#allocation4 + %s896_s22]] (!%p819_p0)  ;;  %s906_s2 = sadd.s32 (!%p819_p0), 3, %s14099_s15 }
  0x54   : > { %s902_s0 = sld [smem:[#allocation4 + %s901_s10]] (!%p819_p0)  ;;  %s911_s26 = sadd.s32 (!%p819_p0), 4, %s14099_s15 }
  0x55   : > { %s907_s11 = sld [smem:[#allocation4 + %s906_s2]] (!%p819_p0)  ;;  %s916_s12 = sadd.s32 (!%p819_p0), 5, %s14099_s15 }
  0x56   : > { %v13330_v0 = vld [vmem:[%s13900_s13 + $0x8] sm:$0xff]   ;;  %v13878_v1 = vmov 0.0   ;;  %v13331_v2 = vld [vmem:[%s13900_s13 + $0x18] sm:$0xff]   ;;  %v13332_v3 = vld [vmem:[%s13900_s13] sm:$0xff]   ;;  %vm13879_vm0 = vmmov 0   ;;  %vm894_vm1 = vcmask 253952  }
  0x57   : > { %12585 = vmatprep.subr.bf16.mxu0 %v13878_v1  ;;  %12593 = vmatprep.subr.bf16.mxu1 %v13878_v1  ;;  %v13333_v4 = vld [vmem:[%s13900_s13 + $0x10] sm:$0xff]   ;;  %s912_s16 = sld [smem:[#allocation4 + %s911_s26]]  ;;  %s921_s4 = sadd.s32 6, %s14099_s15  ;;  %v13334_v13 = vld [vmem:[%s13900_s13 + $0x28] sm:$0xff]   ;;  %v13335_v14 = vld [vmem:[%s13900_s13 + $0x38] sm:$0xff]   ;;  %vm1034_vm2 = vcmask 261120  }
  0x58   : > { %12586 = vmatpush3.bf16.msra.mxu0 %v13330_v0  ;;  %12589 = vmatprep.mubr.msk.bf16.mxu0 %vm13879_vm0, %v13878_v1  ;;  %s892_s22 = scalar_lea.vmem %s15524_s9, %s891_s5  ;;  %s917_s6 = sld [smem:[#allocation4 + %s916_s12]]  ;;  %v13336_v17 = vld [vmem:[%s13900_s13 + $0x20] sm:$0xff]   ;;  %v13337_v18 = vld [vmem:[%s13900_s13 + $0x30] sm:$0xff]   ;;  %v13338_v19 = vld [vmem:[%s13910_s21 + $0x8] sm:$0xff]   ;;  %vm1706_vm3 = vcmask 64512   ;;  %vm1950_vm4 = vcmask 1043456  }
  0x59   : > { %12594 = vmatpush3.bf16.msra.mxu1 %v13331_v2  ;;  %12587 = vmatprep.subr.bf16.mxu0 %v13878_v1  ;;  %v893_v5 = vld [vmem:[%s892_s22] sm:$0x1]  ;;  %s922_s10 = sld [smem:[#allocation4 + %s921_s4]]  ;;  %s926_s27 = sadd.s32 7, %s14099_s15  ;;  %v13339_v20 = vld [vmem:[%s13910_s21 + $0x18] sm:$0xff]   ;;  %v13341_v22 = vld [vmem:[%s13910_s21 + $0x10] sm:$0xff]  }
  0x5a   : > { %12595 = vmatprep.subr.bf16.mxu1 %v13878_v1  ;;  %12597 = vmatprep.mubr.msk.bf16.mxu1 %vm13879_vm0, %v13878_v1  ;;  %895 = vst.msk [vmem:[#allocation2] sm:$0x1] %vm894_vm1, %v893_v5  ;;  %s898_s2 = scalar_lea.vmem %s15524_s9, %s897_s28  ;;  %s927_s7 = sld [smem:[#allocation4 + %s926_s27]]  ;;  %v13340_v21 = vld [vmem:[%s13910_s21] sm:$0xff]   ;;  %v13342_v23 = vld [vmem:[%s13910_s21 + $0x28] sm:$0xff]   ;;  %v13343_v24 = vld [vmem:[%s13910_s21 + $0x38] sm:$0xff]  }
  0x5b   : > { %v899_v6 = vld [vmem:[%s898_s2] sm:$0x1]  ;;  %s903_s18 = scalar_lea.vmem %s15524_s9, %s902_s0  ;;  %s908_s26 = scalar_lea.vmem %s15524_s9, %s907_s11  ;;  %v13345_v26 = vld [vmem:[%s13910_s21 + $0x30] sm:$0xff]   ;;  %v13346_v27 = vld [vmem:[%s13920_s29 + $0x8] sm:$0xff]  }
  0x5c   : > { %12588 = vmatpush3.bf16.msra.mxu0 %v13332_v3  ;;  %900 = vst.msk [vmem:[#allocation2 + $0x1] sm:$0x1] %vm894_vm1, %v899_v6  ;;  %v904_v7 = vld [vmem:[%s903_s18] sm:$0x1]  ;;  %v13348_v29 = vld [vmem:[%s13920_s29 + $0x18] sm:$0xff]   ;;  %v13349_v30 = vld [vmem:[%s13920_s29 + $0x10] sm:$0xff]  }
  0x5d   : > { %12596 = vmatpush3.bf16.msra.mxu1 %v13333_v4  ;;  %12601 = vmatprep.subr.bf16.mxu0 %v13878_v1  ;;  %905 = vst.msk [vmem:[#allocation2 + $0x2] sm:$0x1] %vm894_vm1, %v904_v7  ;;  %v909_v8 = vld [vmem:[%s908_s26] sm:$0x1]  ;;  %s913_s12 = scalar_lea.vmem %s15524_s9, %s912_s16  ;;  %v13350_v31 = vld [vmem:[%s13920_s29 + $0x28] sm:$0xff]   ;;  %v13352_v33 = vld [vmem:[%s13920_s29 + $0x38] sm:$0xff]  }
  0x5e   : > { %12609 = vmatprep.subr.bf16.mxu1 %v13878_v1  ;;  %910 = vst.msk [vmem:[#allocation2 + $0x3] sm:$0x1] %vm894_vm1, %v909_v8  ;;  %v914_v9 = vld [vmem:[%s913_s12] sm:$0x1]  ;;  %s918_s4 = scalar_lea.vmem %s15524_s9, %s917_s6  ;;  %v13353_v34 = vld [vmem:[%s13920_s29 + $0x30] sm:$0xff]   ;;  %s15537_s6 = sld [smem:[#allocation13_spill]] }
  0x5f   : > { %915 = vst.msk [vmem:[#allocation2 + $0x4] sm:$0x1] %vm894_vm1, %v914_v9  ;;  %v919_v10 = vld [vmem:[%s918_s4] sm:$0x1]  ;;  %s923_s0 = scalar_lea.vmem %s15524_s9, %s922_s10  ;;  %v10977_v50 = vld [vmem:[%s13915_s25 + $0x1] ss:$0 sm:$0xff] }
  0x60   : > { %920 = vst.msk [vmem:[#allocation2 + $0x5] sm:$0x1] %vm894_vm1, %v919_v10  ;;  %v924_v11 = vld [vmem:[%s923_s0] sm:$0x1]  ;;  %s928_s18 = scalar_lea.vmem %s15524_s9, %s927_s7  ;;  %v10961_v58 = vld [vmem:[%s13905_s17 + $0x1] ss:$0 sm:$0xff] }
  0x61   : > { %925 = vst.msk [vmem:[#allocation2 + $0x6] sm:$0x1] %vm894_vm1, %v924_v11  ;;  %v929_v12 = vld [vmem:[%s928_s18] sm:$0x1]  ;;  %v10978_v2 = vld [vmem:[%s13915_s25 + $0x2] ss:$0 sm:$0xff] }
  0x62   : > { %930 = vst.msk [vmem:[#allocation2 + $0x7] sm:$0x1] %vm894_vm1, %v929_v12  ;;  %v13344_v25 = vld [vmem:[%s13910_s21 + $0x20] sm:$0xff]   ;;  %s15536_s7 = sld [smem:[#allocation14_spill]] }
  0x63   : > { %v13347_v28 = vld [vmem:[%s13920_s29] sm:$0xff]   ;;  %s15538_s16 = sld [smem:[#allocation12_spill]] }
  0x64   : > { %v13351_v32 = vld [vmem:[%s13920_s29 + $0x20] sm:$0xff]   ;;  %s15540_s11 = sld [smem:[#allocation15_spill]] }
  0x65   : > { %v10976_v49 = vld [vmem:[%s13915_s25] ss:$0 sm:$0xff]  ;;  %v10979_v3 = vld [vmem:[%s13915_s25 + $0x3] ss:$0 sm:$0xff]  ;;  %s15541_s15 = sld [smem:[#allocation16_spill]] }
  0x66   : > { %v10960_v57 = vld [vmem:[%s13905_s17] ss:$0 sm:$0xff]  ;;  %s15542_s5 = sld [smem:[#allocation17_spill]] }
  0x67   : > { %s15543_s28 = sld [smem:[#allocation22_spill]] }
  0x68   : > { %s15544_s22 = sld [smem:[#allocation18_spill]] }
  0x69   : > { %v931_v15 = vld [vmem:[#allocation2] sm:$0xff]  ;;  %s15539_s27 = smov %s15538_s16  ;;  %s15545_s10 = sld [smem:[#allocation19_spill]] }
  0x6a   : > { %v14134_v16 = vpack.c.bf16 %v931_v15, %v931_v15  ;;  %v10963_v15 = vld [vmem:[%s13905_s17 + $0x3] ss:$0 sm:$0xff]  ;;  %s15546_s2 = sld [smem:[#allocation24_spill]] }
  0x6b   : > { %s15547_s26 = sld [smem:[#allocation23_spill]] }
  0x6c   : > { %12590 = vmatmul.mubr.msk.bf16.vlgmr.msra.gmra.mxu0 %vm1034_vm2, %v14134_v16  ;;  %12598 = vmatmul.mubr.msk.bf16.vlgmr.msra.gmra.mxu1 %vm1034_vm2, %v14134_v16  ;;  %s15548_s12 = sld [smem:[#allocation20_spill]] }
  0x6d   : > { %12602 = vmatpush3.bf16.msra.mxu0 %v13334_v13  ;;  %12610 = vmatpush3.bf16.msra.mxu1 %v13335_v14  ;;  %v10962_v14 = vld [vmem:[%s13905_s17 + $0x2] ss:$0 sm:$0xff]  ;;  %s15550_s0 = sld [smem:[#allocation21_spill]] }
  0x6e   : > { %12603 = vmatprep.subr.bf16.mxu0 %v13878_v1  ;;  %12611 = vmatprep.subr.bf16.mxu1 %v13878_v1  ;;  %s15552_s18 = sld [smem:[#allocation29_spill]] }
  0x6f   : > { %12605 = vmatprep.mubr.msk.bf16.mxu0 %vm13879_vm0, %v13878_v1  ;;  %12613 = vmatprep.mubr.msk.bf16.mxu1 %vm13879_vm0, %v13878_v1 }
  0x71   : > { %12604 = vmatpush3.bf16.msra.mxu0 %v13336_v17  ;;  %12612 = vmatpush3.bf16.msra.mxu1 %v13337_v18 }
  0x72   : > { %12617 = vmatprep.subr.bf16.mxu0 %v13878_v1  ;;  %12625 = vmatprep.subr.bf16.mxu1 %v13878_v1  ;;  %s15549_s4 = smov %s15548_s12 }
  0x73   : > { %s15551_s9 = smov %s15550_s0 }
  0x74   : > { %12606 = vmatmul.mubr.msk.bf16.vlgmr.msra.gmra.mxu0 %vm1034_vm2, %v14134_v16  ;;  %12614 = vmatmul.mubr.msk.bf16.vlgmr.msra.gmra.mxu1 %vm1034_vm2, %v14134_v16 }
  0x75   : > { %12618 = vmatpush3.bf16.msra.mxu0 %v13338_v19  ;;  %12626 = vmatpush3.bf16.msra.mxu1 %v13339_v20 }
  0x76   : > { %12619 = vmatprep.subr.bf16.mxu0 %v13878_v1  ;;  %12627 = vmatprep.subr.bf16.mxu1 %v13878_v1 }
  0x77   : > { %12621 = vmatprep.mubr.msk.bf16.mxu0 %vm13879_vm0, %v13878_v1  ;;  %12629 = vmatprep.mubr.msk.bf16.mxu1 %vm13879_vm0, %v13878_v1 }
  0x79   : > { %12620 = vmatpush3.bf16.msra.mxu0 %v13340_v21  ;;  %12628 = vmatpush3.bf16.msra.mxu1 %v13341_v22 }
  0x7a   : > { %12633 = vmatprep.subr.bf16.mxu0 %v13878_v1  ;;  %12641 = vmatprep.subr.bf16.mxu1 %v13878_v1 }
  0x7c   : > { %12622 = vmatmul.mubr.msk.bf16.vlgmr.msra.gmra.mxu0 %vm1034_vm2, %v14134_v16  ;;  %12630 = vmatmul.mubr.msk.bf16.vlgmr.msra.gmra.mxu1 %vm1034_vm2, %v14134_v16 }
  0x7d   : > { %12634 = vmatpush3.bf16.msra.mxu0 %v13342_v23  ;;  %12642 = vmatpush3.bf16.msra.mxu1 %v13343_v24 }
  0x7e   : > { %12635 = vmatprep.subr.bf16.mxu0 %v13878_v1  ;;  %12643 = vmatprep.subr.bf16.mxu1 %v13878_v1 }
  0x7f   : > { %12637 = vmatprep.mubr.msk.bf16.mxu0 %vm13879_vm0, %v13878_v1  ;;  %12645 = vmatprep.mubr.msk.bf16.mxu1 %vm13879_vm0, %v13878_v1 }
  0x81   : > { %12636 = vmatpush3.bf16.msra.mxu0 %v13344_v25  ;;  %12644 = vmatpush3.bf16.msra.mxu1 %v13345_v26 }
  0x82   : > { %12649 = vmatprep.subr.bf16.mxu0 %v13878_v1  ;;  %12657 = vmatprep.subr.bf16.mxu1 %v13878_v1 }
  0x84   : > { %12638 = vmatmul.mubr.msk.bf16.vlgmr.msra.gmra.mxu0 %vm1034_vm2, %v14134_v16  ;;  %12646 = vmatmul.mubr.msk.bf16.vlgmr.msra.gmra.mxu1 %vm1034_vm2, %v14134_v16 }
  0x85   : > { %12653 = vmatprep.mubr.msk.bf16.mxu0 %vm13879_vm0, %v13878_v1  ;;  %12661 = vmatprep.mubr.msk.bf16.mxu1 %vm13879_vm0, %v13878_v1 }
  0x86   : > { %12650 = vmatpush3.bf16.msra.mxu0 %v13346_v27  ;;  %12658 = vmatpush3.bf16.msra.mxu1 %v13348_v29 }
  0x87   : > { %12651 = vmatprep.subr.bf16.mxu0 %v13878_v1  ;;  %12659 = vmatprep.subr.bf16.mxu1 %v13878_v1 }
  0x8a   : > { %12652 = vmatpush3.bf16.msra.mxu0 %v13347_v28  ;;  %12660 = vmatpush3.bf16.msra.mxu1 %v13349_v30 }
  0x8b   : > { %12665 = vmatprep.subr.bf16.mxu0 %v13878_v1  ;;  %12673 = vmatprep.subr.bf16.mxu1 %v13878_v1 }
  0x8d   : > { %12654 = vmatmul.mubr.msk.bf16.vlgmr.msra.gmra.mxu0 %vm1034_vm2, %v14134_v16  ;;  %12662 = vmatmul.mubr.msk.bf16.vlgmr.msra.gmra.mxu1 %vm1034_vm2, %v14134_v16 }
  0x8e   : > { %12666 = vmatpush3.bf16.msra.mxu0 %v13350_v31  ;;  %12669 = vmatprep.mubr.msk.bf16.mxu0 %vm13879_vm0, %v13878_v1 }
  0x8f   : > { %12667 = vmatprep.subr.bf16.mxu0 %v13878_v1  ;;  %12674 = vmatpush3.bf16.msra.mxu1 %v13352_v33  ;;  %v10992_v33 = vld [vmem:[%s15522_s3] ss:$0 sm:$0xff] }
  0x90   : > { %12675 = vmatprep.subr.bf16.mxu1 %v13878_v1  ;;  %12677 = vmatprep.mubr.msk.bf16.mxu1 %vm13879_vm0, %v13878_v1 }
  0x92   : > { %12668 = vmatpush3.bf16.msra.mxu0 %v13351_v32 }
  0x93   : > { %12681 = vmatprep.subr.bf16.mxu0 %v13878_v1  ;;  %12676 = vmatpush3.bf16.msra.mxu1 %v13353_v34 }
  0x94   : > { %12687 = vmatprep.subr.bf16.mxu1 %v13878_v1 }
  0x95   : > { %12670 = vmatmul.mubr.msk.bf16.vlgmr.msra.gmra.mxu0 %vm1034_vm2, %v14134_v16 }
  0x96   : > { %12683 = vmatprep.mubr.msk.bf16.mxu0 %vm13879_vm0, %v13878_v1  ;;  %12678 = vmatmul.mubr.msk.bf16.vlgmr.msra.gmra.mxu1 %vm1034_vm2, %v14134_v16 }
  0x97   : > { %12689 = vmatprep.mubr.msk.bf16.mxu1 %vm13879_vm0, %v13878_v1 }
 0x12c   : > { %v1072_v35 = vpop.f32.mrf.mxu0  ;;  %v1124_v36 = vpop.f32.mrf.mxu1 }
 0x12d   : > { %v1073_v8 = vadd.f32 %v10960_v57, %v1072_v35  ;;  %v1125_v9 = vadd.f32 %v10961_v58, %v1124_v36 }
 0x12e   : > { %v12591_v37 = vpop.f32.mrf.mxu0  ;;  %v12599_v38 = vpop.f32.mrf.mxu1 }
 0x12f   : > { %v1698_v19 = vpack.c.bf16 %v1073_v8, %v1073_v8  ;;  %v1699_v20 = vpack.c.bf16 %v1125_v9, %v1125_v9  ;;  %v10993_v37 = vld [vmem:[%s15522_s3 + $0x1] ss:$0 sm:$0xff] }
 0x130   : > { %v1075_v39 = vpop.f32.mrf.mxu0  ;;  %v1127_v40 = vpop.f32.mrf.mxu1 }
 0x132   : > { %v12592_v41 = vpop.f32.mrf.mxu0  ;;  %v12600_v42 = vpop.f32.mrf.mxu1 }
 0x134   : > { %v1176_v43 = vpop.f32.mrf.mxu0  ;;  %v1228_v44 = vpop.f32.mrf.mxu1 }
 0x135   : > { %v1177_v29 = vadd.f32 %v10962_v14, %v1176_v43  ;;  %v1229_v30 = vadd.f32 %v10963_v15, %v1228_v44 }
 0x136   : > { %v12607_v45 = vpop.f32.mrf.mxu0  ;;  %v12615_v46 = vpop.f32.mrf.mxu1 }
 0x137   : > { %v1700_v31 = vpack.c.bf16 %v1177_v29, %v1177_v29  ;;  %v1701_v32 = vpack.c.bf16 %v1229_v30, %v1229_v30 }
 0x138   : > { %v1179_v47 = vpop.f32.mrf.mxu0  ;;  %v1231_v48 = vpop.f32.mrf.mxu1 }
 0x13a   : > { %v12608_v51 = vpop.f32.mrf.mxu0  ;;  %v12616_v52 = vpop.f32.mrf.mxu1 }
 0x13c   : > { %v1304_v53 = vpop.f32.mrf.mxu0  ;;  %v1356_v54 = vpop.f32.mrf.mxu1 }
 0x13d   : > { %v1305_v55 = vadd.f32 %v10976_v49, %v1304_v53  ;;  %v1357_v56 = vadd.f32 %v10977_v50, %v1356_v54 }
 0x13e   : > { %v12623_v59 = vpop.f32.mrf.mxu0  ;;  %v12631_v60 = vpop.f32.mrf.mxu1 }
 0x13f   : > { %v1702_v61 = vpack.c.bf16 %v1305_v55, %v1305_v55  ;;  %v1703_v62 = vpack.c.bf16 %v1357_v56, %v1357_v56 }
 0x140   : > { %v1307_v63 = vpop.f32.mrf.mxu0  ;;  %v1359_v0 = vpop.f32.mrf.mxu1 }
 0x141   : > { %v1711_v4 = vsel %vm1706_vm3, %v1702_v61, 0  ;;  %v1757_v5 = vsel %vm1706_vm3, %v1703_v62, 0 }
 0x142   : > { %v12624_v6 = vpop.f32.mrf.mxu0  ;;  %v12632_v7 = vpop.f32.mrf.mxu1  ;;  %12682 = vmatpush3.bf16.xpose.msra.mxu0 %v1711_v4  ;;  %12688 = vmatpush3.bf16.xpose.msra.mxu1 %v1757_v5 }
 0x143   : > { %12693 = vmatprep.subr.bf16.mxu0 %v13878_v1  ;;  %12699 = vmatprep.subr.bf16.mxu1 %v13878_v1 }
 0x144   : > { %v1408_v10 = vpop.f32.mrf.mxu0  ;;  %v1460_v11 = vpop.f32.mrf.mxu1 }
 0x145   : > { %v1409_v12 = vadd.f32 %v10978_v2, %v1408_v10  ;;  %v1461_v13 = vadd.f32 %v10979_v3, %v1460_v11 }
 0x146   : > { %v12639_v17 = vpop.f32.mrf.mxu0  ;;  %v12647_v18 = vpop.f32.mrf.mxu1 }
 0x147   : > { %v1704_v21 = vpack.c.bf16 %v1409_v12, %v1409_v12  ;;  %v1705_v22 = vpack.c.bf16 %v1461_v13, %v1461_v13 }
 0x148   : > { %v1411_v23 = vpop.f32.mrf.mxu0  ;;  %v1463_v24 = vpop.f32.mrf.mxu1 }
 0x149   : > { %v1803_v25 = vsel %vm1706_vm3, %v1704_v21, 0  ;;  %v1849_v26 = vsel %vm1706_vm3, %v1705_v22, 0  ;;  %12684 = vmatmul.mubr.msk.bf16.vlgmr.msra.gmra.mxu0 %vm1706_vm3, %v1698_v19  ;;  %12690 = vmatmul.mubr.msk.bf16.vlgmr.msra.gmra.mxu1 %vm1706_vm3, %v1699_v20 }
 0x14a   : > { %v12640_v27 = vpop.f32.mrf.mxu0  ;;  %v12648_v28 = vpop.f32.mrf.mxu1  ;;  %12694 = vmatpush3.bf16.xpose.msra.mxu0 %v1803_v25  ;;  %12700 = vmatpush3.bf16.xpose.msra.mxu1 %v1849_v26 }
 0x14b   : > { %12695 = vmatprep.mubr.msk.bf16.mxu0 %vm13879_vm0, %v13878_v1  ;;  %12701 = vmatprep.mubr.msk.bf16.mxu1 %vm13879_vm0, %v13878_v1 }
 0x14c   : > { %12705 = vmatprep.subr.bf16.mxu0 %v13878_v1  ;;  %12711 = vmatprep.subr.bf16.mxu1 %v13878_v1 }
 0x14d   : > { %v1536_v34 = vpop.f32.mrf.mxu0  ;;  %v1588_v40 = vpop.f32.mrf.mxu1 }
 0x14e   : > { %v1537_v35 = vadd.f32 %v10992_v33, %v1536_v34  ;;  %v1589_v42 = vadd.f32 %v10993_v37, %v1588_v40 }
 0x14f   : > { %v12655_v36 = vpop.f32.mrf.mxu0  ;;  %v12663_v44 = vpop.f32.mrf.mxu1 }
 0x150   : > { %v1943_v38 = vpack.c.bf16 %v1537_v35, %v1537_v35  ;;  %v1944_v45 = vpack.c.bf16 %v1589_v42, %v1589_v42  ;;  %v10995_v44 = vld [vmem:[%s15522_s3 + $0x3] ss:$0 sm:$0xff] }
 0x151   : > { %12696 = vmatmul.mubr.msk.bf16.vlgmr.msra.gmra.mxu0 %vm1706_vm3, %v1700_v31  ;;  %12702 = vmatmul.mubr.msk.bf16.vlgmr.msra.gmra.mxu1 %vm1706_vm3, %v1701_v32  ;;  %v1539_v39 = vpop.f32.mrf.mxu0  ;;  %v1591_v46 = vpop.f32.mrf.mxu1 }
 0x152   : > { %12707 = vmatprep.mubr.msk.bf16.mxu0 %vm13879_vm0, %v13878_v1  ;;  %12713 = vmatprep.mubr.msk.bf16.mxu1 %vm13879_vm0, %v13878_v1  ;;  %v1952_v41 = vsel %vm1950_vm4, %v1943_v38, 0  ;;  %v1998_v48 = vsel %vm1950_vm4, %v1944_v45, 0 }
 0x153   : > { %v12656_v43 = vpop.f32.mrf.mxu0  ;;  %12706 = vmatpush3.bf16.msra.mxu0 %v1952_v41  ;;  %v12664_v49 = vpop.f32.mrf.mxu1  ;;  %12712 = vmatpush3.bf16.msra.mxu1 %v1998_v48  ;;  %v10994_v41 = vld [vmem:[%s15522_s3 + $0x2] ss:$0 sm:$0xff] }
 0x154   : > { %12717 = vmatprep.subr.bf16.mxu0 %v13878_v1  ;;  %12723 = vmatprep.subr.bf16.mxu1 %v13878_v1 }
 0x155   : > { %v14254_v47 = vpop.f32.mrf.mxu0 }
 0x156   : > { %v14258_v52 = vpop.f32.mrf.mxu1  ;;  %v1641_v43 = vadd.f32 %v10994_v41, %v14254_v47 }
 0x157   : > { %v12671_v50 = vpop.f32.mrf.mxu0  ;;  %v1693_v49 = vadd.f32 %v10995_v44, %v14258_v52 }
 0x158   : > { %v12679_v54 = vpop.f32.mrf.mxu1  ;;  %v1945_v48 = vpack.c.bf16 %v1641_v43, %v1641_v43 }
 0x159   : > { %v1643_v51 = vpop.f32.mrf.mxu0 }
 0x15a   : > { %v1695_v55 = vpop.f32.mrf.mxu1  ;;  %v2044_v54 = vsel %vm1950_vm4, %v1945_v48, 0 }
 0x15b   : > { %v12672_v53 = vpop.f32.mrf.mxu0  ;;  %v1946_v55 = vpack.c.bf16 %v1693_v49, %v1693_v49 }
 0x15c   : > { %v12680_v56 = vpop.f32.mrf.mxu1 }
 0x15d   : > { %v2090_v52 = vsel %vm1950_vm4, %v1946_v55, 0 }
 0x209   : > { %v1747_v57 = vpop.f32.mrf.mxu0  ;;  %v1793_v58 = vpop.f32.mrf.mxu1 }
 0x20a   : > { %v1891_v59 = vmul.f32 0.35355338, %v1747_v57  ;;  %v1892_v62 = vmul.f32 0.35355338, %v1793_v58  ;;  %v992_v58 = vld [vmem:[%s15521_s8] sm:$0xf] }
 0x20b   : > { %v12685_v60 = vpop.f32.mrf.mxu0  ;;  %v12691_v61 = vpop.f32.mrf.mxu1 }
 0x20c   : > { %v1895_v63 = vsel %vm1706_vm3, %v1891_v59, -inf  ;;  %v1898_v5 = vsel %vm1706_vm3, %v1892_v62, -inf  ;;  %v2140_v61 = vsel %vm1950_vm4, %v992_v58, 0 }
 0x20d   : > { %v1796_v0 = vpop.f32.mrf.mxu1  ;;  %1896 = vmax.xlane.f32.xlu0 %v1895_v63  ;;  %v1750_v2 = vpop.f32.mrf.mxu0 }
 0x20e   : > { %v993_v2 = vld [vmem:[%s15521_s8 + $0x4] sm:$0xf] }
 0x20f   : > { %v12686_v3 = vpop.f32.mrf.mxu0  ;;  %v12692_v4 = vpop.f32.mrf.mxu1 }
 0x210   : > { %v2186_v3 = vsel %vm1950_vm4, %v993_v2, 0  ;;  %v994_v4 = vld [vmem:[%s15521_s8 + $0x8] sm:$0xf]  ;;  %v13357_v2 = vld [vmem:[%s13940_s19 + $0x10] sm:$0xff]  }
 0x211   : > { %v1885_v6 = vpop.f32.mrf.mxu1  ;;  %1899 = vmax.xlane.f32.xlu0 %v1898_v5  ;;  %v1839_v7 = vpop.f32.mrf.mxu0 }
 0x212   : > { %v1893_v8 = vmul.f32 0.35355338, %v1839_v7  ;;  %v1894_v11 = vmul.f32 0.35355338, %v1885_v6  ;;  %v2232_v7 = vsel %vm1950_vm4, %v994_v4, 0 }
 0x213   : > { %v12697_v9 = vpop.f32.mrf.mxu0  ;;  %v12703_v10 = vpop.f32.mrf.mxu1 }
 0x214   : > { %v1901_v12 = vsel %vm1706_vm3, %v1893_v8, -inf  ;;  %v1904_v18 = vsel %vm1706_vm3, %v1894_v11, -inf  ;;  %v995_v9 = vld [vmem:[%s15521_s8 + $0xc] sm:$0xf] }
 0x215   : > { %v1888_v13 = vpop.f32.mrf.mxu1  ;;  %1902 = vmax.xlane.f32.xlu1 %v1901_v12  ;;  %v1842_v14 = vpop.f32.mrf.mxu0 }
 0x216   : > { %v2278_v13 = vsel %vm1950_vm4, %v995_v9, 0  ;;  %v11022_v9 = vld [vmem:[%s13985_s20] ss:$0 sm:$0xff] }
 0x217   : > { %v12698_v15 = vpop.f32.mrf.mxu0  ;;  %v12704_v17 = vpop.f32.mrf.mxu1 }
 0x219   : > { %1905 = vmax.xlane.f32.xlu1 %v1904_v18 }
 0x296   : > { %v1897_v19 = vpop.xlane.xlu0 %1896 }
 0x297   : > { %v1907_v20 = vsub.f32 %v1891_v59, %v1897_v19 }
 0x299   : > { %v1911_v21 = vmul.f32 1.442695, %v1907_v20 }
 0x29a   : > { %v1900_v22 = vpop.xlane.xlu0 %1899 }
 0x29b   : > { %13694 = vpow2.f32 %v1911_v21  ;;  %v1908_v23 = vsub.f32 %v1892_v62, %v1900_v22 }
 0x29d   : > { %v1913_v24 = vmul.f32 1.442695, %v1908_v23 }
 0x29e   : > { %v1903_v25 = vpop.xlane.xlu1 %1902 }
 0x29f   : > { %13696 = vpow2.f32 %v1913_v24  ;;  %v1909_v26 = vsub.f32 %v1893_v8, %v1903_v25 }
 0x2a1   : > { %v1915_v27 = vmul.f32 1.442695, %v1909_v26 }
 0x2a2   : > { %v1906_v28 = vpop.xlane.xlu1 %1905 }
 0x2a3   : > { %13698 = vpow2.f32 %v1915_v27  ;;  %v1910_v29 = vsub.f32 %v1894_v11, %v1906_v28 }
 0x2a5   : > { %v1917_v30 = vmul.f32 1.442695, %v1910_v29 }
 0x2a7   : > { %13700 = vpow2.f32 %v1917_v30 }
 0x2a8   : > { %v13695_v31 = vpop.eup %13694 }
 0x2a9   : > { %v1919_v32 = vsel %vm1706_vm3, %v13695_v31, 0.0 }
 0x2aa   : > { %1920 = vadd.xlane.f32.xlu0 %v1919_v32 }
 0x2ac   : > { %v13697_v33 = vpop.eup %13696 }
 0x2ad   : > { %v1922_v34 = vsel %vm1706_vm3, %v13697_v33, 0.0 }
 0x2ae   : > { %1923 = vadd.xlane.f32.xlu1 %v1922_v34 }
 0x2b0   : > { %v13699_v35 = vpop.eup %13698 }
 0x2b1   : > { %v1925_v36 = vsel %vm1706_vm3, %v13699_v35, 0.0 }
 0x2b2   : > { %1926 = vadd.xlane.f32.xlu0 %v1925_v36 }
 0x2b4   : > { %v13701_v37 = vpop.eup %13700 }
 0x2b5   : > { %v1928_v38 = vsel %vm1706_vm3, %v13701_v37, 0.0 }
 0x2b6   : > { %1929 = vadd.xlane.f32.xlu1 %v1928_v38 }
 0x333   : > { %v1921_v39 = vpop.xlane.xlu0 %1920 }
 0x334   : > { %13702 = vrcp.f32 %v1921_v39 }
 0x337   : > { %v1924_v40 = vpop.xlane.xlu1 %1923 }
 0x338   : > { %13704 = vrcp.f32 %v1924_v40 }
 0x33b   : > { %v1927_v42 = vpop.xlane.xlu0 %1926 }
 0x33c   : > { %13706 = vrcp.f32 %v1927_v42 }
 0x33f   : > { %v1930_v45 = vpop.xlane.xlu1 %1929 }
 0x340   : > { %13708 = vrcp.f32 %v1930_v45 }
 0x341   : > { %v13703_v46 = vpop.eup %13702 }
 0x342   : > { %v1935_v50 = vmul.f32 %v13703_v46, %v13695_v31  ;;  %v11020_v46 = vld [vmem:[%s13935_s14] ss:$0 sm:$0xff] }
 0x344   : > { %v1939_v51 = vpack.c.bf16 %v1935_v50, %v1935_v50 }
 0x345   : > { %v13705_v53 = vpop.eup %13704 }
 0x346   : > { %12708 = vmatmul.mubr.msk.bf16.vlgmr.msra.gmra.mxu0 %vm1706_vm3, %v1939_v51  ;;  %v1936_v56 = vmul.f32 %v13705_v53, %v13697_v33 }
 0x347   : > { %12718 = vmatpush3.bf16.msra.mxu0 %v2044_v54  ;;  %12719 = vmatprep.mubr.msk.bf16.mxu0 %vm13879_vm0, %v13878_v1 }
 0x348   : > { %v1940_v47 = vpack.c.bf16 %v1936_v56, %v1936_v56  ;;  %12729 = vmatprep.subr.bf16.mxu0 %v13878_v1  ;;  %v13770_v56 = vld [vmem:[#allocation2] sm:$0xff] }
 0x349   : > { %v13707_v57 = vpop.eup %13706 }
 0x34a   : > { %12714 = vmatmul.mubr.msk.bf16.vlgmr.msra.gmra.mxu1 %vm1706_vm3, %v1940_v47  ;;  %v1937_v59 = vmul.f32 %v13707_v57, %v13699_v35 }
 0x34b   : > { %12724 = vmatpush3.bf16.msra.mxu1 %v2090_v52  ;;  %12725 = vmatprep.mubr.msk.bf16.mxu1 %vm13879_vm0, %v13878_v1 }
 0x34c   : > { %v1941_v60 = vpack.c.bf16 %v1937_v59, %v1937_v59  ;;  %12735 = vmatprep.subr.bf16.mxu1 %v13878_v1 }
 0x34d   : > { %v13709_v62 = vpop.eup %13708 }
 0x34e   : > { %12720 = vmatmul.mubr.msk.bf16.vlgmr.msra.gmra.mxu0 %vm1706_vm3, %v1941_v60  ;;  %v1938_v63 = vmul.f32 %v13709_v62, %v13701_v37  ;;  %v13354_v62 = vld [vmem:[%s13940_s19 + $0x8] sm:$0xff]  }
 0x34f   : > { %12730 = vmatpush3.bf16.msra.mxu0 %v2140_v61  ;;  %12731 = vmatprep.mubr.msk.bf16.mxu0 %vm13879_vm0, %v13878_v1 }
 0x350   : > { %v1942_v0 = vpack.c.bf16 %v1938_v63, %v1938_v63  ;;  %12741 = vmatprep.subr.bf16.mxu0 %v13878_v1  ;;  %v13355_v63 = vld [vmem:[%s13940_s19 + $0x18] sm:$0xff]  }
 0x352   : > { %12726 = vmatmul.mubr.msk.bf16.vlgmr.msra.gmra.mxu1 %vm1706_vm3, %v1942_v0  ;;  %v13356_v0 = vld [vmem:[%s13940_s19] sm:$0xff]  }
 0x353   : > { %12737 = vmatprep.mubr.msk.bf16.mxu1 %vm13879_vm0, %v13878_v1  ;;  %12736 = vmatpush3.bf16.msra.mxu1 %v2186_v3 }
 0x354   : > { %12747 = vmatprep.subr.bf16.mxu1 %v13878_v1 }
 0x406   : > { %v1988_v5 = vpop.f32.mrf.mxu0 }
 0x407   : > { %v2132_v6 = vpack.c.bf16 %v1988_v5, %v1988_v5 }
 0x408   : > { %v12709_v8 = vpop.f32.mrf.mxu0 }
 0x409   : > { %12732 = vmatmul.mubr.msk.bf16.vlgmr.msra.gmra.mxu0 %vm1706_vm3, %v2132_v6 }
 0x40a   : > { %v1991_v10 = vpop.f32.mrf.mxu0  ;;  %v2034_v11 = vpop.f32.mrf.mxu1  ;;  %12742 = vmatpush3.bf16.msra.mxu0 %v2232_v7  ;;  %12743 = vmatprep.mubr.msk.bf16.mxu0 %vm13879_vm0, %v13878_v1  ;;  %v11021_v7 = vld [vmem:[%s13980_s24] ss:$0 sm:$0xff] }
 0x40b   : > { %v2133_v12 = vpack.c.bf16 %v2034_v11, %v2034_v11  ;;  %12753 = vmatprep.subr.bf16.mxu0 %v13878_v1 }
 0x40c   : > { %v12710_v14 = vpop.f32.mrf.mxu0  ;;  %v12715_v15 = vpop.f32.mrf.mxu1 }
 0x40d   : > { %12738 = vmatmul.mubr.msk.bf16.vlgmr.msra.gmra.mxu1 %vm1706_vm3, %v2133_v12  ;;  %v13358_v12 = vld [vmem:[%s13940_s19 + $0x28] sm:$0xff]   ;;  %v13360_v15 = vld [vmem:[%s13940_s19 + $0x20] sm:$0xff]  }
 0x40e   : > { %v2037_v17 = vpop.f32.mrf.mxu1  ;;  %v2080_v18 = vpop.f32.mrf.mxu0  ;;  %12748 = vmatpush3.bf16.msra.mxu1 %v2278_v13  ;;  %12749 = vmatprep.mubr.msk.bf16.mxu1 %vm13879_vm0, %v13878_v1  ;;  %v13359_v13 = vld [vmem:[%s13940_s19 + $0x38] sm:$0xff]  }
 0x40f   : > { %v2134_v19 = vpack.c.bf16 %v2080_v18, %v2080_v18  ;;  %12761 = vmatprep.subr.bf16.mxu1 %v13878_v1  ;;  %v13361_v17 = vld [vmem:[%s13940_s19 + $0x30] sm:$0xff]   ;;  %v13362_v18 = vld [vmem:[%s13950_s30 + $0x8] sm:$0xff]  }
 0x410   : > { %v12716_v20 = vpop.f32.mrf.mxu1  ;;  %v12721_v21 = vpop.f32.mrf.mxu0 }
 0x411   : > { %12744 = vmatmul.mubr.msk.bf16.vlgmr.msra.gmra.mxu0 %vm1706_vm3, %v2134_v19  ;;  %v13363_v19 = vld [vmem:[%s13950_s30 + $0x18] sm:$0xff]   ;;  %v13364_v20 = vld [vmem:[%s13950_s30] sm:$0xff]   ;;  %v13365_v21 = vld [vmem:[%s13950_s30 + $0x10] sm:$0xff]  }
 0x412   : > { %v2083_v22 = vpop.f32.mrf.mxu0  ;;  %v2126_v23 = vpop.f32.mrf.mxu1  ;;  %12757 = vmatprep.mubr.msk.bf16.mxu0 %vm13879_vm0, %v13878_v1  ;;  %12754 = vmatpush3.bf16.msra.mxu0 %v13354_v62 }
 0x413   : > { %v2135_v24 = vpack.c.bf16 %v2126_v23, %v2126_v23  ;;  %12755 = vmatprep.subr.bf16.mxu0 %v13878_v1  ;;  %v13366_v22 = vld [vmem:[%s13950_s30 + $0x28] sm:$0xff]   ;;  %v13367_v23 = vld [vmem:[%s13950_s30 + $0x38] sm:$0xff]  }
 0x414   : > { %v12722_v25 = vpop.f32.mrf.mxu0  ;;  %v12727_v26 = vpop.f32.mrf.mxu1 }
 0x415   : > { %12750 = vmatmul.mubr.msk.bf16.vlgmr.msra.gmra.mxu1 %vm1706_vm3, %v2135_v24  ;;  %v13368_v24 = vld [vmem:[%s13950_s30 + $0x20] sm:$0xff]   ;;  %v13369_v25 = vld [vmem:[%s13950_s30 + $0x30] sm:$0xff]   ;;  %v13370_v26 = vld [vmem:[%s15536_s7 + $0x8] sm:$0xff]  }
 0x416   : > { %v2129_v27 = vpop.f32.mrf.mxu1  ;;  %12765 = vmatprep.mubr.msk.bf16.mxu1 %vm13879_vm0, %v13878_v1  ;;  %12762 = vmatpush3.bf16.msra.mxu1 %v13355_v63 }
 0x417   : > { %12763 = vmatprep.subr.bf16.mxu1 %v13878_v1  ;;  %12756 = vmatpush3.bf16.msra.mxu0 %v13356_v0  ;;  %v13371_v27 = vld [vmem:[%s15536_s7 + $0x18] sm:$0xff]  }
 0x418   : > { %v12728_v28 = vpop.f32.mrf.mxu1  ;;  %12769 = vmatprep.subr.bf16.mxu0 %v13878_v1 }
 0x419   : > { %v13372_v28 = vld [vmem:[%s15536_s7] sm:$0xff]  }
 0x41a   : > { %12764 = vmatpush3.bf16.msra.mxu1 %v13357_v2 }
 0x41b   : > { %12777 = vmatprep.subr.bf16.mxu1 %v13878_v1 }
 0x4c9   : > { %v2176_v29 = vpop.f32.mrf.mxu0 }
 0x4ca   : > { %v2320_v38 = vsel %vm1034_vm2, %v2176_v29, 0.0  ;;  %v13373_v29 = vld [vmem:[%s15536_s7 + $0x10] sm:$0xff]  }
 0x4cb   : > { %v12733_v30 = vpop.f32.mrf.mxu0 }
 0x4cc   : > { %v13374_v30 = vld [vmem:[%s15536_s7 + $0x28] sm:$0xff]  }
 0x4cd   : > { %v2179_v31 = vpop.f32.mrf.mxu0  ;;  %v2222_v32 = vpop.f32.mrf.mxu1 }
 0x4ce   : > { %v2321_v35 = vsel %vm1034_vm2, %v2222_v32, 0.0  ;;  %v13375_v31 = vld [vmem:[%s15536_s7 + $0x38] sm:$0xff]   ;;  %v13376_v32 = vld [vmem:[%s15536_s7 + $0x20] sm:$0xff]  }
 0x4cf   : > { %v12734_v33 = vpop.f32.mrf.mxu0  ;;  %v12739_v34 = vpop.f32.mrf.mxu1  ;;  %v2322_v40 = vadd.f32 %v2321_v35, %v2320_v38 }
 0x4d0   : > { %v13377_v33 = vld [vmem:[%s15536_s7 + $0x30] sm:$0xff]  }
 0x4d1   : > { %v2225_v36 = vpop.f32.mrf.mxu1  ;;  %v2268_v37 = vpop.f32.mrf.mxu0 }
 0x4d2   : > { %v2323_v39 = vsel %vm1034_vm2, %v2268_v37, 0.0 }
 0x4d3   : > { %v12740_v41 = vpop.f32.mrf.mxu1  ;;  %v12745_v42 = vpop.f32.mrf.mxu0  ;;  %v2324_v43 = vadd.f32 %v2323_v39, %v2322_v40 }
 0x4d5   : > { %v2271_v44 = vpop.f32.mrf.mxu0  ;;  %v2314_v45 = vpop.f32.mrf.mxu1 }
 0x4d6   : > { %v2325_v48 = vsel %vm1034_vm2, %v2314_v45, 0.0 }
 0x4d7   : > { %v2326_v49 = vadd.f32 %v2325_v48, %v2324_v43  ;;  %v12746_v50 = vpop.f32.mrf.mxu0  ;;  %v12751_v51 = vpop.f32.mrf.mxu1 }
 0x4d8   : > { %v11039_v50 = vld [vmem:[%s15537_s6] ss:$0 sm:$0xff]  ;;  %v11040_v51 = vld [vmem:[%s15537_s6 + $0x1] ss:$0 sm:$0xff] }
 0x4d9   : > { %v2331_v53 = vadd.f32 %v11020_v46, %v2326_v49  ;;  %v2317_v54 = vpop.f32.mrf.mxu1 }
 0x4db   : > { %v12752_v55 = vpop.f32.mrf.mxu1  ;;  %v2334_v47 = vadd.f32 %v13770_v56, %v2331_v53 }
 0x4dd   : > { %v2335_v57 = vsel %vm1034_vm2, %v2334_v47, 0.0 }
 0x4de   : > { %2336 = vadd.xlane.f32.xlu0 %v2335_v57 }
 0x567   : > { %v2337_v58 = vpop.xlane.xlu0 %2336 }
 0x568   : > { %v2339_v52 = vmul.f32 0.03125, %v2337_v58 }
 0x56a   : > { %v2340_v59 = vsub.f32 %v2334_v47, %v2339_v52 }
 0x56c   : > { %v2341_v60 = vmul.f32 %v2340_v59, %v2340_v59 }
 0x56e   : > { %v2342_v61 = vsel %vm1034_vm2, %v2341_v60, 0.0  ;;  %v11024_v60 = vld [vmem:[%s15539_s27 + $0x1] ss:$0 sm:$0xff] }
 0x56f   : > { %2343 = vadd.xlane.f32.xlu1 %v2342_v61 }
 0x5f8   : > { %v2344_v3 = vpop.xlane.xlu1 %2343 }
 0x5f9   : > { %v2345_v4 = vmul.f32 0.03125, %v2344_v3 }
 0x5fb   : > { %v2346_v5 = vadd.f32 1e-05, %v2345_v4  ;;  %v11041_v4 = vld [vmem:[%s15537_s6 + $0x2] ss:$0 sm:$0xff] }
 0x5fd   : > { %13710 = vrsqrt.f32 %v2346_v5  ;;  %v11042_v5 = vld [vmem:[%s15537_s6 + $0x3] ss:$0 sm:$0xff] }
 0x60a   : > { %v13711_v6 = vpop.eup %13710 }
 0x60b   : > { %v2348_v8 = vmul.f32 %v13711_v6, %v2340_v59  ;;  %v11023_v59 = vld [vmem:[%s15538_s16] ss:$0 sm:$0xff]  ;;  %s15553_s16 = sld [smem:[#allocation26_spill]] }
 0x60d   : > { %v2353_v10 = vmul.f32 %v11021_v7, %v2348_v8 }
 0x60f   : > { %v14329_v11 = vadd.f32 %v11022_v9, %v2353_v10 }
 0x611   : > { %v2424_v14 = vpack.c.bf16 %v14329_v11, %v14329_v11 }
 0x613   : > { %12758 = vmatmul.mubr.msk.bf16.vlgmr.msra.gmra.mxu0 %vm1034_vm2, %v2424_v14  ;;  %12766 = vmatmul.mubr.msk.bf16.vlgmr.msra.gmra.mxu1 %vm1034_vm2, %v2424_v14 }
 0x614   : > { %12770 = vmatpush3.bf16.msra.mxu0 %v13358_v12  ;;  %12778 = vmatpush3.bf16.msra.mxu1 %v13359_v13 }
 0x615   : > { %12771 = vmatprep.subr.bf16.mxu0 %v13878_v1  ;;  %12779 = vmatprep.subr.bf16.mxu1 %v13878_v1 }
 0x616   : > { %12773 = vmatprep.mubr.msk.bf16.mxu0 %vm13879_vm0, %v13878_v1  ;;  %12781 = vmatprep.mubr.msk.bf16.mxu1 %vm13879_vm0, %v13878_v1 }
 0x618   : > { %12772 = vmatpush3.bf16.msra.mxu0 %v13360_v15  ;;  %12780 = vmatpush3.bf16.msra.mxu1 %v13361_v17 }
 0x619   : > { %12785 = vmatprep.subr.bf16.mxu0 %v13878_v1  ;;  %12793 = vmatprep.subr.bf16.mxu1 %v13878_v1 }
 0x61b   : > { %12774 = vmatmul.mubr.msk.bf16.vlgmr.msra.gmra.mxu0 %vm1034_vm2, %v2424_v14  ;;  %12782 = vmatmul.mubr.msk.bf16.vlgmr.msra.gmra.mxu1 %vm1034_vm2, %v2424_v14 }
 0x61c   : > { %12786 = vmatpush3.bf16.msra.mxu0 %v13362_v18  ;;  %12794 = vmatpush3.bf16.msra.mxu1 %v13363_v19 }
 0x61d   : > { %12787 = vmatprep.subr.bf16.mxu0 %v13878_v1  ;;  %12795 = vmatprep.subr.bf16.mxu1 %v13878_v1 }
 0x61e   : > { %12789 = vmatprep.mubr.msk.bf16.mxu0 %vm13879_vm0, %v13878_v1  ;;  %12797 = vmatprep.mubr.msk.bf16.mxu1 %vm13879_vm0, %v13878_v1 }
 0x620   : > { %12788 = vmatpush3.bf16.msra.mxu0 %v13364_v20  ;;  %12796 = vmatpush3.bf16.msra.mxu1 %v13365_v21  ;;  %v11025_v20 = vld [vmem:[%s15539_s27 + $0x2] ss:$0 sm:$0xff]  ;;  %v11026_v21 = vld [vmem:[%s15539_s27 + $0x3] ss:$0 sm:$0xff] }
 0x621   : > { %12801 = vmatprep.subr.bf16.mxu0 %v13878_v1  ;;  %12809 = vmatprep.subr.bf16.mxu1 %v13878_v1 }
 0x623   : > { %12790 = vmatmul.mubr.msk.bf16.vlgmr.msra.gmra.mxu0 %vm1034_vm2, %v14134_v16  ;;  %12798 = vmatmul.mubr.msk.bf16.vlgmr.msra.gmra.mxu1 %vm1034_vm2, %v14134_v16 }
 0x624   : > { %12802 = vmatpush3.bf16.msra.mxu0 %v13366_v22  ;;  %12810 = vmatpush3.bf16.msra.mxu1 %v13367_v23 }
 0x625   : > { %12803 = vmatprep.subr.bf16.mxu0 %v13878_v1  ;;  %12811 = vmatprep.subr.bf16.mxu1 %v13878_v1 }
 0x626   : > { %12805 = vmatprep.mubr.msk.bf16.mxu0 %vm13879_vm0, %v13878_v1  ;;  %12813 = vmatprep.mubr.msk.bf16.mxu1 %vm13879_vm0, %v13878_v1 }
 0x628   : > { %12804 = vmatpush3.bf16.msra.mxu0 %v13368_v24  ;;  %12812 = vmatpush3.bf16.msra.mxu1 %v13369_v25 }
 0x629   : > { %12817 = vmatprep.subr.bf16.mxu0 %v13878_v1  ;;  %12825 = vmatprep.subr.bf16.mxu1 %v13878_v1 }
 0x62b   : > { %12806 = vmatmul.mubr.msk.bf16.vlgmr.msra.gmra.mxu0 %vm1034_vm2, %v14134_v16  ;;  %12814 = vmatmul.mubr.msk.bf16.vlgmr.msra.gmra.mxu1 %vm1034_vm2, %v14134_v16 }
 0x62c   : > { %12821 = vmatprep.mubr.msk.bf16.mxu0 %vm13879_vm0, %v13878_v1  ;;  %12829 = vmatprep.mubr.msk.bf16.mxu1 %vm13879_vm0, %v13878_v1 }
 0x62d   : > { %12818 = vmatpush3.bf16.msra.mxu0 %v13370_v26  ;;  %12826 = vmatpush3.bf16.msra.mxu1 %v13371_v27 }
 0x62e   : > { %12819 = vmatprep.subr.bf16.mxu0 %v13878_v1  ;;  %12827 = vmatprep.subr.bf16.mxu1 %v13878_v1 }
 0x631   : > { %12820 = vmatpush3.bf16.msra.mxu0 %v13372_v28  ;;  %12828 = vmatpush3.bf16.msra.mxu1 %v13373_v29 }
 0x632   : > { %12833 = vmatprep.subr.bf16.mxu0 %v13878_v1  ;;  %12841 = vmatprep.subr.bf16.mxu1 %v13878_v1 }
 0x634   : > { %12822 = vmatmul.mubr.msk.bf16.vlgmr.msra.gmra.mxu0 %vm1034_vm2, %v14134_v16  ;;  %12830 = vmatmul.mubr.msk.bf16.vlgmr.msra.gmra.mxu1 %vm1034_vm2, %v14134_v16 }
 0x635   : > { %12834 = vmatpush3.bf16.msra.mxu0 %v13374_v30  ;;  %12837 = vmatprep.mubr.msk.bf16.mxu0 %vm13879_vm0, %v13878_v1 }
 0x636   : > { %12835 = vmatprep.subr.bf16.mxu0 %v13878_v1  ;;  %12842 = vmatpush3.bf16.msra.mxu1 %v13375_v31 }
 0x637   : > { %12845 = vmatprep.mubr.msk.bf16.mxu1 %vm13879_vm0, %v13878_v1  ;;  %12843 = vmatprep.subr.bf16.mxu1 %v13878_v1 }
 0x639   : > { %12836 = vmatpush3.bf16.msra.mxu0 %v13376_v32  ;;  %v11055_v32 = vld [vmem:[%s15540_s11] ss:$0 sm:$0xff] }
 0x63a   : > { %12849 = vmatprep.subr.bf16.mxu0 %v13878_v1  ;;  %12844 = vmatpush3.bf16.msra.mxu1 %v13377_v33 }
 0x63b   : > { %12855 = vmatprep.subr.bf16.mxu1 %v13878_v1 }
 0x63c   : > { %12838 = vmatmul.mubr.msk.bf16.vlgmr.msra.gmra.mxu0 %vm1034_vm2, %v14134_v16 }
 0x63d   : > { %12851 = vmatprep.mubr.msk.bf16.mxu0 %vm13879_vm0, %v13878_v1  ;;  %12846 = vmatmul.mubr.msk.bf16.vlgmr.msra.gmra.mxu1 %vm1034_vm2, %v14134_v16 }
 0x63e   : > { %12857 = vmatprep.mubr.msk.bf16.mxu1 %vm13879_vm0, %v13878_v1 }
 0x6d3   : > { %v2498_v34 = vpop.f32.mrf.mxu0  ;;  %v2550_v35 = vpop.f32.mrf.mxu1 }
 0x6d4   : > { %v2499_v6 = vadd.f32 %v11023_v59, %v2498_v34  ;;  %v2551_v7 = vadd.f32 %v11024_v60, %v2550_v35  ;;  %v11056_v34 = vld [vmem:[%s15540_s11 + $0x1] ss:$0 sm:$0xff] }
 0x6d5   : > { %v12759_v36 = vpop.f32.mrf.mxu0  ;;  %v12767_v37 = vpop.f32.mrf.mxu1 }
 0x6d6   : > { %v3124_v15 = vpack.c.bf16 %v2499_v6, %v2499_v6  ;;  %v3125_v17 = vpack.c.bf16 %v2551_v7, %v2551_v7 }
 0x6d7   : > { %v2501_v38 = vpop.f32.mrf.mxu0  ;;  %v2553_v39 = vpop.f32.mrf.mxu1 }
 0x6d9   : > { %v12760_v40 = vpop.f32.mrf.mxu0  ;;  %v12768_v41 = vpop.f32.mrf.mxu1 }
 0x6db   : > { %v2602_v42 = vpop.f32.mrf.mxu0  ;;  %v2654_v43 = vpop.f32.mrf.mxu1 }
 0x6dc   : > { %v2603_v28 = vadd.f32 %v11025_v20, %v2602_v42  ;;  %v2655_v29 = vadd.f32 %v11026_v21, %v2654_v43 }
 0x6dd   : > { %v12775_v44 = vpop.f32.mrf.mxu0  ;;  %v12783_v45 = vpop.f32.mrf.mxu1 }
 0x6de   : > { %v3126_v30 = vpack.c.bf16 %v2603_v28, %v2603_v28  ;;  %v3127_v31 = vpack.c.bf16 %v2655_v29, %v2655_v29 }
 0x6df   : > { %v2605_v16 = vpop.f32.mrf.mxu0  ;;  %v2657_v46 = vpop.f32.mrf.mxu1 }
 0x6e1   : > { %v12776_v48 = vpop.f32.mrf.mxu0  ;;  %v12784_v49 = vpop.f32.mrf.mxu1 }
 0x6e3   : > { %v2730_v53 = vpop.f32.mrf.mxu0  ;;  %v2782_v54 = vpop.f32.mrf.mxu1 }
 0x6e4   : > { %v2731_v55 = vadd.f32 %v11039_v50, %v2730_v53  ;;  %v2783_v56 = vadd.f32 %v11040_v51, %v2782_v54 }
 0x6e5   : > { %v12791_v47 = vpop.f32.mrf.mxu0  ;;  %v12799_v57 = vpop.f32.mrf.mxu1 }
 0x6e6   : > { %v3128_v58 = vpack.c.bf16 %v2731_v55, %v2731_v55  ;;  %v3129_v52 = vpack.c.bf16 %v2783_v56, %v2783_v56 }
 0x6e7   : > { %v2733_v61 = vpop.f32.mrf.mxu0  ;;  %v2785_v62 = vpop.f32.mrf.mxu1 }
 0x6e8   : > { %v3136_v63 = vsel %vm1706_vm3, %v3128_v58, 0  ;;  %v3182_v0 = vsel %vm1706_vm3, %v3129_v52, 0 }
 0x6e9   : > { %v12792_v2 = vpop.f32.mrf.mxu0  ;;  %v12800_v3 = vpop.f32.mrf.mxu1  ;;  %12850 = vmatpush3.bf16.xpose.msra.mxu0 %v3136_v63  ;;  %12856 = vmatpush3.bf16.xpose.msra.mxu1 %v3182_v0 }
 0x6ea   : > { %12861 = vmatprep.subr.bf16.mxu0 %v13878_v1  ;;  %12867 = vmatprep.subr.bf16.mxu1 %v13878_v1 }
 0x6eb   : > { %v2834_v8 = vpop.f32.mrf.mxu0  ;;  %v2886_v9 = vpop.f32.mrf.mxu1 }
 0x6ec   : > { %v2835_v10 = vadd.f32 %v11041_v4, %v2834_v8  ;;  %v2887_v12 = vadd.f32 %v11042_v5, %v2886_v9 }
 0x6ed   : > { %v12807_v13 = vpop.f32.mrf.mxu0  ;;  %v12815_v14 = vpop.f32.mrf.mxu1 }
 0x6ee   : > { %v3130_v18 = vpack.c.bf16 %v2835_v10, %v2835_v10  ;;  %v3131_v19 = vpack.c.bf16 %v2887_v12, %v2887_v12 }
 0x6ef   : > { %v2837_v22 = vpop.f32.mrf.mxu0  ;;  %v2889_v23 = vpop.f32.mrf.mxu1 }
 0x6f0   : > { %v3228_v24 = vsel %vm1706_vm3, %v3130_v18, 0  ;;  %v3274_v25 = vsel %vm1706_vm3, %v3131_v19, 0  ;;  %12852 = vmatmul.mubr.msk.bf16.vlgmr.msra.gmra.mxu0 %vm1706_vm3, %v3124_v15  ;;  %12858 = vmatmul.mubr.msk.bf16.vlgmr.msra.gmra.mxu1 %vm1706_vm3, %v3125_v17 }
 0x6f1   : > { %v12808_v26 = vpop.f32.mrf.mxu0  ;;  %v12816_v27 = vpop.f32.mrf.mxu1  ;;  %12862 = vmatpush3.bf16.xpose.msra.mxu0 %v3228_v24  ;;  %12868 = vmatpush3.bf16.xpose.msra.mxu1 %v3274_v25 }
 0x6f2   : > { %12863 = vmatprep.mubr.msk.bf16.mxu0 %vm13879_vm0, %v13878_v1  ;;  %12869 = vmatprep.mubr.msk.bf16.mxu1 %vm13879_vm0, %v13878_v1 }
 0x6f3   : > { %12873 = vmatprep.subr.bf16.mxu0 %v13878_v1  ;;  %12879 = vmatprep.subr.bf16.mxu1 %v13878_v1 }
 0x6f4   : > { %v2962_v33 = vpop.f32.mrf.mxu0  ;;  %v3014_v37 = vpop.f32.mrf.mxu1 }
 0x6f5   : > { %v2963_v35 = vadd.f32 %v11055_v32, %v2962_v33  ;;  %v3015_v39 = vadd.f32 %v11056_v34, %v3014_v37 }
 0x6f6   : > { %v12823_v36 = vpop.f32.mrf.mxu0  ;;  %v12831_v41 = vpop.f32.mrf.mxu1 }
 0x6f7   : > { %v3368_v38 = vpack.c.bf16 %v2963_v35, %v2963_v35  ;;  %v3369_v43 = vpack.c.bf16 %v3015_v39, %v3015_v39 }
 0x6f8   : > { %12864 = vmatmul.mubr.msk.bf16.vlgmr.msra.gmra.mxu0 %vm1706_vm3, %v3126_v30  ;;  %12870 = vmatmul.mubr.msk.bf16.vlgmr.msra.gmra.mxu1 %vm1706_vm3, %v3127_v31  ;;  %v2965_v40 = vpop.f32.mrf.mxu0  ;;  %v3017_v45 = vpop.f32.mrf.mxu1 }
 0x6f9   : > { %12875 = vmatprep.mubr.msk.bf16.mxu0 %vm13879_vm0, %v13878_v1  ;;  %12881 = vmatprep.mubr.msk.bf16.mxu1 %vm13879_vm0, %v13878_v1  ;;  %v3376_v42 = vsel %vm1950_vm4, %v3368_v38, 0  ;;  %v3422_v16 = vsel %vm1950_vm4, %v3369_v43, 0  ;;  %v11058_v40 = vld [vmem:[%s15540_s11 + $0x3] ss:$0 sm:$0xff] }
 0x6fa   : > { %v12824_v44 = vpop.f32.mrf.mxu0  ;;  %12874 = vmatpush3.bf16.msra.mxu0 %v3376_v42  ;;  %v12832_v46 = vpop.f32.mrf.mxu1  ;;  %12880 = vmatpush3.bf16.msra.mxu1 %v3422_v16  ;;  %v11057_v42 = vld [vmem:[%s15540_s11 + $0x2] ss:$0 sm:$0xff] }
 0x6fb   : > { %12885 = vmatprep.subr.bf16.mxu0 %v13878_v1  ;;  %12891 = vmatprep.subr.bf16.mxu1 %v13878_v1 }
 0x6fc   : > { %v14450_v48 = vpop.f32.mrf.mxu0 }
 0x6fd   : > { %v14453_v50 = vpop.f32.mrf.mxu1  ;;  %v3067_v45 = vadd.f32 %v11057_v42, %v14450_v48 }
 0x6fe   : > { %v12839_v49 = vpop.f32.mrf.mxu0  ;;  %v3119_v44 = vadd.f32 %v11058_v40, %v14453_v50  ;;  %v2420_v50 = vld [vmem:[%s15541_s15 + $0x4] sm:$0xf] }
 0x6ff   : > { %v12847_v53 = vpop.f32.mrf.mxu1 }
 0x700   : > { %v3069_v51 = vpop.f32.mrf.mxu0  ;;  %v3371_v49 = vpack.c.bf16 %v3119_v44, %v3119_v44  ;;  %v3370_v53 = vpack.c.bf16 %v3067_v45, %v3067_v45  ;;  %v11083_v45 = vld [vmem:[%s15542_s5] ss:$0 sm:$0xff] }
 0x701   : > { %v3121_v55 = vpop.f32.mrf.mxu1 }
 0x702   : > { %v12840_v54 = vpop.f32.mrf.mxu0 }
 0x703   : > { %v12848_v56 = vpop.f32.mrf.mxu1 }
 0x7b0   : > { %v3172_v47 = vpop.f32.mrf.mxu0  ;;  %v3218_v57 = vpop.f32.mrf.mxu1 }
 0x7b1   : > { %v3316_v58 = vmul.f32 0.35355338, %v3172_v47  ;;  %v3317_v52 = vmul.f32 0.35355338, %v3218_v57  ;;  %v3514_v47 = vsel %vm1950_vm4, %v3371_v49, 0  ;;  %v3468_v57 = vsel %vm1950_vm4, %v3370_v53, 0 }
 0x7b2   : > { %v12853_v59 = vpop.f32.mrf.mxu0  ;;  %v12859_v60 = vpop.f32.mrf.mxu1 }
 0x7b3   : > { %v3323_v61 = vsel %vm1706_vm3, %v3317_v52, -inf  ;;  %v3320_v62 = vsel %vm1706_vm3, %v3316_v58, -inf  ;;  %v2419_v59 = vld [vmem:[%s15541_s15] sm:$0xf] }
 0x7b4   : > { %3324 = vmax.xlane.f32.xlu1 %v3323_v61  ;;  %v3221_v63 = vpop.f32.mrf.mxu1  ;;  %3321 = vmax.xlane.f32.xlu0 %v3320_v62  ;;  %v3175_v0 = vpop.f32.mrf.mxu0  ;;  %v3610_v62 = vsel %vm1950_vm4, %v2420_v50, 0 }
 0x7b5   : > { %v3564_v0 = vsel %vm1950_vm4, %v2419_v59, 0  ;;  %v3787_v59 = vld [vmem:[%s15543_s28 + $0x80] sm:$0xff] }
 0x7b6   : > { %v12854_v2 = vpop.f32.mrf.mxu0  ;;  %v12860_v3 = vpop.f32.mrf.mxu1 }
 0x7b7   : > { %v2422_v2 = vld [vmem:[%s15541_s15 + $0xc] sm:$0xf]  ;;  %v2421_v3 = vld [vmem:[%s15541_s15 + $0x8] sm:$0xf] }
 0x7b8   : > { %v3264_v4 = vpop.f32.mrf.mxu0  ;;  %v3310_v5 = vpop.f32.mrf.mxu1 }
 0x7b9   : > { %v3318_v6 = vmul.f32 0.35355338, %v3264_v4  ;;  %v3319_v7 = vmul.f32 0.35355338, %v3310_v5 }
 0x7ba   : > { %v12865_v8 = vpop.f32.mrf.mxu0  ;;  %v12871_v9 = vpop.f32.mrf.mxu1 }
 0x7bb   : > { %v3329_v10 = vsel %vm1706_vm3, %v3319_v7, -inf  ;;  %v3326_v12 = vsel %vm1706_vm3, %v3318_v6, -inf }
 0x7bc   : > { %3330 = vmax.xlane.f32.xlu1 %v3329_v10  ;;  %v3313_v13 = vpop.f32.mrf.mxu1  ;;  %3327 = vmax.xlane.f32.xlu0 %v3326_v12  ;;  %v3267_v14 = vpop.f32.mrf.mxu0  ;;  %v3656_v10 = vsel %vm1950_vm4, %v2421_v3, 0  ;;  %v3783_v3 = vld [vmem:[%s15543_s28] sm:$0xff] }
 0x7be   : > { %v12866_v15 = vpop.f32.mrf.mxu0  ;;  %v12872_v17 = vpop.f32.mrf.mxu1 }
 0x83d   : > { %v3325_v18 = vpop.xlane.xlu1 %3324  ;;  %v3322_v19 = vpop.xlane.xlu0 %3321 }
 0x83e   : > { %v3333_v20 = vsub.f32 %v3317_v52, %v3325_v18  ;;  %v3332_v21 = vsub.f32 %v3316_v58, %v3322_v19 }
 0x840   : > { %v3338_v22 = vmul.f32 1.442695, %v3333_v20  ;;  %v3336_v23 = vmul.f32 1.442695, %v3332_v21 }
 0x842   : > { %13712 = vpow2.f32 %v3338_v22 }
 0x843   : > { %13714 = vpow2.f32 %v3336_v23 }
 0x845   : > { %v3331_v24 = vpop.xlane.xlu1 %3330  ;;  %v3328_v25 = vpop.xlane.xlu0 %3327 }
 0x846   : > { %v3335_v26 = vsub.f32 %v3319_v7, %v3331_v24  ;;  %v3334_v27 = vsub.f32 %v3318_v6, %v3328_v25  ;;  %v3702_v7 = vsel %vm1950_vm4, %v2422_v2, 0 }
 0x848   : > { %v3342_v28 = vmul.f32 1.442695, %v3335_v26  ;;  %v3340_v29 = vmul.f32 1.442695, %v3334_v27 }
 0x84a   : > { %13716 = vpow2.f32 %v3342_v28 }
 0x84b   : > { %13718 = vpow2.f32 %v3340_v29 }
 0x84f   : > { %v13713_v30 = vpop.eup %13712 }
 0x850   : > { %v13715_v31 = vpop.eup %13714  ;;  %v3347_v32 = vsel %vm1706_vm3, %v13713_v30, 0.0 }
 0x851   : > { %3348 = vadd.xlane.f32.xlu1 %v3347_v32  ;;  %v3344_v33 = vsel %vm1706_vm3, %v13715_v31, 0.0 }
 0x852   : > { %3345 = vadd.xlane.f32.xlu0 %v3344_v33 }
 0x857   : > { %v13717_v34 = vpop.eup %13716 }
 0x858   : > { %v13719_v35 = vpop.eup %13718  ;;  %v3353_v36 = vsel %vm1706_vm3, %v13717_v34, 0.0 }
 0x859   : > { %3354 = vadd.xlane.f32.xlu1 %v3353_v36  ;;  %v3350_v37 = vsel %vm1706_vm3, %v13719_v35, 0.0 }
 0x85a   : > { %3351 = vadd.xlane.f32.xlu0 %v3350_v37 }
 0x8da   : > { %v3349_v38 = vpop.xlane.xlu1 %3348 }
 0x8db   : > { %13720 = vrcp.f32 %v3349_v38  ;;  %v3346_v39 = vpop.xlane.xlu0 %3345 }
 0x8dc   : > { %13722 = vrcp.f32 %v3346_v39 }
 0x8e2   : > { %v3355_v41 = vpop.xlane.xlu1 %3354 }
 0x8e3   : > { %13724 = vrcp.f32 %v3355_v41  ;;  %v3352_v43 = vpop.xlane.xlu0 %3351 }
 0x8e4   : > { %13726 = vrcp.f32 %v3352_v43 }
 0x8e8   : > { %v13721_v16 = vpop.eup %13720 }
 0x8e9   : > { %v13723_v46 = vpop.eup %13722  ;;  %v3361_v51 = vmul.f32 %v13721_v16, %v13713_v30 }
 0x8ea   : > { %v3360_v54 = vmul.f32 %v13723_v46, %v13715_v31 }
 0x8eb   : > { %v3365_v55 = vpack.c.bf16 %v3361_v51, %v3361_v51 }
 0x8ec   : > { %v3364_v56 = vpack.c.bf16 %v3360_v54, %v3360_v54 }
 0x8ed   : > { %12882 = vmatmul.mubr.msk.bf16.vlgmr.msra.gmra.mxu1 %vm1706_vm3, %v3365_v55 }
 0x8ee   : > { %12876 = vmatmul.mubr.msk.bf16.vlgmr.msra.gmra.mxu0 %vm1706_vm3, %v3364_v56  ;;  %12892 = vmatpush3.bf16.msra.mxu1 %v3514_v47 }
 0x8ef   : > { %12886 = vmatpush3.bf16.msra.mxu0 %v3468_v57  ;;  %12887 = vmatprep.mubr.msk.bf16.mxu0 %vm13879_vm0, %v13878_v1 }
 0x8f0   : > { %v13725_v48 = vpop.eup %13724  ;;  %12893 = vmatprep.mubr.msk.bf16.mxu1 %vm13879_vm0, %v13878_v1  ;;  %12897 = vmatprep.subr.bf16.mxu0 %v13878_v1 }
 0x8f1   : > { %v13727_v58 = vpop.eup %13726  ;;  %v3363_v52 = vmul.f32 %v13725_v48, %v13717_v34  ;;  %12903 = vmatprep.subr.bf16.mxu1 %v13878_v1 }
 0x8f2   : > { %v3362_v60 = vmul.f32 %v13727_v58, %v13719_v35 }
 0x8f3   : > { %v3367_v61 = vpack.c.bf16 %v3363_v52, %v3363_v52 }
 0x8f4   : > { %v3366_v63 = vpack.c.bf16 %v3362_v60, %v3362_v60  ;;  %v3789_v60 = vld [vmem:[%s15543_s28 + $0xc0] sm:$0xff] }
 0x8f5   : > { %12894 = vmatmul.mubr.msk.bf16.vlgmr.msra.gmra.mxu1 %vm1706_vm3, %v3367_v61  ;;  %v3788_v61 = vld [vmem:[%s15543_s28 + $0x88] sm:$0xff] }
 0x8f6   : > { %12888 = vmatmul.mubr.msk.bf16.vlgmr.msra.gmra.mxu0 %vm1706_vm3, %v3366_v63  ;;  %12904 = vmatpush3.bf16.msra.mxu1 %v3610_v62  ;;  %v11091_v62 = vcombine.high %v3787_v59, %v3789_v60  ;;  %v3790_v63 = vld [vmem:[%s15543_s28 + $0xc8] sm:$0xff] }
 0x8f7   : > { %12898 = vmatpush3.bf16.msra.mxu0 %v3564_v0  ;;  %12899 = vmatprep.mubr.msk.bf16.mxu0 %vm13879_vm0, %v13878_v1  ;;  %v11092_v0 = vcombine.low %v3788_v61, %v3790_v63  ;;  %v11093_v2 = vcombine.high %v3788_v61, %v3790_v63  ;;  %v13400_v61 = vld [vmem:[%s15546_s2 + $0x110] sm:$0xff]   ;;  %v13402_v63 = vld [vmem:[%s15546_s2 + $0x148] sm:$0xff]  }
 0x8f8   : > { %12905 = vmatprep.mubr.msk.bf16.mxu1 %vm13879_vm0, %v13878_v1  ;;  %12909 = vmatprep.subr.bf16.mxu0 %v13878_v1 }
 0x8f9   : > { %12915 = vmatprep.subr.bf16.mxu1 %v13878_v1 }
 0x9ad   : > { %v3458_v4 = vpop.f32.mrf.mxu1 }
 0x9ae   : > { %v3412_v5 = vpop.f32.mrf.mxu0  ;;  %v3557_v6 = vpack.c.bf16 %v3458_v4, %v3458_v4  ;;  %v3785_v4 = vld [vmem:[%s15543_s28 + $0x40] sm:$0xff] }
 0x9af   : > { %v3556_v8 = vpack.c.bf16 %v3412_v5, %v3412_v5  ;;  %v12883_v9 = vpop.f32.mrf.mxu1  ;;  %v3784_v5 = vld [vmem:[%s15543_s28 + $0x8] sm:$0xff] }
 0x9b0   : > { %v12877_v12 = vpop.f32.mrf.mxu0  ;;  %12906 = vmatmul.mubr.msk.bf16.vlgmr.msra.gmra.mxu1 %vm1706_vm3, %v3557_v6  ;;  %v11087_v6 = vcombine.high %v3783_v3, %v3785_v4 }
 0x9b1   : > { %12900 = vmatmul.mubr.msk.bf16.vlgmr.msra.gmra.mxu0 %vm1706_vm3, %v3556_v8  ;;  %v3461_v13 = vpop.f32.mrf.mxu1  ;;  %12916 = vmatpush3.bf16.msra.mxu1 %v3702_v7  ;;  %v3786_v7 = vld [vmem:[%s15543_s28 + $0x48] sm:$0xff]  ;;  %v11086_v8 = vcombine.low %v3783_v3, %v3785_v4  ;;  %v4014_v12 = vld [vmem:[%s15543_s28 + $0x90] sm:$0xff]  ;;  %v13406_v3 = vld [vmem:[%s15546_s2 + $0x140] sm:$0xff]  }
 0x9b2   : > { %v3415_v14 = vpop.f32.mrf.mxu0  ;;  %12910 = vmatpush3.bf16.msra.mxu0 %v3656_v10  ;;  %12911 = vmatprep.mubr.msk.bf16.mxu0 %vm13879_vm0, %v13878_v1  ;;  %v11088_v9 = vcombine.low %v3784_v5, %v3786_v7  ;;  %v11089_v10 = vcombine.high %v3784_v5, %v3786_v7  ;;  %v4016_v13 = vld [vmem:[%s15543_s28 + $0xd0] sm:$0xff]  ;;  %v13407_v4 = vld [vmem:[%s15546_s2 + $0x1c0] sm:$0xff]   ;;  %v13410_v7 = vld [vmem:[%s15546_s2 + $0x78] sm:$0xff]  }
 0x9b3   : > { %v12884_v15 = vpop.f32.mrf.mxu1  ;;  %12917 = vmatprep.mubr.msk.bf16.mxu1 %vm13879_vm0, %v13878_v1  ;;  %3868 = vmatprep.subr.bf16.mxu0 %v11091_v62  ;;  %v4015_v14 = vld [vmem:[%s15543_s28 + $0x98] sm:$0xff]  ;;  %v13401_v62 = vld [vmem:[%s15546_s2 + $0x190] sm:$0xff]   ;;  %v13408_v5 = vld [vmem:[%s15546_s2 + $0x100] sm:$0xff]  }
 0x9b4   : > { %v12878_v17 = vpop.f32.mrf.mxu0  ;;  %3909 = vmatprep.subr.bf16.mxu1 %v11093_v2  ;;  %v13880_v15 = vmov 0   ;;  %v13405_v2 = vld [vmem:[%s15546_s2 + $0x188] sm:$0xff]  }
 0x9b5   : > { %v3550_v18 = vpop.f32.mrf.mxu1  ;;  %v11102_v17 = vcombine.high %v4014_v12, %v4016_v13 }
 0x9b6   : > { %v3504_v19 = vpop.f32.mrf.mxu0  ;;  %v3559_v20 = vpack.c.bf16 %v3550_v18, %v3550_v18  ;;  %v4017_v18 = vld [vmem:[%s15543_s28 + $0xd8] sm:$0xff] }
 0x9b7   : > { %v3558_v21 = vpack.c.bf16 %v3504_v19, %v3504_v19  ;;  %v12895_v22 = vpop.f32.mrf.mxu1  ;;  %v11101_v19 = vcombine.low %v4014_v12, %v4016_v13 }
 0x9b8   : > { %v12889_v23 = vpop.f32.mrf.mxu0  ;;  %12918 = vmatmul.mubr.msk.bf16.vlgmr.msra.gmra.mxu1 %vm1706_vm3, %v3559_v20  ;;  %v11103_v20 = vcombine.low %v4015_v14, %v4017_v18 }
 0x9b9   : > { %12912 = vmatmul.mubr.msk.bf16.vlgmr.msra.gmra.mxu0 %vm1706_vm3, %v3558_v21  ;;  %v3553_v24 = vpop.f32.mrf.mxu1  ;;  %3910 = vmatpush1.bf16.msra.mxu1 %v11092_v0  ;;  %v11104_v21 = vcombine.high %v4015_v14, %v4017_v18  ;;  %v13404_v0 = vld [vmem:[%s15546_s2 + $0x108] sm:$0xff]  }
 0x9ba   : > { %v3507_v25 = vpop.f32.mrf.mxu0  ;;  %3911 = vmatprep.subr.bf16.mxu1 %v11089_v10  ;;  %3888 = vmatprep.mubr.bf16.mxu0 %v13880_v15 }
 0x9bb   : > { %v12896_v26 = vpop.f32.mrf.mxu1  ;;  %3929 = vmatprep.mubr.bf16.mxu1 %v13880_v15 }
 0x9bc   : > { %v12890_v27 = vpop.f32.mrf.mxu0  ;;  %v11084_v26 = vld [vmem:[%s15544_s22] ss:$0 sm:$0xff] }
 0x9bd   : > { %3912 = vmatpush1.bf16.msra.mxu1 %v11088_v9  ;;  %v3793_v9 = vlaneseq }
 0x9be   : > { %4134 = vmatprep.subr.bf16.mxu1 %v11104_v21 }
 0x9bf   : > { %v3794_v10 = vshrl.u32 %v3793_v9, 7  ;;  %v13424_v9 = vld [vmem:[%s15546_s2 + $0x20] sm:$0xff]  }
 0x9c1   : > { %v14583_v14 = vsub.s32 1, %v3794_v10  ;;  %v14585_v18 = vsub.s32 3, %v3794_v10  ;;  %v14588_v21 = vsub.s32 0, %v3794_v10 }
 0xa70   : > { %v3646_v28 = vpop.f32.mrf.mxu1 }
 0xa71   : > { %v3600_v29 = vpop.f32.mrf.mxu0  ;;  %v3745_v35 = vsel %vm1034_vm2, %v3646_v28, 0.0  ;;  %v11085_v28 = vld [vmem:[%s15545_s10] ss:$0 sm:$0xff] }
 0xa72   : > { %v12907_v30 = vpop.f32.mrf.mxu1  ;;  %v3744_v34 = vsel %vm1034_vm2, %v3600_v29, 0.0 }
 0xa73   : > { %v12901_v31 = vpop.f32.mrf.mxu0  ;;  %v3746_v39 = vadd.f32 %v3745_v35, %v3744_v34  ;;  %v4010_v30 = vld [vmem:[%s15543_s28 + $0x10] sm:$0xff] }
 0xa74   : > { %v3649_v32 = vpop.f32.mrf.mxu1  ;;  %v4012_v31 = vld [vmem:[%s15543_s28 + $0x50] sm:$0xff] }
 0xa75   : > { %v3603_v33 = vpop.f32.mrf.mxu0  ;;  %v4011_v32 = vld [vmem:[%s15543_s28 + $0x18] sm:$0xff] }
 0xa76   : > { %v12908_v36 = vpop.f32.mrf.mxu1  ;;  %v4013_v33 = vld [vmem:[%s15543_s28 + $0x58] sm:$0xff] }
 0xa77   : > { %v12902_v37 = vpop.f32.mrf.mxu0  ;;  %v11098_v36 = vcombine.high %v4010_v30, %v4012_v31 }
 0xa78   : > { %v3738_v38 = vpop.f32.mrf.mxu1  ;;  %v11100_v37 = vcombine.high %v4011_v32, %v4013_v33 }
 0xa79   : > { %v3692_v40 = vpop.f32.mrf.mxu0  ;;  %v3749_v16 = vsel %vm1034_vm2, %v3738_v38, 0.0  ;;  %v11097_v38 = vcombine.low %v4010_v30, %v4012_v31 }
 0xa7a   : > { %v3747_v41 = vsel %vm1034_vm2, %v3692_v40, 0.0  ;;  %v12919_v42 = vpop.f32.mrf.mxu1  ;;  %v13378_v40 = vld [vmem:[%s15546_s2 + $0x178] sm:$0xff]  }
 0xa7b   : > { %v3748_v43 = vadd.f32 %v3747_v41, %v3746_v39  ;;  %v12913_v44 = vpop.f32.mrf.mxu0  ;;  %v11099_v39 = vcombine.low %v4011_v32, %v4013_v33  ;;  %v13379_v41 = vld [vmem:[%s15546_s2 + $0x1f8] sm:$0xff]  }
 0xa7c   : > { %v3741_v46 = vpop.f32.mrf.mxu1  ;;  %v13380_v42 = vld [vmem:[%s15546_s2 + $0x138] sm:$0xff]   ;;  %v13382_v44 = vld [vmem:[%s15546_s2 + $0x170] sm:$0xff]  }
 0xa7d   : > { %v3750_v49 = vadd.f32 %v3749_v16, %v3748_v43  ;;  %v3695_v51 = vpop.f32.mrf.mxu0  ;;  %v13381_v43 = vld [vmem:[%s15546_s2 + $0x1b8] sm:$0xff]   ;;  %v13384_v16 = vld [vmem:[%s15546_s2 + $0x130] sm:$0xff]  }
 0xa7e   : > { %v12920_v53 = vpop.f32.mrf.mxu1  ;;  %v13385_v46 = vld [vmem:[%s15546_s2 + $0x1b0] sm:$0xff]   ;;  %v13387_v51 = vld [vmem:[%s15546_s2 + $0x1e8] sm:$0xff]  }
 0xa7f   : > { %v3755_v54 = vadd.f32 %v11083_v45, %v3750_v49  ;;  %v12914_v55 = vpop.f32.mrf.mxu0  ;;  %v13383_v45 = vld [vmem:[%s15546_s2 + $0x1f0] sm:$0xff]   ;;  %v13386_v49 = vld [vmem:[%s15546_s2 + $0x168] sm:$0xff]  }
 0xa80   : > { %v13388_v53 = vld [vmem:[%s15546_s2 + $0x128] sm:$0xff]   ;;  %v13390_v55 = vld [vmem:[%s15546_s2 + $0x160] sm:$0xff]  }
 0xa81   : > { %v3758_v56 = vadd.f32 %v3755_v54, %v14329_v11  ;;  %v11090_v11 = vcombine.low %v3787_v59, %v3789_v60  ;;  %v13389_v54 = vld [vmem:[%s15546_s2 + $0x1a8] sm:$0xff]   ;;  %v13398_v59 = vld [vmem:[%s15546_s2 + $0x150] sm:$0xff]  }
 0xa82   : > { %v13399_v60 = vld [vmem:[%s15546_s2 + $0x1d0] sm:$0xff]  }
 0xa83   : > { %v3759_v47 = vsel %vm1034_vm2, %v3758_v56, 0.0  ;;  %3869 = vmatpush1.bf16.msra.mxu0 %v11090_v11  ;;  %v13403_v11 = vld [vmem:[%s15546_s2 + $0x1c8] sm:$0xff]  }
 0xa84   : > { %3760 = vadd.xlane.f32.xlu0 %v3759_v47  ;;  %3870 = vmatprep.subr.bf16.mxu0 %v11087_v6  ;;  %v13392_v47 = vld [vmem:[%s15546_s2 + $0x120] sm:$0xff]  }
 0xa85   : > { %v13409_v6 = vld [vmem:[%s15546_s2 + $0x180] sm:$0xff]  }
 0xa87   : > { %3871 = vmatpush1.bf16.msra.mxu0 %v11086_v8  ;;  %v13411_v8 = vld [vmem:[%s15546_s2 + $0xf8] sm:$0xff]  }
 0xa88   : > { %4093 = vmatprep.subr.bf16.mxu0 %v11102_v17 }
 0xb0d   : > { %v3761_v57 = vpop.xlane.xlu0 %3760 }
 0xb0e   : > { %v3762_v48 = vmul.f32 0.03125, %v3761_v57  ;;  %v13393_v57 = vld [vmem:[%s15546_s2 + $0x1a0] sm:$0xff]  }
 0xb10   : > { %v3763_v50 = vsub.f32 %v3758_v56, %v3762_v48  ;;  %v13391_v56 = vld [vmem:[%s15546_s2 + $0x1e0] sm:$0xff]   ;;  %v13394_v48 = vld [vmem:[%s15546_s2 + $0x158] sm:$0xff]  }
 0xb12   : > { %v3764_v58 = vmul.f32 %v3763_v50, %v3763_v50 }
 0xb14   : > { %v3765_v52 = vsel %vm1034_vm2, %v3764_v58, 0.0  ;;  %v13396_v58 = vld [vmem:[%s15546_s2 + $0x118] sm:$0xff]  }
 0xb15   : > { %3766 = vadd.xlane.f32.xlu1 %v3765_v52  ;;  %v13397_v52 = vld [vmem:[%s15546_s2 + $0x198] sm:$0xff]  }
 0xb9e   : > { %v3767_v22 = vpop.xlane.xlu1 %3766 }
 0xb9f   : > { %v3768_v23 = vmul.f32 0.03125, %v3767_v22  ;;  %v14590_v22 = vsub.s32 2, %v3794_v10  ;;  %v13425_v10 = vld [vmem:[%s15546_s2 + $0xa0] sm:$0xff]  }
 0xba1   : > { %v3769_v24 = vadd.f32 1e-05, %v3768_v23 }
 0xba3   : > { %13728 = vrsqrt.f32 %v3769_v24 }
 0xbb0   : > { %v13729_v25 = vpop.eup %13728 }
 0xbb1   : > { %v3771_v27 = vmul.f32 %v13729_v25, %v3763_v50  ;;  %v13395_v50 = vld [vmem:[%s15546_s2 + $0x1d8] sm:$0xff]   ;;  %v14593_v25 = vld [vmem:[%s15547_s26] ss:$2 sm:$0xf] }
 0xbb3   : > { %v3776_v29 = vmul.f32 %v11084_v26, %v3771_v27 }
 0xbb5   : > { %v14529_v34 = vadd.f32 %v11085_v28, %v3776_v29  ;;  %v3800_v28 = vrot.slane %v14593_v25, %v14583_v14  ;;  %v3808_v29 = vrot.slane %v14593_v25, %v14585_v18 }
 0xbb7   : > { %v14533_v35 = vpack.c.bf16 %v14529_v34, %v14529_v34 }
 0xbb9   : > { %11094 = vmatmul.mubr.msk.bf16.vlgmr.msra.gmra.mxu0 %vm1034_vm2, %v14533_v35  ;;  %11095 = vmatmul.mubr.msk.bf16.vlgmr.msra.gmra.mxu1 %vm1034_vm2, %v14533_v35 }
 0xbba   : > { %4094 = vmatpush1.bf16.msra.mxu0 %v11101_v19  ;;  %4135 = vmatpush1.bf16.msra.mxu1 %v11103_v20  ;;  %v11096_v20 = vld [vmem:[%s15547_s26 + $0x8] ss:$2 sm:$0xf] }
 0xbbb   : > { %4095 = vmatprep.subr.bf16.mxu0 %v11098_v36  ;;  %4136 = vmatprep.subr.bf16.mxu1 %v11100_v37  ;;  %v4024_v26 = vrot.slane %v11096_v20, %v14588_v21  ;;  %v4032_v27 = vrot.slane %v11096_v20, %v14590_v22  ;;  %v4028_v32 = vrot.slane %v11096_v20, %v14583_v14 }
 0xbbc   : > { %4113 = vmatprep.mubr.bf16.mxu0 %v13880_v15  ;;  %4154 = vmatprep.mubr.bf16.mxu1 %v13880_v15  ;;  %v4036_v33 = vrot.slane %v11096_v20, %v14585_v18  ;;  %v13428_v20 = vld [vmem:[%s15546_s2 + $0x18] sm:$0xff]  }
 0xbbe   : > { %4096 = vmatpush1.bf16.msra.mxu0 %v11097_v38  ;;  %4137 = vmatpush1.bf16.msra.mxu1 %v11099_v39 }
 0xbbf   : > { %12113 = vmatprep.subr.bf16.mxu0 %v13378_v40  ;;  %12135 = vmatprep.subr.bf16.mxu1 %v13379_v41 }
 0xbc1   : > { %11105 = vmatmul.mubr.msk.bf16.vlgmr.msra.gmra.mxu0 %vm1034_vm2, %v14533_v35  ;;  %11106 = vmatmul.mubr.msk.bf16.vlgmr.msra.gmra.mxu1 %vm1034_vm2, %v14533_v35 }
 0xbc2   : > { %12114 = vmatpush3.bf16.msra.mxu0 %v13380_v42  ;;  %12136 = vmatpush3.bf16.msra.mxu1 %v13381_v43 }
 0xbc3   : > { %12115 = vmatprep.subr.bf16.mxu0 %v13382_v44  ;;  %12137 = vmatprep.subr.bf16.mxu1 %v13383_v45 }
 0xbc6   : > { %12116 = vmatpush3.bf16.msra.mxu0 %v13384_v16  ;;  %12138 = vmatpush3.bf16.msra.mxu1 %v13385_v46 }
 0xbc7   : > { %12117 = vmatprep.subr.bf16.mxu0 %v13386_v49  ;;  %12139 = vmatprep.subr.bf16.mxu1 %v13387_v51 }
 0xbca   : > { %12118 = vmatpush3.bf16.msra.mxu0 %v13388_v53  ;;  %12140 = vmatpush3.bf16.msra.mxu1 %v13389_v54 }
 0xbcb   : > { %12119 = vmatprep.subr.bf16.mxu0 %v13390_v55  ;;  %12141 = vmatprep.subr.bf16.mxu1 %v13391_v56 }
 0xbce   : > { %12120 = vmatpush3.bf16.msra.mxu0 %v13392_v47  ;;  %12142 = vmatpush3.bf16.msra.mxu1 %v13393_v57 }
 0xbcf   : > { %12121 = vmatprep.subr.bf16.mxu0 %v13394_v48  ;;  %12143 = vmatprep.subr.bf16.mxu1 %v13395_v50 }
 0xbd2   : > { %12122 = vmatpush3.bf16.msra.mxu0 %v13396_v58  ;;  %12144 = vmatpush3.bf16.msra.mxu1 %v13397_v52  ;;  %v13412_v58 = vld [vmem:[%s15546_s2 + $0x38] sm:$0xff]  }
 0xbd3   : > { %12123 = vmatprep.subr.bf16.mxu0 %v13398_v59  ;;  %12145 = vmatprep.subr.bf16.mxu1 %v13399_v60  ;;  %v13413_v52 = vld [vmem:[%s15546_s2 + $0xb8] sm:$0xff]  }
 0xbd6   : > { %12124 = vmatpush3.bf16.msra.mxu0 %v13400_v61  ;;  %12146 = vmatpush3.bf16.msra.mxu1 %v13401_v62  ;;  %v13414_v61 = vld [vmem:[%s15546_s2 + $0x70] sm:$0xff]  }
 0xbd7   : > { %12125 = vmatprep.subr.bf16.mxu0 %v13402_v63  ;;  %12147 = vmatprep.subr.bf16.mxu1 %v13403_v11  ;;  %v13415_v62 = vld [vmem:[%s15546_s2 + $0xf0] sm:$0xff]  }
 0xbda   : > { %12126 = vmatpush3.bf16.msra.mxu0 %v13404_v0  ;;  %12148 = vmatpush3.bf16.msra.mxu1 %v13405_v2  ;;  %v13416_v0 = vld [vmem:[%s15546_s2 + $0x30] sm:$0xff]  }
 0xbdb   : > { %12127 = vmatprep.subr.bf16.mxu0 %v13406_v3  ;;  %12149 = vmatprep.subr.bf16.mxu1 %v13407_v4  ;;  %v13417_v2 = vld [vmem:[%s15546_s2 + $0xb0] sm:$0xff]   ;;  %v13418_v3 = vld [vmem:[%s15546_s2 + $0x68] sm:$0xff]  }
 0xbdc   : > { %v13419_v4 = vld [vmem:[%s15546_s2 + $0xe8] sm:$0xff]  }
 0xbde   : > { %12128 = vmatpush3.bf16.msra.mxu0 %v13408_v5  ;;  %12150 = vmatpush3.bf16.msra.mxu1 %v13409_v6  ;;  %v13420_v5 = vld [vmem:[%s15546_s2 + $0x28] sm:$0xff]  }
 0xbdf   : > { %12157 = vmatprep.subr.bf16.mxu0 %v13410_v7  ;;  %12179 = vmatprep.subr.bf16.mxu1 %v13411_v8  ;;  %v13421_v6 = vld [vmem:[%s15546_s2 + $0xa8] sm:$0xff]   ;;  %v13422_v7 = vld [vmem:[%s15546_s2 + $0x60] sm:$0xff]  }
 0xbe0   : > { %v13423_v8 = vld [vmem:[%s15546_s2 + $0xe0] sm:$0xff]  }
 0xc79   : > { %v14579_v12 = vpop.f32.mrf.mxu0  ;;  %v14581_v13 = vpop.f32.mrf.mxu1 }
 0xc7b   : > { %v3892_v17 = vpop.f32.mrf.mxu0  ;;  %v3933_v19 = vpop.f32.mrf.mxu1 }
 0xc7c   : > { %v3893_v40 = vadd.f32 %v3892_v17, %v3800_v28  ;;  %v3934_v41 = vadd.f32 %v3933_v19, %v3808_v29  ;;  %v13426_v17 = vld [vmem:[%s15546_s2 + $0x58] sm:$0xff]   ;;  %v13433_v28 = vld [vmem:[%s15546_s2 + $0x90] sm:$0xff]   ;;  %v3796_v29 = vrot.slane %v14593_v25, %v14588_v21 }
 0xc7d   : > { %v3894_v23 = vpop.f32.mrf.mxu0  ;;  %v3935_v24 = vpop.f32.mrf.mxu1  ;;  %v13427_v19 = vld [vmem:[%s15546_s2 + $0xd8] sm:$0xff]  }
 0xc7e   : > { %v3939_v55 = vmax.f32 %v3893_v40, 0.0  ;;  %v3941_v56 = vmax.f32 %v3934_v41, 0.0  ;;  %v13429_v23 = vld [vmem:[%s15546_s2 + $0x98] sm:$0xff]   ;;  %v13430_v24 = vld [vmem:[%s15546_s2 + $0x50] sm:$0xff]   ;;  %v4783_v40 = vld [vmem:[%s15543_s28 + $0xa0] sm:$0xff] }
 0xc7f   : > { %v3895_v30 = vpop.f32.mrf.mxu0  ;;  %v3936_v31 = vpop.f32.mrf.mxu1  ;;  %v4785_v41 = vld [vmem:[%s15543_s28 + $0xe0] sm:$0xff] }
 0xc80   : > { %v3943_v63 = vpack.c.bf16 %v3939_v55, %v3939_v55  ;;  %v3945_v11 = vpack.c.bf16 %v3941_v56, %v3941_v56  ;;  %v3804_v30 = vrot.slane %v14593_v25, %v14590_v22  ;;  %v13434_v31 = vld [vmem:[%s15546_s2 + $0x48] sm:$0xff]   ;;  %v13438_v25 = vld [vmem:[%s15546_s2 + $0x40] sm:$0xff]   ;;  %v11176_v55 = vcombine.low %v4783_v40, %v4785_v41 }
 0xc81   : > { %v4115_v36 = vpop.f32.mrf.mxu0  ;;  %v4156_v37 = vpop.f32.mrf.mxu1 }
 0xc82   : > { %v4116_v38 = vadd.f32 %v4115_v36, %v4024_v26  ;;  %v4157_v39 = vadd.f32 %v4156_v37, %v4032_v27  ;;  %v13431_v26 = vld [vmem:[%s15546_s2 + $0xd0] sm:$0xff]   ;;  %v13437_v36 = vld [vmem:[%s15546_s2 + $0x88] sm:$0xff]   ;;  %v3891_v37 = vadd.f32 %v14579_v12, %v3796_v29 }
 0xc83   : > { %v4117_v42 = vpop.f32.mrf.mxu0  ;;  %v4158_v43 = vpop.f32.mrf.mxu1  ;;  %v13432_v27 = vld [vmem:[%s15546_s2 + $0x10] sm:$0xff]   ;;  %v13466_v29 = vld [vmem:[%s15546_s2 + $0x248] sm:$0xff]  }
 0xc84   : > { %v4118_v44 = vadd.f32 %v4117_v42, %v4028_v32  ;;  %v4159_v45 = vadd.f32 %v4158_v43, %v4036_v33  ;;  %v4163_v16 = vmax.f32 %v4116_v38, 0.0  ;;  %v4165_v46 = vmax.f32 %v4157_v39, 0.0  ;;  %v13435_v32 = vld [vmem:[%s15546_s2 + $0xc8] sm:$0xff]   ;;  %v13439_v39 = vld [vmem:[%s15546_s2 + $0xc0] sm:$0xff]  }
 0xc85   : > { %v4119_v49 = vpop.f32.mrf.mxu0  ;;  %v4160_v51 = vpop.f32.mrf.mxu1  ;;  %v13436_v33 = vld [vmem:[%s15546_s2 + $0x8] sm:$0xff]   ;;  %v3932_v38 = vadd.f32 %v14581_v13, %v3804_v30  ;;  %v11177_v13 = vcombine.high %v4783_v40, %v4785_v41  ;;  %v14692_v40 = vld [vmem:[%s15543_s28 + $0xb8] sm:$0xff] }
 0xc86   : > { %v4164_v53 = vmax.f32 %v4118_v44, 0.0  ;;  %v4166_v54 = vmax.f32 %v4159_v45, 0.0  ;;  %v4167_v59 = vpack.c.bf16 %v4163_v16, %v4163_v16  ;;  %v4169_v60 = vpack.c.bf16 %v4165_v46, %v4165_v46  ;;  %v4784_v42 = vld [vmem:[%s15543_s28 + $0xa8] sm:$0xff]  ;;  %v13440_v44 = vld [vmem:[%s15546_s2] sm:$0xff]  }
 0xc87   : > { %v4120_v47 = vpop.f32.mrf.mxu0  ;;  %v4161_v57 = vpop.f32.mrf.mxu1  ;;  %v4786_v43 = vld [vmem:[%s15543_s28 + $0xe8] sm:$0xff]  ;;  %v13441_v45 = vld [vmem:[%s15546_s2 + $0x80] sm:$0xff]   ;;  %v3938_v16 = vmax.f32 %v3891_v37, 0.0  ;;  %v3940_v12 = vmax.f32 %v3932_v38, 0.0 }
 0xc88   : > { %v4168_v48 = vpack.c.bf16 %v4164_v53, %v4164_v53  ;;  %v4170_v50 = vpack.c.bf16 %v4166_v54, %v4166_v54  ;;  %v11179_v46 = vcombine.high %v4784_v42, %v4786_v43  ;;  %v4779_v49 = vld [vmem:[%s15543_s28 + $0x20] sm:$0xff]  ;;  %v4780_v53 = vld [vmem:[%s15543_s28 + $0x28] sm:$0xff]  ;;  %v11178_v56 = vcombine.low %v4784_v42, %v4786_v43  ;;  %v14697_v42 = vld [vmem:[%s15543_s28 + $0xf8] sm:$0xff] }
 0xc89   : > { %v4781_v51 = vld [vmem:[%s15543_s28 + $0x60] sm:$0xff]  ;;  %v4782_v54 = vld [vmem:[%s15543_s28 + $0x68] sm:$0xff]  ;;  %v3942_v57 = vpack.c.bf16 %v3938_v16, %v3938_v16 }
 0xc8a   : > { %4459 = vmatprep.mubr.bf16.mxu0 %v4168_v48  ;;  %4499 = vmatprep.mubr.bf16.mxu1 %v4170_v50  ;;  %v11173_v47 = vcombine.high %v4779_v49, %v4781_v51  ;;  %v3944_v48 = vpack.c.bf16 %v3940_v12, %v3940_v12  ;;  %v11175_v50 = vcombine.high %v4780_v53, %v4782_v54  ;;  %v13467_v30 = vld [vmem:[%s15546_s2 + $0x2c8] sm:$0xff]   ;;  %v13472_v37 = vld [vmem:[%s15546_s2 + $0x200] sm:$0xff]  }
 0xc8b   : > { %4460 = vmatmul.mubr.bf16.vlgmr.msra.gmra.mxu0 %v4167_v59  ;;  %4500 = vmatmul.mubr.bf16.vlgmr.msra.gmra.mxu1 %v4169_v60  ;;  %v13442_v59 = vld [vmem:[%s15546_s2 + $0x278] sm:$0xff]   ;;  %v13473_v38 = vld [vmem:[%s15546_s2 + $0x280] sm:$0xff]  }
 0xc8c   : > { %12158 = vmatpush3.bf16.msra.mxu0 %v13412_v58  ;;  %12180 = vmatpush3.bf16.msra.mxu1 %v13413_v52  ;;  %v11172_v58 = vcombine.low %v4779_v49, %v4781_v51  ;;  %v11174_v52 = vcombine.low %v4780_v53, %v4782_v54  ;;  %v13443_v60 = vld [vmem:[%s15546_s2 + $0x2f8] sm:$0xff]  }
 0xc8d   : > { %4731 = vmatprep.mubr.bf16.mxu0 %v3943_v63  ;;  %4771 = vmatprep.mubr.bf16.mxu1 %v3945_v11  ;;  %v13446_v63 = vld [vmem:[%s15546_s2 + $0x270] sm:$0xff]  }
 0xc8e   : > { %12159 = vmatprep.subr.bf16.mxu0 %v13414_v61  ;;  %12181 = vmatprep.subr.bf16.mxu1 %v13415_v62  ;;  %v13444_v61 = vld [vmem:[%s15546_s2 + $0x238] sm:$0xff]   ;;  %v13447_v11 = vld [vmem:[%s15546_s2 + $0x2f0] sm:$0xff]  }
 0xc8f   : > { %v13445_v62 = vld [vmem:[%s15546_s2 + $0x2b8] sm:$0xff]  }
 0xc90   : > { %12160 = vmatpush3.bf16.msra.mxu0 %v13416_v0  ;;  %12182 = vmatpush3.bf16.msra.mxu1 %v13417_v2  ;;  %v13448_v0 = vld [vmem:[%s15546_s2 + $0x230] sm:$0xff]  }
 0xc91   : > { %12161 = vmatprep.subr.bf16.mxu0 %v13418_v3  ;;  %12183 = vmatprep.subr.bf16.mxu1 %v13419_v4  ;;  %v13449_v2 = vld [vmem:[%s15546_s2 + $0x2b0] sm:$0xff]   ;;  %v13450_v3 = vld [vmem:[%s15546_s2 + $0x268] sm:$0xff]  }
 0xc92   : > { %v13451_v4 = vld [vmem:[%s15546_s2 + $0x2e8] sm:$0xff]  }
 0xc94   : > { %12162 = vmatpush3.bf16.msra.mxu0 %v13420_v5  ;;  %12184 = vmatpush3.bf16.msra.mxu1 %v13421_v6  ;;  %v13452_v5 = vld [vmem:[%s15546_s2 + $0x228] sm:$0xff]  }
 0xc95   : > { %12163 = vmatprep.subr.bf16.mxu0 %v13422_v7  ;;  %12185 = vmatprep.subr.bf16.mxu1 %v13423_v8  ;;  %v13453_v6 = vld [vmem:[%s15546_s2 + $0x2a8] sm:$0xff]   ;;  %v13454_v7 = vld [vmem:[%s15546_s2 + $0x260] sm:$0xff]  }
 0xc96   : > { %v13455_v8 = vld [vmem:[%s15546_s2 + $0x2e0] sm:$0xff]  }
 0xc98   : > { %12164 = vmatpush3.bf16.msra.mxu0 %v13424_v9  ;;  %12186 = vmatpush3.bf16.msra.mxu1 %v13425_v10  ;;  %v13456_v9 = vld [vmem:[%s15546_s2 + $0x220] sm:$0xff]  }
 0xc99   : > { %12165 = vmatprep.subr.bf16.mxu0 %v13426_v17  ;;  %12187 = vmatprep.subr.bf16.mxu1 %v13427_v19  ;;  %v13457_v10 = vld [vmem:[%s15546_s2 + $0x2a0] sm:$0xff]   ;;  %v13458_v17 = vld [vmem:[%s15546_s2 + $0x258] sm:$0xff]  }
 0xc9a   : > { %v13459_v19 = vld [vmem:[%s15546_s2 + $0x2d8] sm:$0xff]  }
 0xc9c   : > { %12166 = vmatpush3.bf16.msra.mxu0 %v13428_v20  ;;  %12188 = vmatpush3.bf16.msra.mxu1 %v13429_v23  ;;  %v13460_v20 = vld [vmem:[%s15546_s2 + $0x218] sm:$0xff]  }
 0xc9d   : > { %12167 = vmatprep.subr.bf16.mxu0 %v13430_v24  ;;  %12189 = vmatprep.subr.bf16.mxu1 %v13431_v26  ;;  %v13461_v23 = vld [vmem:[%s15546_s2 + $0x298] sm:$0xff]   ;;  %v13462_v24 = vld [vmem:[%s15546_s2 + $0x250] sm:$0xff]  }
 0xc9e   : > { %v13463_v26 = vld [vmem:[%s15546_s2 + $0x2d0] sm:$0xff]  }
 0xca0   : > { %12168 = vmatpush3.bf16.msra.mxu0 %v13432_v27  ;;  %12190 = vmatpush3.bf16.msra.mxu1 %v13433_v28  ;;  %v13464_v27 = vld [vmem:[%s15546_s2 + $0x210] sm:$0xff]  }
 0xca1   : > { %12169 = vmatprep.subr.bf16.mxu0 %v13434_v31  ;;  %12191 = vmatprep.subr.bf16.mxu1 %v13435_v32  ;;  %v13465_v28 = vld [vmem:[%s15546_s2 + $0x290] sm:$0xff]   ;;  %v13468_v31 = vld [vmem:[%s15546_s2 + $0x208] sm:$0xff]  }
 0xca2   : > { %v13469_v32 = vld [vmem:[%s15546_s2 + $0x288] sm:$0xff]  }
 0xca4   : > { %12170 = vmatpush3.bf16.msra.mxu0 %v13436_v33  ;;  %12192 = vmatpush3.bf16.msra.mxu1 %v13437_v36  ;;  %v13470_v33 = vld [vmem:[%s15546_s2 + $0x240] sm:$0xff]  }
 0xca5   : > { %12171 = vmatprep.subr.bf16.mxu0 %v13438_v25  ;;  %12193 = vmatprep.subr.bf16.mxu1 %v13439_v39  ;;  %v13471_v36 = vld [vmem:[%s15546_s2 + $0x2c0] sm:$0xff]   ;;  %v14686_v25 = vld [vmem:[%s15543_s28 + $0xb0] sm:$0xff] }
 0xca6   : > { %v14689_v39 = vld [vmem:[%s15543_s28 + $0xf0] sm:$0xff] }
 0xca7   : > { %v11220_v41 = vcombine.high %v14686_v25, %v14689_v39  ;;  %v11219_v43 = vcombine.low %v14686_v25, %v14689_v39 }
 0xca8   : > { %12172 = vmatpush3.bf16.msra.mxu0 %v13440_v44  ;;  %12194 = vmatpush3.bf16.msra.mxu1 %v13441_v45  ;;  %v11221_v44 = vcombine.low %v14692_v40, %v14697_v42  ;;  %v11222_v45 = vcombine.high %v14692_v40, %v14697_v42 }
 0xca9   : > { %4862 = vmatprep.subr.bf16.mxu0 %v11177_v13  ;;  %4903 = vmatprep.subr.bf16.mxu1 %v11179_v46 }
 0xcab   : > { %4732 = vmatmul.mubr.bf16.vlgmr.msra.gmra.mxu0 %v3942_v57  ;;  %4772 = vmatmul.mubr.bf16.vlgmr.msra.gmra.mxu1 %v3944_v48 }
 0xcac   : > { %4863 = vmatpush1.bf16.msra.mxu0 %v11176_v55  ;;  %4904 = vmatpush1.bf16.msra.mxu1 %v11178_v56 }
 0xcad   : > { %4864 = vmatprep.subr.bf16.mxu0 %v11173_v47  ;;  %4905 = vmatprep.subr.bf16.mxu1 %v11175_v50 }
 0xcae   : > { %4882 = vmatprep.mubr.bf16.mxu0 %v13880_v15  ;;  %4923 = vmatprep.mubr.bf16.mxu1 %v13880_v15 }
 0xcb0   : > { %4865 = vmatpush1.bf16.msra.mxu0 %v11172_v58  ;;  %4906 = vmatpush1.bf16.msra.mxu1 %v11174_v52  ;;  %v11171_v52 = vld [vmem:[%s15547_s26 + $0x10] ss:$2 sm:$0xf] }
 0xcb1   : > { %12201 = vmatprep.subr.bf16.mxu0 %v13442_v59  ;;  %12223 = vmatprep.subr.bf16.mxu1 %v13443_v60 }
 0xcb3   : > { %11180 = vmatmul.mubr.msk.bf16.vlgmr.msra.gmra.mxu0 %vm1034_vm2, %v14533_v35  ;;  %11181 = vmatmul.mubr.msk.bf16.vlgmr.msra.gmra.mxu1 %vm1034_vm2, %v14533_v35 }
 0xcb4   : > { %12202 = vmatpush3.bf16.msra.mxu0 %v13444_v61  ;;  %12224 = vmatpush3.bf16.msra.mxu1 %v13445_v62 }
 0xcb5   : > { %12203 = vmatprep.subr.bf16.mxu0 %v13446_v63  ;;  %12225 = vmatprep.subr.bf16.mxu1 %v13447_v11  ;;  %v4793_v11 = vrot.slane %v11171_v52, %v14588_v21 }
 0xcb8   : > { %12204 = vmatpush3.bf16.msra.mxu0 %v13448_v0  ;;  %12226 = vmatpush3.bf16.msra.mxu1 %v13449_v2  ;;  %v4801_v0 = vrot.slane %v11171_v52, %v14590_v22 }
 0xcb9   : > { %12205 = vmatprep.subr.bf16.mxu0 %v13450_v3  ;;  %12227 = vmatprep.subr.bf16.mxu1 %v13451_v4 }
 0xcbc   : > { %12206 = vmatpush3.bf16.msra.mxu0 %v13452_v5  ;;  %12228 = vmatpush3.bf16.msra.mxu1 %v13453_v6  ;;  %v4797_v5 = vrot.slane %v11171_v52, %v14583_v14  ;;  %v4805_v6 = vrot.slane %v11171_v52, %v14585_v18  ;;  %v13490_v52 = vld [vmem:[%s15546_s2 + $0x358] sm:$0xff]  }
 0xcbd   : > { %12207 = vmatprep.subr.bf16.mxu0 %v13454_v7  ;;  %12229 = vmatprep.subr.bf16.mxu1 %v13455_v8 }
 0xcc0   : > { %12208 = vmatpush3.bf16.msra.mxu0 %v13456_v9  ;;  %12230 = vmatpush3.bf16.msra.mxu1 %v13457_v10 }
 0xcc1   : > { %12209 = vmatprep.subr.bf16.mxu0 %v13458_v17  ;;  %12231 = vmatprep.subr.bf16.mxu1 %v13459_v19 }
 0xcc4   : > { %12210 = vmatpush3.bf16.msra.mxu0 %v13460_v20  ;;  %12232 = vmatpush3.bf16.msra.mxu1 %v13461_v23 }
 0xcc5   : > { %12211 = vmatprep.subr.bf16.mxu0 %v13462_v24  ;;  %12233 = vmatprep.subr.bf16.mxu1 %v13463_v26 }
 0xcc8   : > { %12212 = vmatpush3.bf16.msra.mxu0 %v13464_v27  ;;  %12234 = vmatpush3.bf16.msra.mxu1 %v13465_v28 }
 0xcc9   : > { %12213 = vmatprep.subr.bf16.mxu0 %v13466_v29  ;;  %12235 = vmatprep.subr.bf16.mxu1 %v13467_v30  ;;  %v5277_v29 = vld [vmem:[%s15543_s28 + $0x30] sm:$0xff] }
 0xccc   : > { %12214 = vmatpush3.bf16.msra.mxu0 %v13468_v31  ;;  %12236 = vmatpush3.bf16.msra.mxu1 %v13469_v32  ;;  %v5279_v32 = vld [vmem:[%s15543_s28 + $0x70] sm:$0xff] }
 0xccd   : > { %12215 = vmatprep.subr.bf16.mxu0 %v13470_v33  ;;  %12237 = vmatprep.subr.bf16.mxu1 %v13471_v36  ;;  %v5278_v33 = vld [vmem:[%s15543_s28 + $0x38] sm:$0xff]  ;;  %v11216_v42 = vcombine.high %v5277_v29, %v5279_v32 }
 0xcce   : > { %v5280_v36 = vld [vmem:[%s15543_s28 + $0x78] sm:$0xff] }
 0xcd0   : > { %12216 = vmatpush3.bf16.msra.mxu0 %v13472_v37  ;;  %12238 = vmatpush3.bf16.msra.mxu1 %v13473_v38 }
 0xcd1   : > { %5360 = vmatprep.subr.bf16.mxu0 %v11220_v41  ;;  %5401 = vmatprep.subr.bf16.mxu1 %v11222_v45  ;;  %v11218_v45 = vcombine.high %v5278_v33, %v5280_v36 }
 0xd4b   : > { %v12129_v16 = vpop.f32.mrf.mxu0  ;;  %v12151_v12 = vpop.f32.mrf.mxu1 }
 0xd4d   : > { %v12130_v13 = vpop.f32.mrf.mxu0  ;;  %v12152_v46 = vpop.f32.mrf.mxu1 }
 0xd4e   : > { %v12131_v49 = vadd.f32 %v12130_v13, %v12129_v16  ;;  %v12153_v51 = vadd.f32 %v12152_v46, %v12151_v12  ;;  %v11215_v16 = vcombine.low %v5277_v29, %v5279_v32  ;;  %v11217_v12 = vcombine.low %v5278_v33, %v5280_v36  ;;  %v13474_v13 = vld [vmem:[%s15546_s2 + $0x378] sm:$0xff]  }
 0xd4f   : > { %v12132_v53 = vpop.f32.mrf.mxu0  ;;  %v12154_v54 = vpop.f32.mrf.mxu1  ;;  %v13475_v46 = vld [vmem:[%s15546_s2 + $0x3f8] sm:$0xff]  }
 0xd50   : > { %v4502_v55 = vadd.f32 %v12153_v51, %v12131_v49  ;;  %v13477_v49 = vld [vmem:[%s15546_s2 + $0x3b8] sm:$0xff]   ;;  %v13479_v51 = vld [vmem:[%s15546_s2 + $0x3f0] sm:$0xff]  }
 0xd51   : > { %v12133_v56 = vpop.f32.mrf.mxu0  ;;  %v12155_v47 = vpop.f32.mrf.mxu1  ;;  %v13480_v53 = vld [vmem:[%s15546_s2 + $0x330] sm:$0xff]  }
 0xd52   : > { %v13481_v54 = vld [vmem:[%s15546_s2 + $0x3b0] sm:$0xff]   ;;  %v13483_v56 = vld [vmem:[%s15546_s2 + $0x3e8] sm:$0xff]  }
 0xd53   : > { %v13484_v47 = vld [vmem:[%s15546_s2 + $0x328] sm:$0xff]  }
 0xd6b   : > { %v12173_v57 = vpop.f32.mrf.mxu0  ;;  %v12195_v48 = vpop.f32.mrf.mxu1 }
 0xd6d   : > { %v12174_v50 = vpop.f32.mrf.mxu0  ;;  %v12196_v58 = vpop.f32.mrf.mxu1 }
 0xd6e   : > { %v12175_v59 = vadd.f32 %v12174_v50, %v12173_v57  ;;  %v12197_v60 = vadd.f32 %v12196_v58, %v12195_v48  ;;  %v13485_v57 = vld [vmem:[%s15546_s2 + $0x3a8] sm:$0xff]   ;;  %v13487_v48 = vld [vmem:[%s15546_s2 + $0x3e0] sm:$0xff]  }
 0xd6f   : > { %v12176_v61 = vpop.f32.mrf.mxu0  ;;  %v12198_v62 = vpop.f32.mrf.mxu1  ;;  %v13488_v50 = vld [vmem:[%s15546_s2 + $0x320] sm:$0xff]  }
 0xd70   : > { %v4734_v63 = vadd.f32 %v12175_v59, %v4502_v55  ;;  %v13482_v55 = vld [vmem:[%s15546_s2 + $0x368] sm:$0xff]   ;;  %v13489_v58 = vld [vmem:[%s15546_s2 + $0x3a0] sm:$0xff]   ;;  %v13491_v59 = vld [vmem:[%s15546_s2 + $0x3d8] sm:$0xff]  }
 0xd71   : > { %v12177_v2 = vpop.f32.mrf.mxu0  ;;  %v12199_v3 = vpop.f32.mrf.mxu1  ;;  %v13493_v61 = vld [vmem:[%s15546_s2 + $0x398] sm:$0xff]   ;;  %v13494_v62 = vld [vmem:[%s15546_s2 + $0x350] sm:$0xff]  }
 0xd72   : > { %v14708_v4 = vadd.f32 %v12197_v60, %v4734_v63  ;;  %v13492_v60 = vld [vmem:[%s15546_s2 + $0x318] sm:$0xff]   ;;  %v13495_v63 = vld [vmem:[%s15546_s2 + $0x3d0] sm:$0xff]   ;;  %v13498_v2 = vld [vmem:[%s15546_s2 + $0x348] sm:$0xff]  }
 0xd73   : > { %v4884_v7 = vpop.f32.mrf.mxu0  ;;  %v4925_v8 = vpop.f32.mrf.mxu1  ;;  %v13499_v3 = vld [vmem:[%s15546_s2 + $0x3c8] sm:$0xff]  }
 0xd74   : > { %v4885_v9 = vadd.f32 %v4884_v7, %v4793_v11  ;;  %v4926_v10 = vadd.f32 %v4925_v8, %v4801_v0  ;;  %v13496_v11 = vld [vmem:[%s15546_s2 + $0x310] sm:$0xff]   ;;  %v13502_v7 = vld [vmem:[%s15546_s2 + $0x340] sm:$0xff]  }
 0xd75   : > { %v4886_v17 = vpop.f32.mrf.mxu0  ;;  %v4927_v19 = vpop.f32.mrf.mxu1  ;;  %v13497_v0 = vld [vmem:[%s15546_s2 + $0x390] sm:$0xff]   ;;  %v13503_v8 = vld [vmem:[%s15546_s2 + $0x3c0] sm:$0xff]  }
 0xd76   : > { %v4887_v20 = vadd.f32 %v4886_v17, %v4797_v5  ;;  %v4928_v23 = vadd.f32 %v4927_v19, %v4805_v6  ;;  %v4932_v24 = vmax.f32 %v4885_v9, 0.0  ;;  %v4934_v26 = vmax.f32 %v4926_v10, 0.0  ;;  %v13500_v5 = vld [vmem:[%s15546_s2 + $0x308] sm:$0xff]   ;;  %v13504_v9 = vld [vmem:[%s15546_s2 + $0x300] sm:$0xff]  }
 0xd77   : > { %v4888_v27 = vpop.f32.mrf.mxu0  ;;  %v4929_v28 = vpop.f32.mrf.mxu1  ;;  %v13501_v6 = vld [vmem:[%s15546_s2 + $0x388] sm:$0xff]   ;;  %v13505_v10 = vld [vmem:[%s15546_s2 + $0x380] sm:$0xff]  }
 0xd78   : > { %v4933_v30 = vmax.f32 %v4887_v20, 0.0  ;;  %v4935_v31 = vmax.f32 %v4928_v23, 0.0  ;;  %v4936_v40 = vpack.c.bf16 %v4932_v24, %v4932_v24  ;;  %v4938_v41 = vpack.c.bf16 %v4934_v26, %v4934_v26  ;;  %v11214_v24 = vld [vmem:[%s15547_s26 + $0x18] ss:$2 sm:$0xf] }
 0xd79   : > { %v4889_v37 = vpop.f32.mrf.mxu0  ;;  %v4930_v38 = vpop.f32.mrf.mxu1  ;;  %v5299_v32 = vrot.slane %v11214_v24, %v14590_v22 }
 0xd7a   : > { %v4937_v25 = vpack.c.bf16 %v4933_v30, %v4933_v30  ;;  %v4939_v39 = vpack.c.bf16 %v4935_v31, %v4935_v31  ;;  %v5291_v31 = vrot.slane %v11214_v24, %v14588_v21  ;;  %v5295_v38 = vrot.slane %v11214_v24, %v14583_v14 }
 0xd7c   : > { %5228 = vmatprep.mubr.bf16.mxu0 %v4937_v25  ;;  %5268 = vmatprep.mubr.bf16.mxu1 %v4939_v39  ;;  %v5303_v25 = vrot.slane %v11214_v24, %v14585_v18 }
 0xd7d   : > { %5229 = vmatmul.mubr.bf16.vlgmr.msra.gmra.mxu0 %v4936_v40  ;;  %5269 = vmatmul.mubr.bf16.vlgmr.msra.gmra.mxu1 %v4938_v41 }
 0xd7e   : > { %5361 = vmatpush1.bf16.msra.mxu0 %v11219_v43  ;;  %5402 = vmatpush1.bf16.msra.mxu1 %v11221_v44  ;;  %v13476_v43 = vld [vmem:[%s15546_s2 + $0x338] sm:$0xff]   ;;  %v13478_v44 = vld [vmem:[%s15546_s2 + $0x370] sm:$0xff]  }
 0xd7f   : > { %5362 = vmatprep.subr.bf16.mxu0 %v11216_v42  ;;  %5403 = vmatprep.subr.bf16.mxu1 %v11218_v45 }
 0xd80   : > { %5380 = vmatprep.mubr.bf16.mxu0 %v13880_v15  ;;  %5421 = vmatprep.mubr.bf16.mxu1 %v13880_v15 }
 0xd82   : > { %5363 = vmatpush1.bf16.msra.mxu0 %v11215_v16  ;;  %5404 = vmatpush1.bf16.msra.mxu1 %v11217_v12 }
 0xd83   : > { %12245 = vmatprep.subr.bf16.mxu0 %v13474_v13  ;;  %12267 = vmatprep.subr.bf16.mxu1 %v13475_v46 }
 0xd85   : > { %11223 = vmatmul.mubr.msk.bf16.vlgmr.msra.gmra.mxu0 %vm1034_vm2, %v14533_v35  ;;  %11224 = vmatmul.mubr.msk.bf16.vlgmr.msra.gmra.mxu1 %vm1034_vm2, %v14533_v35  ;;  %v13486_v35 = vld [vmem:[%s15546_s2 + $0x360] sm:$0xff]  }
 0xd86   : > { %12246 = vmatpush3.bf16.msra.mxu0 %v13476_v43  ;;  %12268 = vmatpush3.bf16.msra.mxu1 %v13477_v49 }
 0xd87   : > { %12247 = vmatprep.subr.bf16.mxu0 %v13478_v44  ;;  %12269 = vmatprep.subr.bf16.mxu1 %v13479_v51 }
 0xd8a   : > { %12248 = vmatpush3.bf16.msra.mxu0 %v13480_v53  ;;  %12270 = vmatpush3.bf16.msra.mxu1 %v13481_v54 }
 0xd8b   : > { %12249 = vmatprep.subr.bf16.mxu0 %v13482_v55  ;;  %12271 = vmatprep.subr.bf16.mxu1 %v13483_v56 }
 0xd8e   : > { %12250 = vmatpush3.bf16.msra.mxu0 %v13484_v47  ;;  %12272 = vmatpush3.bf16.msra.mxu1 %v13485_v57 }
 0xd8f   : > { %12251 = vmatprep.subr.bf16.mxu0 %v13486_v35  ;;  %12273 = vmatprep.subr.bf16.mxu1 %v13487_v48 }
 0xd92   : > { %12252 = vmatpush3.bf16.msra.mxu0 %v13488_v50  ;;  %12274 = vmatpush3.bf16.msra.mxu1 %v13489_v58 }
 0xd93   : > { %12253 = vmatprep.subr.bf16.mxu0 %v13490_v52  ;;  %12275 = vmatprep.subr.bf16.mxu1 %v13491_v59 }
 0xd96   : > { %12254 = vmatpush3.bf16.msra.mxu0 %v13492_v60  ;;  %12276 = vmatpush3.bf16.msra.mxu1 %v13493_v61 }
 0xd97   : > { %12255 = vmatprep.subr.bf16.mxu0 %v13494_v62  ;;  %12277 = vmatprep.subr.bf16.mxu1 %v13495_v63 }
 0xd9a   : > { %12256 = vmatpush3.bf16.msra.mxu0 %v13496_v11  ;;  %12278 = vmatpush3.bf16.msra.mxu1 %v13497_v0  ;;  %v11257_v0 = vld [vmem:[%s14025_s23] ss:$0 sm:$0xff] }
 0xd9b   : > { %12257 = vmatprep.subr.bf16.mxu0 %v13498_v2  ;;  %12279 = vmatprep.subr.bf16.mxu1 %v13499_v3 }
 0xd9e   : > { %12258 = vmatpush3.bf16.msra.mxu0 %v13500_v5  ;;  %12280 = vmatpush3.bf16.msra.mxu1 %v13501_v6 }
 0xd9f   : > { %12259 = vmatprep.subr.bf16.mxu0 %v13502_v7  ;;  %12281 = vmatprep.subr.bf16.mxu1 %v13503_v8 }
 0xda2   : > { %12260 = vmatpush3.bf16.msra.mxu0 %v13504_v9  ;;  %12282 = vmatpush3.bf16.msra.mxu1 %v13505_v10 }
 0xda3   : > { %12921 = vmatprep.subr.bf16.mxu0 %v13878_v1  ;;  %12929 = vmatprep.subr.bf16.mxu1 %v13878_v1 }
 0xe3d   : > { %v12217_v17 = vpop.f32.mrf.mxu0  ;;  %v12239_v19 = vpop.f32.mrf.mxu1 }
 0xe3f   : > { %v12218_v20 = vpop.f32.mrf.mxu0  ;;  %v12240_v23 = vpop.f32.mrf.mxu1 }
 0xe40   : > { %v12219_v26 = vadd.f32 %v12218_v20, %v12217_v17  ;;  %v12241_v27 = vadd.f32 %v12240_v23, %v12239_v19  ;;  %v13506_v19 = vld [vmem:[%s13900_s13 + $0x48] sm:$0xff]   ;;  %v13507_v20 = vld [vmem:[%s13900_s13 + $0x58] sm:$0xff]   ;;  %v13509_v23 = vld [vmem:[%s13900_s13 + $0x50] sm:$0xff]  }
 0xe41   : > { %v12220_v28 = vpop.f32.mrf.mxu0  ;;  %v12242_v29 = vpop.f32.mrf.mxu1 }
 0xe42   : > { %v5271_v30 = vadd.f32 %v12241_v27, %v12219_v26  ;;  %v11258_v29 = vld [vmem:[%s15548_s12] ss:$0 sm:$0xff]  ;;  %s15554_s12 = sld [smem:[#allocation32_spill]] }
 0xe43   : > { %v12221_v33 = vpop.f32.mrf.mxu0  ;;  %v12243_v36 = vpop.f32.mrf.mxu1 }
 0xe44   : > { %v5276_v37 = vadd.f32 %v5271_v30, %v14708_v4  ;;  %v13510_v36 = vld [vmem:[%s13900_s13 + $0x68] sm:$0xff]  }
 0xe45   : > { %v5382_v39 = vpop.f32.mrf.mxu0  ;;  %v5423_v40 = vpop.f32.mrf.mxu1 }
 0xe46   : > { %v5383_v41 = vadd.f32 %v5382_v39, %v5291_v31  ;;  %v5424_v42 = vadd.f32 %v5423_v40, %v5299_v32  ;;  %v11259_v31 = vld [vmem:[%s15550_s0] ss:$0 sm:$0xff]  ;;  %v13513_v39 = vld [vmem:[%s13900_s13 + $0x70] sm:$0xff]   ;;  %v13514_v40 = vld [vmem:[%s13910_s21 + $0x48] sm:$0xff]   ;;  %s886_s0 = sand.u32 1, %s15552_s18  }
 0xe47   : > { %v5384_v45 = vpop.f32.mrf.mxu0  ;;  %v5425_v16 = vpop.f32.mrf.mxu1 }
 0xe48   : > { %v5385_v12 = vadd.f32 %v5384_v45, %v5295_v38  ;;  %v5426_v13 = vadd.f32 %v5425_v16, %v5303_v25  ;;  %v5430_v46 = vmax.f32 %v5383_v41, 0.0  ;;  %v5432_v43 = vmax.f32 %v5424_v42, 0.0  ;;  %v13512_v25 = vld [vmem:[%s13900_s13 + $0x60] sm:$0xff]   ;;  %v13515_v41 = vld [vmem:[%s13910_s21 + $0x58] sm:$0xff]   ;;  %v13517_v45 = vld [vmem:[%s13910_s21 + $0x50] sm:$0xff]  }
 0xe49   : > { %v5386_v49 = vpop.f32.mrf.mxu0  ;;  %v5427_v44 = vpop.f32.mrf.mxu1  ;;  %v13516_v42 = vld [vmem:[%s13910_s21 + $0x40] sm:$0xff]   ;;  %v13518_v16 = vld [vmem:[%s13910_s21 + $0x68] sm:$0xff]  }
 0xe4a   : > { %v5431_v51 = vmax.f32 %v5385_v12, 0.0  ;;  %v5433_v53 = vmax.f32 %v5426_v13, 0.0  ;;  %v5434_v47 = vpack.c.bf16 %v5430_v46, %v5430_v46  ;;  %v5436_v57 = vpack.c.bf16 %v5432_v43, %v5432_v43  ;;  %v13519_v12 = vld [vmem:[%s13910_s21 + $0x78] sm:$0xff]   ;;  %v13520_v13 = vld [vmem:[%s13910_s21 + $0x60] sm:$0xff]   ;;  %v13521_v46 = vld [vmem:[%s13910_s21 + $0x70] sm:$0xff]  }
 0xe4b   : > { %v5387_v54 = vpop.f32.mrf.mxu0  ;;  %v5428_v4 = vpop.f32.mrf.mxu1  ;;  %v13522_v43 = vld [vmem:[%s13920_s29 + $0x48] sm:$0xff]   ;;  %v13523_v49 = vld [vmem:[%s13920_s29 + $0x58] sm:$0xff]   ;;  %v13524_v44 = vld [vmem:[%s13920_s29 + $0x40] sm:$0xff]  }
 0xe4c   : > { %v5435_v55 = vpack.c.bf16 %v5431_v51, %v5431_v51  ;;  %v5437_v56 = vpack.c.bf16 %v5433_v53, %v5433_v53  ;;  %v13525_v51 = vld [vmem:[%s13920_s29 + $0x50] sm:$0xff]   ;;  %v13526_v53 = vld [vmem:[%s13920_s29 + $0x68] sm:$0xff]   ;;  %v13527_v54 = vld [vmem:[%s13920_s29 + $0x78] sm:$0xff]  }
 0xe4d   : > { %v13528_v4 = vld [vmem:[%s13920_s29 + $0x60] sm:$0xff]  }
 0xe4e   : > { %5726 = vmatprep.mubr.bf16.mxu0 %v5435_v55  ;;  %5766 = vmatprep.mubr.bf16.mxu1 %v5437_v56  ;;  %v13529_v55 = vld [vmem:[%s13920_s29 + $0x70] sm:$0xff]  }
 0xe4f   : > { %5727 = vmatmul.mubr.bf16.vlgmr.msra.gmra.mxu0 %v5434_v47  ;;  %5767 = vmatmul.mubr.bf16.vlgmr.msra.gmra.mxu1 %v5436_v57 }
 0xe50   : > { %12925 = vmatprep.mubr.msk.bf16.mxu0 %vm13879_vm0, %v13878_v1  ;;  %12933 = vmatprep.mubr.msk.bf16.mxu1 %vm13879_vm0, %v13878_v1 }
 0xe51   : > { %12922 = vmatpush3.bf16.msra.mxu0 %v13506_v19  ;;  %12930 = vmatpush3.bf16.msra.mxu1 %v13507_v20 }
 0xe52   : > { %12923 = vmatprep.subr.bf16.mxu0 %v13878_v1  ;;  %12931 = vmatprep.subr.bf16.mxu1 %v13878_v1 }
 0xe55   : > { %12932 = vmatpush3.bf16.msra.mxu1 %v13509_v23  ;;  %v11325_v23 = vld [vmem:[%s13905_s17 + $0x5] ss:$0 sm:$0xff] }
 0xe56   : > { %12945 = vmatprep.subr.bf16.mxu1 %v13878_v1 }
 0xf0f   : > { %v12261_v35 = vpop.f32.mrf.mxu0  ;;  %v12283_v48 = vpop.f32.mrf.mxu1 }
 0xf11   : > { %v12262_v50 = vpop.f32.mrf.mxu0  ;;  %v12284_v58 = vpop.f32.mrf.mxu1 }
 0xf12   : > { %v12263_v52 = vadd.f32 %v12262_v50, %v12261_v35  ;;  %v12285_v59 = vadd.f32 %v12284_v58, %v12283_v48 }
 0xf13   : > { %v12264_v60 = vpop.f32.mrf.mxu0  ;;  %v12286_v61 = vpop.f32.mrf.mxu1 }
 0xf14   : > { %v5769_v62 = vadd.f32 %v12285_v59, %v12263_v52 }
 0xf15   : > { %v12265_v63 = vpop.f32.mrf.mxu0  ;;  %v12287_v11 = vpop.f32.mrf.mxu1 }
 0xf16   : > { %v5774_v2 = vadd.f32 %v5769_v62, %v5276_v37  ;;  %v13511_v37 = vld [vmem:[%s13900_s13 + $0x78] sm:$0xff]  }
 0xf18   : > { %v5780_v3 = vadd.f32 %v11257_v0, %v5774_v2 }
 0xf1a   : > { %v5783_v5 = vadd.f32 %v5780_v3, %v14529_v34  ;;  %v13508_v34 = vld [vmem:[%s13900_s13 + $0x40] sm:$0xff]  }
 0xf1b   : > { %12924 = vmatpush3.bf16.msra.mxu0 %v13508_v34  ;;  %v11340_v3 = vld [vmem:[%s13915_s25 + $0x4] ss:$0 sm:$0xff] }
 0xf1c   : > { %v5784_v6 = vsel %vm1034_vm2, %v5783_v5, 0.0  ;;  %12937 = vmatprep.subr.bf16.mxu0 %v13878_v1  ;;  %v11324_v34 = vld [vmem:[%s13905_s17 + $0x4] ss:$0 sm:$0xff] }
 0xf1d   : > { %5785 = vadd.xlane.f32.xlu0 %v5784_v6 }
 0xfa6   : > { %v5786_v7 = vpop.xlane.xlu0 %5785 }
 0xfa7   : > { %v5787_v8 = vmul.f32 0.03125, %v5786_v7 }
 0xfa9   : > { %v5788_v9 = vsub.f32 %v5783_v5, %v5787_v8  ;;  %v11341_v5 = vld [vmem:[%s13915_s25 + $0x5] ss:$0 sm:$0xff] }
 0xfab   : > { %v5789_v10 = vmul.f32 %v5788_v9, %v5788_v9 }
 0xfad   : > { %v5790_v17 = vsel %vm1034_vm2, %v5789_v10, 0.0 }
 0xfae   : > { %5791 = vadd.xlane.f32.xlu1 %v5790_v17 }
0x1037   : > { %v5792_v24 = vpop.xlane.xlu1 %5791 }
0x1038   : > { %v5793_v26 = vmul.f32 0.03125, %v5792_v24 }
0x103a   : > { %v5794_v27 = vadd.f32 1e-05, %v5793_v26 }
0x103c   : > { %13730 = vrsqrt.f32 %v5794_v27 }
0x1049   : > { %v13731_v28 = vpop.eup %13730 }
0x104a   : > { %v5796_v30 = vmul.f32 %v13731_v28, %v5788_v9 }
0x104c   : > { %v5801_v32 = vmul.f32 %v11258_v29, %v5796_v30 }
0x104e   : > { %v14780_v33 = vadd.f32 %v11259_v31, %v5801_v32  ;;  %v11342_v31 = vld [vmem:[%s13915_s25 + $0x6] ss:$0 sm:$0xff]  ;;  %v11343_v32 = vld [vmem:[%s13915_s25 + $0x7] ss:$0 sm:$0xff] }
0x1050   : > { %v14786_v38 = vpack.c.bf16 %v14780_v33, %v14780_v33 }
0x1052   : > { %12926 = vmatmul.mubr.msk.bf16.vlgmr.msra.gmra.mxu0 %vm1034_vm2, %v14786_v38  ;;  %12934 = vmatmul.mubr.msk.bf16.vlgmr.msra.gmra.mxu1 %vm1034_vm2, %v14786_v38 }
0x1053   : > { %12938 = vmatpush3.bf16.msra.mxu0 %v13510_v36  ;;  %12946 = vmatpush3.bf16.msra.mxu1 %v13511_v37 }
0x1054   : > { %12939 = vmatprep.subr.bf16.mxu0 %v13878_v1  ;;  %12947 = vmatprep.subr.bf16.mxu1 %v13878_v1 }
0x1055   : > { %12941 = vmatprep.mubr.msk.bf16.mxu0 %vm13879_vm0, %v13878_v1  ;;  %12949 = vmatprep.mubr.msk.bf16.mxu1 %vm13879_vm0, %v13878_v1 }
0x1057   : > { %12940 = vmatpush3.bf16.msra.mxu0 %v13512_v25  ;;  %12948 = vmatpush3.bf16.msra.mxu1 %v13513_v39 }
0x1058   : > { %12953 = vmatprep.subr.bf16.mxu0 %v13878_v1  ;;  %12961 = vmatprep.subr.bf16.mxu1 %v13878_v1 }
0x105a   : > { %12942 = vmatmul.mubr.msk.bf16.vlgmr.msra.gmra.mxu0 %vm1034_vm2, %v14786_v38  ;;  %12950 = vmatmul.mubr.msk.bf16.vlgmr.msra.gmra.mxu1 %vm1034_vm2, %v14786_v38 }
0x105b   : > { %12954 = vmatpush3.bf16.msra.mxu0 %v13514_v40  ;;  %12962 = vmatpush3.bf16.msra.mxu1 %v13515_v41 }
0x105c   : > { %12955 = vmatprep.subr.bf16.mxu0 %v13878_v1  ;;  %12963 = vmatprep.subr.bf16.mxu1 %v13878_v1 }
0x105d   : > { %12957 = vmatprep.mubr.msk.bf16.mxu0 %vm13879_vm0, %v13878_v1  ;;  %12965 = vmatprep.mubr.msk.bf16.mxu1 %vm13879_vm0, %v13878_v1 }
0x105f   : > { %12956 = vmatpush3.bf16.msra.mxu0 %v13516_v42  ;;  %12964 = vmatpush3.bf16.msra.mxu1 %v13517_v45 }
0x1060   : > { %12969 = vmatprep.subr.bf16.mxu0 %v13878_v1  ;;  %12977 = vmatprep.subr.bf16.mxu1 %v13878_v1 }
0x1062   : > { %12958 = vmatmul.mubr.msk.bf16.vlgmr.msra.gmra.mxu0 %vm1034_vm2, %v14786_v38  ;;  %12966 = vmatmul.mubr.msk.bf16.vlgmr.msra.gmra.mxu1 %vm1034_vm2, %v14786_v38 }
0x1063   : > { %12970 = vmatpush3.bf16.msra.mxu0 %v13518_v16  ;;  %12978 = vmatpush3.bf16.msra.mxu1 %v13519_v12 }
0x1064   : > { %12971 = vmatprep.subr.bf16.mxu0 %v13878_v1  ;;  %12979 = vmatprep.subr.bf16.mxu1 %v13878_v1 }
0x1065   : > { %12973 = vmatprep.mubr.msk.bf16.mxu0 %vm13879_vm0, %v13878_v1  ;;  %12981 = vmatprep.mubr.msk.bf16.mxu1 %vm13879_vm0, %v13878_v1 }
0x1067   : > { %12972 = vmatpush3.bf16.msra.mxu0 %v13520_v13  ;;  %12980 = vmatpush3.bf16.msra.mxu1 %v13521_v46 }
0x1068   : > { %12985 = vmatprep.subr.bf16.mxu0 %v13878_v1  ;;  %12993 = vmatprep.subr.bf16.mxu1 %v13878_v1 }
0x106a   : > { %12974 = vmatmul.mubr.msk.bf16.vlgmr.msra.gmra.mxu0 %vm1034_vm2, %v14786_v38  ;;  %12982 = vmatmul.mubr.msk.bf16.vlgmr.msra.gmra.mxu1 %vm1034_vm2, %v14786_v38 }
0x106b   : > { %12986 = vmatpush3.bf16.msra.mxu0 %v13522_v43  ;;  %12994 = vmatpush3.bf16.msra.mxu1 %v13523_v49  ;;  %v11326_v43 = vld [vmem:[%s13905_s17 + $0x6] ss:$0 sm:$0xff]  ;;  %v11327_v49 = vld [vmem:[%s13905_s17 + $0x7] ss:$0 sm:$0xff] }
0x106c   : > { %12987 = vmatprep.subr.bf16.mxu0 %v13878_v1  ;;  %12995 = vmatprep.subr.bf16.mxu1 %v13878_v1 }
0x106d   : > { %12989 = vmatprep.mubr.msk.bf16.mxu0 %vm13879_vm0, %v13878_v1  ;;  %12997 = vmatprep.mubr.msk.bf16.mxu1 %vm13879_vm0, %v13878_v1 }
0x106f   : > { %12988 = vmatpush3.bf16.msra.mxu0 %v13524_v44  ;;  %12996 = vmatpush3.bf16.msra.mxu1 %v13525_v51 }
0x1070   : > { %13001 = vmatprep.subr.bf16.mxu0 %v13878_v1  ;;  %13009 = vmatprep.subr.bf16.mxu1 %v13878_v1 }
0x1072   : > { %12990 = vmatmul.mubr.msk.bf16.vlgmr.msra.gmra.mxu0 %vm1034_vm2, %v14786_v38  ;;  %12998 = vmatmul.mubr.msk.bf16.vlgmr.msra.gmra.mxu1 %vm1034_vm2, %v14786_v38 }
0x1073   : > { %13002 = vmatpush3.bf16.msra.mxu0 %v13526_v53  ;;  %13010 = vmatpush3.bf16.msra.mxu1 %v13527_v54 }
0x1074   : > { %13003 = vmatprep.subr.bf16.mxu0 %v13878_v1  ;;  %13011 = vmatprep.subr.bf16.mxu1 %v13878_v1 }
0x1075   : > { %13005 = vmatprep.mubr.msk.bf16.mxu0 %vm13879_vm0, %v13878_v1  ;;  %13013 = vmatprep.mubr.msk.bf16.mxu1 %vm13879_vm0, %v13878_v1 }
0x1077   : > { %13004 = vmatpush3.bf16.msra.mxu0 %v13528_v4  ;;  %13012 = vmatpush3.bf16.msra.mxu1 %v13529_v55 }
0x1078   : > { %13017 = vmatprep.subr.bf16.mxu0 %v13878_v1  ;;  %13023 = vmatprep.subr.bf16.mxu1 %v13878_v1 }
0x107a   : > { %13006 = vmatmul.mubr.msk.bf16.vlgmr.msra.gmra.mxu0 %vm1034_vm2, %v14786_v38  ;;  %13014 = vmatmul.mubr.msk.bf16.vlgmr.msra.gmra.mxu1 %vm1034_vm2, %v14786_v38 }
0x107b   : > { %13019 = vmatprep.mubr.msk.bf16.mxu0 %vm13879_vm0, %v13878_v1  ;;  %13025 = vmatprep.mubr.msk.bf16.mxu1 %vm13879_vm0, %v13878_v1 }
0x1112   : > { %v5953_v56 = vpop.f32.mrf.mxu0  ;;  %v6005_v47 = vpop.f32.mrf.mxu1 }
0x1113   : > { %v5954_v36 = vadd.f32 %v11324_v34, %v5953_v56  ;;  %v6006_v37 = vadd.f32 %v11325_v23, %v6005_v47  ;;  %v11356_v56 = vld [vmem:[%s15522_s3 + $0x4] ss:$0 sm:$0xff]  ;;  %v11357_v47 = vld [vmem:[%s15522_s3 + $0x5] ss:$0 sm:$0xff] }
0x1114   : > { %v12927_v57 = vpop.f32.mrf.mxu0  ;;  %v12935_v35 = vpop.f32.mrf.mxu1 }
0x1115   : > { %v6579_v16 = vpack.c.bf16 %v5954_v36, %v5954_v36  ;;  %v6580_v12 = vpack.c.bf16 %v6006_v37, %v6006_v37 }
0x1116   : > { %v5956_v48 = vpop.f32.mrf.mxu0  ;;  %v6008_v50 = vpop.f32.mrf.mxu1 }
0x1118   : > { %v12928_v58 = vpop.f32.mrf.mxu0  ;;  %v12936_v52 = vpop.f32.mrf.mxu1 }
0x111a   : > { %v6057_v59 = vpop.f32.mrf.mxu0  ;;  %v6109_v60 = vpop.f32.mrf.mxu1 }
0x111b   : > { %v6058_v57 = vadd.f32 %v11326_v43, %v6057_v59  ;;  %v6110_v35 = vadd.f32 %v11327_v49, %v6109_v60 }
0x111c   : > { %v12943_v61 = vpop.f32.mrf.mxu0  ;;  %v12951_v62 = vpop.f32.mrf.mxu1 }
0x111e   : > { %v6060_v63 = vpop.f32.mrf.mxu0  ;;  %v6112_v11 = vpop.f32.mrf.mxu1 }
0x111f   : > { %v6581_v63 = vpack.c.bf16 %v6058_v57, %v6058_v57  ;;  %v6582_v11 = vpack.c.bf16 %v6110_v35, %v6110_v35 }
0x1120   : > { %v12944_v0 = vpop.f32.mrf.mxu0  ;;  %v12952_v2 = vpop.f32.mrf.mxu1 }
0x1122   : > { %v6185_v6 = vpop.f32.mrf.mxu0  ;;  %v6237_v7 = vpop.f32.mrf.mxu1 }
0x1123   : > { %v6186_v8 = vadd.f32 %v11340_v3, %v6185_v6  ;;  %v6238_v9 = vadd.f32 %v11341_v5, %v6237_v7 }
0x1124   : > { %v12959_v10 = vpop.f32.mrf.mxu0  ;;  %v12967_v17 = vpop.f32.mrf.mxu1 }
0x1125   : > { %v6583_v19 = vpack.c.bf16 %v6186_v8, %v6186_v8  ;;  %v6584_v20 = vpack.c.bf16 %v6238_v9, %v6238_v9 }
0x1126   : > { %v6188_v24 = vpop.f32.mrf.mxu0  ;;  %v6240_v26 = vpop.f32.mrf.mxu1 }
0x1127   : > { %v6591_v27 = vsel %vm1706_vm3, %v6583_v19, 0  ;;  %v6637_v28 = vsel %vm1706_vm3, %v6584_v20, 0 }
0x1128   : > { %v12960_v29 = vpop.f32.mrf.mxu0  ;;  %v12968_v30 = vpop.f32.mrf.mxu1  ;;  %13018 = vmatpush3.bf16.xpose.msra.mxu0 %v6591_v27  ;;  %13024 = vmatpush3.bf16.xpose.msra.mxu1 %v6637_v28 }
0x1129   : > { %13029 = vmatprep.subr.bf16.mxu0 %v13878_v1  ;;  %13035 = vmatprep.subr.bf16.mxu1 %v13878_v1 }
0x112a   : > { %v6289_v25 = vpop.f32.mrf.mxu0  ;;  %v6341_v39 = vpop.f32.mrf.mxu1 }
0x112b   : > { %v6290_v40 = vadd.f32 %v11342_v31, %v6289_v25  ;;  %v6342_v41 = vadd.f32 %v11343_v32, %v6341_v39 }
0x112c   : > { %v12975_v42 = vpop.f32.mrf.mxu0  ;;  %v12983_v45 = vpop.f32.mrf.mxu1 }
0x112d   : > { %v6585_v13 = vpack.c.bf16 %v6290_v40, %v6290_v40  ;;  %v6586_v46 = vpack.c.bf16 %v6342_v41, %v6342_v41 }
0x112e   : > { %v6292_v44 = vpop.f32.mrf.mxu0  ;;  %v6344_v51 = vpop.f32.mrf.mxu1 }
0x112f   : > { %v6683_v53 = vsel %vm1706_vm3, %v6585_v13, 0  ;;  %v6729_v54 = vsel %vm1706_vm3, %v6586_v46, 0  ;;  %13020 = vmatmul.mubr.msk.bf16.vlgmr.msra.gmra.mxu0 %vm1706_vm3, %v6579_v16  ;;  %13026 = vmatmul.mubr.msk.bf16.vlgmr.msra.gmra.mxu1 %vm1706_vm3, %v6580_v12 }
0x1130   : > { %v12976_v4 = vpop.f32.mrf.mxu0  ;;  %v12984_v55 = vpop.f32.mrf.mxu1  ;;  %13030 = vmatpush3.bf16.xpose.msra.mxu0 %v6683_v53  ;;  %13036 = vmatpush3.bf16.xpose.msra.mxu1 %v6729_v54 }
0x1131   : > { %13031 = vmatprep.mubr.msk.bf16.mxu0 %vm13879_vm0, %v13878_v1  ;;  %13037 = vmatprep.mubr.msk.bf16.mxu1 %vm13879_vm0, %v13878_v1 }
0x1132   : > { %v6417_v48 = vpop.f32.mrf.mxu0  ;;  %v6469_v50 = vpop.f32.mrf.mxu1  ;;  %13041 = vmatprep.subr.bf16.mxu0 %v13878_v1  ;;  %13047 = vmatprep.subr.bf16.mxu1 %v13878_v1 }
0x1133   : > { %v6418_v58 = vadd.f32 %v11356_v56, %v6417_v48  ;;  %v6470_v52 = vadd.f32 %v11357_v47, %v6469_v50 }
0x1134   : > { %v12991_v61 = vpop.f32.mrf.mxu0  ;;  %v12999_v62 = vpop.f32.mrf.mxu1 }
0x1135   : > { %v6823_v59 = vpack.c.bf16 %v6418_v58, %v6418_v58  ;;  %v6824_v60 = vpack.c.bf16 %v6470_v52, %v6470_v52 }
0x1136   : > { %v6420_v0 = vpop.f32.mrf.mxu0  ;;  %v6472_v2 = vpop.f32.mrf.mxu1 }
0x1137   : > { %v6831_v3 = vsel %vm1950_vm4, %v6823_v59, 0  ;;  %v6877_v5 = vsel %vm1950_vm4, %v6824_v60, 0  ;;  %13032 = vmatmul.mubr.msk.bf16.vlgmr.msra.gmra.mxu0 %vm1706_vm3, %v6581_v63  ;;  %13038 = vmatmul.mubr.msk.bf16.vlgmr.msra.gmra.mxu1 %vm1706_vm3, %v6582_v11 }
0x1138   : > { %v12992_v6 = vpop.f32.mrf.mxu0  ;;  %v13000_v7 = vpop.f32.mrf.mxu1  ;;  %13042 = vmatpush3.bf16.msra.mxu0 %v6831_v3  ;;  %13048 = vmatpush3.bf16.msra.mxu1 %v6877_v5 }
0x1139   : > { %13043 = vmatprep.mubr.msk.bf16.mxu0 %vm13879_vm0, %v13878_v1  ;;  %13049 = vmatprep.mubr.msk.bf16.mxu1 %vm13879_vm0, %v13878_v1  ;;  %v11359_v6 = vld [vmem:[%s15522_s3 + $0x7] ss:$0 sm:$0xff] }
0x113a   : > { %v14906_v8 = vpop.f32.mrf.mxu0  ;;  %v14908_v9 = vpop.f32.mrf.mxu1  ;;  %13053 = vmatprep.subr.bf16.mxu0 %v13878_v1  ;;  %13059 = vmatprep.subr.bf16.mxu1 %v13878_v1 }
0x113c   : > { %v13007_v10 = vpop.f32.mrf.mxu0  ;;  %v13015_v17 = vpop.f32.mrf.mxu1 }
0x113d   : > { %v11358_v10 = vld [vmem:[%s15522_s3 + $0x6] ss:$0 sm:$0xff]  ;;  %s11992_s3 = sshll.u32 %s15554_s12, 9 }
0x113e   : > { %v6524_v19 = vpop.f32.mrf.mxu0  ;;  %v6576_v20 = vpop.f32.mrf.mxu1 }
0x113f   : > { %v6574_v19 = vadd.f32 %v11359_v6, %v14908_v9  ;;  %v6522_v20 = vadd.f32 %v11358_v10, %v14906_v8  ;;  %v11321_v9 = vld [vmem:[%s15521_s8 + $0x14] sm:$0xf] }
0x1140   : > { %v13008_v34 = vpop.f32.mrf.mxu0  ;;  %v13016_v23 = vpop.f32.mrf.mxu1 }
0x11ef   : > { %v6627_v24 = vpop.f32.mrf.mxu0  ;;  %v6673_v26 = vpop.f32.mrf.mxu1 }
0x11f0   : > { %v6771_v27 = vmul.f32 0.35355338, %v6627_v24  ;;  %v6772_v28 = vmul.f32 0.35355338, %v6673_v26  ;;  %v6826_v24 = vpack.c.bf16 %v6574_v19, %v6574_v19 }
0x11f1   : > { %v13021_v29 = vpop.f32.mrf.mxu0  ;;  %v13027_v30 = vpop.f32.mrf.mxu1 }
0x11f2   : > { %v6778_v31 = vsel %vm1706_vm3, %v6772_v28, -inf  ;;  %v6775_v32 = vsel %vm1706_vm3, %v6771_v27, -inf }
0x11f3   : > { %6779 = vmax.xlane.f32.xlu1 %v6778_v31  ;;  %v6676_v36 = vpop.f32.mrf.mxu1  ;;  %6776 = vmax.xlane.f32.xlu0 %v6775_v32  ;;  %v6630_v37 = vpop.f32.mrf.mxu0  ;;  %v6969_v31 = vsel %vm1950_vm4, %v6826_v24, 0 }
0x11f5   : > { %v13022_v25 = vpop.f32.mrf.mxu0  ;;  %v13028_v39 = vpop.f32.mrf.mxu1 }
0x11f6   : > { %v11320_v25 = vld [vmem:[%s15521_s8 + $0x10] sm:$0xf] }
0x11f7   : > { %v6719_v40 = vpop.f32.mrf.mxu0  ;;  %v6765_v41 = vpop.f32.mrf.mxu1 }
0x11f8   : > { %v6773_v42 = vmul.f32 0.35355338, %v6719_v40  ;;  %v6774_v45 = vmul.f32 0.35355338, %v6765_v41  ;;  %v7065_v41 = vsel %vm1950_vm4, %v11321_v9, 0 }
0x11f9   : > { %v13033_v16 = vpop.f32.mrf.mxu0  ;;  %v13039_v12 = vpop.f32.mrf.mxu1 }
0x11fa   : > { %v6784_v13 = vsel %vm1706_vm3, %v6774_v45, -inf  ;;  %v6781_v46 = vsel %vm1706_vm3, %v6773_v42, -inf  ;;  %v11323_v16 = vld [vmem:[%s15521_s8 + $0x1c] sm:$0xf]  ;;  %v11322_v12 = vld [vmem:[%s15521_s8 + $0x18] sm:$0xf] }
0x11fb   : > { %6785 = vmax.xlane.f32.xlu1 %v6784_v13  ;;  %v6768_v43 = vpop.f32.mrf.mxu1  ;;  %6782 = vmax.xlane.f32.xlu0 %v6781_v46  ;;  %v6722_v49 = vpop.f32.mrf.mxu0 }
0x11fc   : > { %v7157_v49 = vsel %vm1950_vm4, %v11323_v16, 0  ;;  %v13530_v16 = vld [vmem:[%s13940_s19 + $0x48] sm:$0xff]  }
0x11fd   : > { %v13034_v44 = vpop.f32.mrf.mxu0  ;;  %v13040_v51 = vpop.f32.mrf.mxu1 }
0x127c   : > { %v6780_v53 = vpop.xlane.xlu1 %6779  ;;  %v6777_v54 = vpop.xlane.xlu0 %6776 }
0x127d   : > { %v6788_v4 = vsub.f32 %v6772_v28, %v6780_v53  ;;  %v6787_v55 = vsub.f32 %v6771_v27, %v6777_v54  ;;  %v6825_v27 = vpack.c.bf16 %v6522_v20, %v6522_v20  ;;  %v7111_v53 = vsel %vm1950_vm4, %v11322_v12, 0  ;;  %v13531_v12 = vld [vmem:[%s13940_s19 + $0x58] sm:$0xff]  }
0x127f   : > { %v6793_v56 = vmul.f32 1.442695, %v6788_v4  ;;  %v6791_v47 = vmul.f32 1.442695, %v6787_v55  ;;  %v6923_v32 = vsel %vm1950_vm4, %v6825_v27, 0 }
0x1281   : > { %13732 = vpow2.f32 %v6793_v56 }
0x1282   : > { %13734 = vpow2.f32 %v6791_v47 }
0x1284   : > { %v6786_v57 = vpop.xlane.xlu1 %6785  ;;  %v6783_v35 = vpop.xlane.xlu0 %6782 }
0x1285   : > { %v6790_v48 = vsub.f32 %v6774_v45, %v6786_v57  ;;  %v6789_v50 = vsub.f32 %v6773_v42, %v6783_v35  ;;  %v7019_v45 = vsel %vm1950_vm4, %v11320_v25, 0 }
0x1287   : > { %v6797_v58 = vmul.f32 1.442695, %v6790_v48  ;;  %v6795_v52 = vmul.f32 1.442695, %v6789_v50 }
0x1289   : > { %13736 = vpow2.f32 %v6797_v58 }
0x128a   : > { %13738 = vpow2.f32 %v6795_v52 }
0x128e   : > { %v13733_v61 = vpop.eup %13732 }
0x128f   : > { %v13735_v62 = vpop.eup %13734  ;;  %v6802_v63 = vsel %vm1706_vm3, %v13733_v61, 0.0 }
0x1290   : > { %6803 = vadd.xlane.f32.xlu1 %v6802_v63  ;;  %v6799_v11 = vsel %vm1706_vm3, %v13735_v62, 0.0 }
0x1291   : > { %6800 = vadd.xlane.f32.xlu0 %v6799_v11 }
0x1296   : > { %v13737_v59 = vpop.eup %13736 }
0x1297   : > { %v13739_v60 = vpop.eup %13738  ;;  %v6808_v0 = vsel %vm1706_vm3, %v13737_v59, 0.0 }
0x1298   : > { %6809 = vadd.xlane.f32.xlu1 %v6808_v0  ;;  %v6805_v2 = vsel %vm1706_vm3, %v13739_v60, 0.0 }
0x1299   : > { %6806 = vadd.xlane.f32.xlu0 %v6805_v2 }
0x1319   : > { %v6804_v3 = vpop.xlane.xlu1 %6803 }
0x131a   : > { %13740 = vrcp.f32 %v6804_v3  ;;  %v6801_v5 = vpop.xlane.xlu0 %6800 }
0x131b   : > { %13742 = vrcp.f32 %v6801_v5 }
0x1321   : > { %v6810_v7 = vpop.xlane.xlu1 %6809 }
0x1322   : > { %13744 = vrcp.f32 %v6810_v7  ;;  %v6807_v17 = vpop.xlane.xlu0 %6806 }
0x1323   : > { %13746 = vrcp.f32 %v6807_v17 }
0x1327   : > { %v13741_v34 = vpop.eup %13740 }
0x1328   : > { %v13743_v23 = vpop.eup %13742  ;;  %v6816_v26 = vmul.f32 %v13741_v34, %v13733_v61 }
0x1329   : > { %v6815_v28 = vmul.f32 %v13743_v23, %v13735_v62 }
0x132a   : > { %v6820_v29 = vpack.c.bf16 %v6816_v26, %v6816_v26 }
0x132b   : > { %v6819_v30 = vpack.c.bf16 %v6815_v28, %v6815_v28  ;;  %v11384_v28 = vld [vmem:[%s13935_s14 + $0x1] ss:$0 sm:$0xff] }
0x132c   : > { %13050 = vmatmul.mubr.msk.bf16.vlgmr.msra.gmra.mxu1 %vm1706_vm3, %v6820_v29 }
0x132d   : > { %13044 = vmatmul.mubr.msk.bf16.vlgmr.msra.gmra.mxu0 %vm1706_vm3, %v6819_v30  ;;  %13060 = vmatpush3.bf16.msra.mxu1 %v6969_v31 }
0x132e   : > { %13054 = vmatpush3.bf16.msra.mxu0 %v6923_v32  ;;  %13055 = vmatprep.mubr.msk.bf16.mxu0 %vm13879_vm0, %v13878_v1 }
0x132f   : > { %v13745_v8 = vpop.eup %13744  ;;  %13061 = vmatprep.mubr.msk.bf16.mxu1 %vm13879_vm0, %v13878_v1  ;;  %13065 = vmatprep.subr.bf16.mxu0 %v13878_v1 }
0x1330   : > { %v13747_v36 = vpop.eup %13746  ;;  %v6818_v37 = vmul.f32 %v13745_v8, %v13737_v59  ;;  %13071 = vmatprep.subr.bf16.mxu1 %v13878_v1 }
0x1331   : > { %v6817_v39 = vmul.f32 %v13747_v36, %v13739_v60 }
0x1332   : > { %v6822_v40 = vpack.c.bf16 %v6818_v37, %v6818_v37 }
0x1333   : > { %v6821_v42 = vpack.c.bf16 %v6817_v39, %v6817_v39 }
0x1334   : > { %13062 = vmatmul.mubr.msk.bf16.vlgmr.msra.gmra.mxu1 %vm1706_vm3, %v6822_v40 }
0x1335   : > { %13056 = vmatmul.mubr.msk.bf16.vlgmr.msra.gmra.mxu0 %vm1706_vm3, %v6821_v42  ;;  %13072 = vmatpush3.bf16.msra.mxu1 %v7065_v41 }
0x1336   : > { %13066 = vmatpush3.bf16.msra.mxu0 %v7019_v45  ;;  %13067 = vmatprep.mubr.msk.bf16.mxu0 %vm13879_vm0, %v13878_v1 }
0x1337   : > { %13073 = vmatprep.mubr.msk.bf16.mxu1 %vm13879_vm0, %v13878_v1  ;;  %13077 = vmatprep.subr.bf16.mxu0 %v13878_v1 }
0x1338   : > { %13083 = vmatprep.subr.bf16.mxu1 %v13878_v1 }
0x13ec   : > { %v6913_v13 = vpop.f32.mrf.mxu1 }
0x13ed   : > { %v6867_v46 = vpop.f32.mrf.mxu0  ;;  %v7012_v43 = vpack.c.bf16 %v6913_v13, %v6913_v13  ;;  %v13532_v13 = vld [vmem:[%s13940_s19 + $0x40] sm:$0xff]  }
0x13ee   : > { %v7011_v44 = vpack.c.bf16 %v6867_v46, %v6867_v46  ;;  %v13051_v51 = vpop.f32.mrf.mxu1  ;;  %v13533_v46 = vld [vmem:[%s13940_s19 + $0x50] sm:$0xff]  }
0x13ef   : > { %v13045_v54 = vpop.f32.mrf.mxu0  ;;  %13074 = vmatmul.mubr.msk.bf16.vlgmr.msra.gmra.mxu1 %vm1706_vm3, %v7012_v43  ;;  %v11385_v51 = vld [vmem:[%s13980_s24 + $0x1] ss:$0 sm:$0xff] }
0x13f0   : > { %13068 = vmatmul.mubr.msk.bf16.vlgmr.msra.gmra.mxu0 %vm1706_vm3, %v7011_v44  ;;  %v6916_v4 = vpop.f32.mrf.mxu1  ;;  %13084 = vmatpush3.bf16.msra.mxu1 %v7157_v49  ;;  %v11386_v54 = vld [vmem:[%s13985_s20 + $0x1] ss:$0 sm:$0xff] }
0x13f1   : > { %v6870_v55 = vpop.f32.mrf.mxu0  ;;  %13078 = vmatpush3.bf16.msra.mxu0 %v7111_v53  ;;  %13079 = vmatprep.mubr.msk.bf16.mxu0 %vm13879_vm0, %v13878_v1 }
0x13f2   : > { %v13052_v56 = vpop.f32.mrf.mxu1  ;;  %13085 = vmatprep.mubr.msk.bf16.mxu1 %vm13879_vm0, %v13878_v1  ;;  %13089 = vmatprep.subr.bf16.mxu0 %v13878_v1 }
0x13f3   : > { %v13046_v47 = vpop.f32.mrf.mxu0  ;;  %13097 = vmatprep.subr.bf16.mxu1 %v13878_v1  ;;  %v13534_v56 = vld [vmem:[%s13940_s19 + $0x68] sm:$0xff]  }
0x13f4   : > { %v7005_v57 = vpop.f32.mrf.mxu1  ;;  %v13535_v47 = vld [vmem:[%s13940_s19 + $0x78] sm:$0xff]  }
0x13f5   : > { %v6959_v35 = vpop.f32.mrf.mxu0  ;;  %v7014_v48 = vpack.c.bf16 %v7005_v57, %v7005_v57 }
0x13f6   : > { %v7013_v50 = vpack.c.bf16 %v6959_v35, %v6959_v35  ;;  %v13063_v58 = vpop.f32.mrf.mxu1  ;;  %v13536_v35 = vld [vmem:[%s13940_s19 + $0x60] sm:$0xff]  }
0x13f7   : > { %v13057_v52 = vpop.f32.mrf.mxu0  ;;  %13086 = vmatmul.mubr.msk.bf16.vlgmr.msra.gmra.mxu1 %vm1706_vm3, %v7014_v48  ;;  %v13537_v48 = vld [vmem:[%s13940_s19 + $0x70] sm:$0xff]   ;;  %v13539_v58 = vld [vmem:[%s13950_s30 + $0x58] sm:$0xff]  }
0x13f8   : > { %13080 = vmatmul.mubr.msk.bf16.vlgmr.msra.gmra.mxu0 %vm1706_vm3, %v7013_v50  ;;  %v7008_v61 = vpop.f32.mrf.mxu1  ;;  %13101 = vmatprep.mubr.msk.bf16.mxu1 %vm13879_vm0, %v13878_v1  ;;  %v13538_v50 = vld [vmem:[%s13950_s30 + $0x48] sm:$0xff]   ;;  %v13540_v52 = vld [vmem:[%s13950_s30 + $0x40] sm:$0xff]  }
0x13f9   : > { %v6962_v62 = vpop.f32.mrf.mxu0  ;;  %13093 = vmatprep.mubr.msk.bf16.mxu0 %vm13879_vm0, %v13878_v1  ;;  %13090 = vmatpush3.bf16.msra.mxu0 %v13530_v16  ;;  %v13541_v61 = vld [vmem:[%s13950_s30 + $0x50] sm:$0xff]  }
0x13fa   : > { %v13064_v63 = vpop.f32.mrf.mxu1  ;;  %13098 = vmatpush3.bf16.msra.mxu1 %v13531_v12  ;;  %13091 = vmatprep.subr.bf16.mxu0 %v13878_v1  ;;  %v13542_v62 = vld [vmem:[%s13950_s30 + $0x68] sm:$0xff]  }
0x13fb   : > { %v13058_v11 = vpop.f32.mrf.mxu0  ;;  %13099 = vmatprep.subr.bf16.mxu1 %v13878_v1  ;;  %v13543_v63 = vld [vmem:[%s13950_s30 + $0x78] sm:$0xff]  }
0x13fc   : > { %v13544_v11 = vld [vmem:[%s13950_s30 + $0x60] sm:$0xff]  }
0x13fd   : > { %13092 = vmatpush3.bf16.msra.mxu0 %v13532_v13  ;;  %v11451_v13 = vld [vmem:[%s15539_s27 + $0x4] ss:$0 sm:$0xff] }
0x13fe   : > { %13100 = vmatpush3.bf16.msra.mxu1 %v13533_v46  ;;  %13105 = vmatprep.subr.bf16.mxu0 %v13878_v1  ;;  %v11452_v46 = vld [vmem:[%s15539_s27 + $0x5] ss:$0 sm:$0xff] }
0x13ff   : > { %13113 = vmatprep.subr.bf16.mxu1 %v13878_v1 }
0x14af   : > { %v7101_v59 = vpop.f32.mrf.mxu1 }
0x14b0   : > { %v7055_v60 = vpop.f32.mrf.mxu0  ;;  %v7200_v7 = vsel %vm1034_vm2, %v7101_v59, 0.0  ;;  %v13545_v59 = vld [vmem:[%s13950_s30 + $0x70] sm:$0xff]  }
0x14b1   : > { %v13075_v0 = vpop.f32.mrf.mxu1  ;;  %v7199_v6 = vsel %vm1034_vm2, %v7055_v60, 0.0  ;;  %v13546_v60 = vld [vmem:[%s15536_s7 + $0x48] sm:$0xff]  }
0x14b2   : > { %v13069_v2 = vpop.f32.mrf.mxu0  ;;  %v7201_v20 = vadd.f32 %v7200_v7, %v7199_v6  ;;  %v13547_v0 = vld [vmem:[%s15536_s7 + $0x58] sm:$0xff]   ;;  %v13552_v7 = vld [vmem:[%s15536_s7 + $0x60] sm:$0xff]  }
0x14b3   : > { %v7104_v3 = vpop.f32.mrf.mxu1  ;;  %v13548_v2 = vld [vmem:[%s15536_s7 + $0x40] sm:$0xff]   ;;  %v13551_v6 = vld [vmem:[%s15536_s7 + $0x78] sm:$0xff]  }
0x14b4   : > { %v7058_v5 = vpop.f32.mrf.mxu0  ;;  %v13549_v3 = vld [vmem:[%s15536_s7 + $0x50] sm:$0xff]  }
0x14b5   : > { %v13076_v10 = vpop.f32.mrf.mxu1  ;;  %v13550_v5 = vld [vmem:[%s15536_s7 + $0x68] sm:$0xff]  }
0x14b6   : > { %v13070_v17 = vpop.f32.mrf.mxu0  ;;  %v13553_v10 = vld [vmem:[%s15536_s7 + $0x70] sm:$0xff]  }
0x14b7   : > { %v7193_v19 = vpop.f32.mrf.mxu1 }
0x14b8   : > { %v7147_v34 = vpop.f32.mrf.mxu0  ;;  %v7204_v29 = vsel %vm1034_vm2, %v7193_v19, 0.0 }
0x14b9   : > { %v7202_v23 = vsel %vm1034_vm2, %v7147_v34, 0.0  ;;  %v13087_v24 = vpop.f32.mrf.mxu1 }
0x14ba   : > { %v7203_v26 = vadd.f32 %v7202_v23, %v7201_v20  ;;  %v13081_v27 = vpop.f32.mrf.mxu0 }
0x14bb   : > { %v7196_v30 = vpop.f32.mrf.mxu1 }
0x14bc   : > { %v7205_v31 = vadd.f32 %v7204_v29, %v7203_v26  ;;  %v7150_v32 = vpop.f32.mrf.mxu0 }
0x14bd   : > { %v13088_v8 = vpop.f32.mrf.mxu1 }
0x14be   : > { %v7210_v9 = vadd.f32 %v11384_v28, %v7205_v31  ;;  %v13082_v36 = vpop.f32.mrf.mxu0 }
0x14bf   : > { %v11467_v36 = vld [vmem:[%s15537_s6 + $0x4] ss:$0 sm:$0xff] }
0x14c0   : > { %v7213_v37 = vadd.f32 %v7210_v9, %v14780_v33 }
0x14c2   : > { %v7214_v25 = vsel %vm1034_vm2, %v7213_v37, 0.0 }
0x14c3   : > { %7215 = vadd.xlane.f32.xlu0 %v7214_v25 }
0x154c   : > { %v7216_v39 = vpop.xlane.xlu0 %7215 }
0x154d   : > { %v7217_v40 = vmul.f32 0.03125, %v7216_v39 }
0x154f   : > { %v7218_v41 = vsub.f32 %v7213_v37, %v7217_v40  ;;  %v11468_v37 = vld [vmem:[%s15537_s6 + $0x5] ss:$0 sm:$0xff] }
0x1551   : > { %v7219_v42 = vmul.f32 %v7218_v41, %v7218_v41 }
0x1553   : > { %v7220_v45 = vsel %vm1034_vm2, %v7219_v42, 0.0 }
0x1554   : > { %7221 = vadd.xlane.f32.xlu1 %v7220_v45 }
0x15dd   : > { %v7222_v33 = vpop.xlane.xlu1 %7221 }
0x15de   : > { %v7223_v43 = vmul.f32 0.03125, %v7222_v33 }
0x15e0   : > { %v7224_v49 = vadd.f32 1e-05, %v7223_v43 }
0x15e2   : > { %13748 = vrsqrt.f32 %v7224_v49 }
0x15ef   : > { %v13749_v44 = vpop.eup %13748 }
0x15f0   : > { %v7226_v53 = vmul.f32 %v13749_v44, %v7218_v41 }
0x15f2   : > { %v7231_v4 = vmul.f32 %v11385_v51, %v7226_v53 }
0x15f4   : > { %v14982_v55 = vadd.f32 %v11386_v54, %v7231_v4  ;;  %v11469_v54 = vld [vmem:[%s15537_s6 + $0x6] ss:$0 sm:$0xff]  ;;  %v11470_v4 = vld [vmem:[%s15537_s6 + $0x7] ss:$0 sm:$0xff]  ;;  %s13881_s6 = smov [#allocation5]  }
0x15f6   : > { %v7309_v57 = vpack.c.bf16 %v14982_v55, %v14982_v55 }
0x15f8   : > { %13094 = vmatmul.mubr.msk.bf16.vlgmr.msra.gmra.mxu0 %vm1034_vm2, %v7309_v57  ;;  %13102 = vmatmul.mubr.msk.bf16.vlgmr.msra.gmra.mxu1 %vm1034_vm2, %v7309_v57 }
0x15f9   : > { %13106 = vmatpush3.bf16.msra.mxu0 %v13534_v56  ;;  %13114 = vmatpush3.bf16.msra.mxu1 %v13535_v47 }
0x15fa   : > { %13107 = vmatprep.subr.bf16.mxu0 %v13878_v1  ;;  %13115 = vmatprep.subr.bf16.mxu1 %v13878_v1 }
0x15fb   : > { %13109 = vmatprep.mubr.msk.bf16.mxu0 %vm13879_vm0, %v13878_v1  ;;  %13117 = vmatprep.mubr.msk.bf16.mxu1 %vm13879_vm0, %v13878_v1 }
0x15fd   : > { %13108 = vmatpush3.bf16.msra.mxu0 %v13536_v35  ;;  %13116 = vmatpush3.bf16.msra.mxu1 %v13537_v48 }
0x15fe   : > { %13121 = vmatprep.subr.bf16.mxu0 %v13878_v1  ;;  %13129 = vmatprep.subr.bf16.mxu1 %v13878_v1 }
0x1600   : > { %13110 = vmatmul.mubr.msk.bf16.vlgmr.msra.gmra.mxu0 %vm1034_vm2, %v7309_v57  ;;  %13118 = vmatmul.mubr.msk.bf16.vlgmr.msra.gmra.mxu1 %vm1034_vm2, %v7309_v57 }
0x1601   : > { %13122 = vmatpush3.bf16.msra.mxu0 %v13538_v50  ;;  %13130 = vmatpush3.bf16.msra.mxu1 %v13539_v58 }
0x1602   : > { %13123 = vmatprep.subr.bf16.mxu0 %v13878_v1  ;;  %13131 = vmatprep.subr.bf16.mxu1 %v13878_v1 }
0x1603   : > { %13125 = vmatprep.mubr.msk.bf16.mxu0 %vm13879_vm0, %v13878_v1  ;;  %13133 = vmatprep.mubr.msk.bf16.mxu1 %vm13879_vm0, %v13878_v1 }
0x1605   : > { %13124 = vmatpush3.bf16.msra.mxu0 %v13540_v52  ;;  %13132 = vmatpush3.bf16.msra.mxu1 %v13541_v61 }
0x1606   : > { %13137 = vmatprep.subr.bf16.mxu0 %v13878_v1  ;;  %13145 = vmatprep.subr.bf16.mxu1 %v13878_v1 }
0x1608   : > { %13126 = vmatmul.mubr.msk.bf16.vlgmr.msra.gmra.mxu0 %vm1034_vm2, %v14786_v38  ;;  %13134 = vmatmul.mubr.msk.bf16.vlgmr.msra.gmra.mxu1 %vm1034_vm2, %v14786_v38 }
0x1609   : > { %13138 = vmatpush3.bf16.msra.mxu0 %v13542_v62  ;;  %13146 = vmatpush3.bf16.msra.mxu1 %v13543_v63 }
0x160a   : > { %13139 = vmatprep.subr.bf16.mxu0 %v13878_v1  ;;  %13147 = vmatprep.subr.bf16.mxu1 %v13878_v1 }
0x160b   : > { %13141 = vmatprep.mubr.msk.bf16.mxu0 %vm13879_vm0, %v13878_v1  ;;  %13149 = vmatprep.mubr.msk.bf16.mxu1 %vm13879_vm0, %v13878_v1 }
0x160d   : > { %13140 = vmatpush3.bf16.msra.mxu0 %v13544_v11  ;;  %13148 = vmatpush3.bf16.msra.mxu1 %v13545_v59  ;;  %v11453_v59 = vld [vmem:[%s15539_s27 + $0x6] ss:$0 sm:$0xff] }
0x160e   : > { %13153 = vmatprep.subr.bf16.mxu0 %v13878_v1  ;;  %13161 = vmatprep.subr.bf16.mxu1 %v13878_v1 }
0x1610   : > { %13142 = vmatmul.mubr.msk.bf16.vlgmr.msra.gmra.mxu0 %vm1034_vm2, %v14786_v38  ;;  %13150 = vmatmul.mubr.msk.bf16.vlgmr.msra.gmra.mxu1 %vm1034_vm2, %v14786_v38 }
0x1611   : > { %13154 = vmatpush3.bf16.msra.mxu0 %v13546_v60  ;;  %13162 = vmatpush3.bf16.msra.mxu1 %v13547_v0  ;;  %v11454_v60 = vld [vmem:[%s15539_s27 + $0x7] ss:$0 sm:$0xff] }
0x1612   : > { %13155 = vmatprep.subr.bf16.mxu0 %v13878_v1  ;;  %13163 = vmatprep.subr.bf16.mxu1 %v13878_v1 }
0x1613   : > { %13157 = vmatprep.mubr.msk.bf16.mxu0 %vm13879_vm0, %v13878_v1  ;;  %13165 = vmatprep.mubr.msk.bf16.mxu1 %vm13879_vm0, %v13878_v1 }
0x1615   : > { %13156 = vmatpush3.bf16.msra.mxu0 %v13548_v2  ;;  %13164 = vmatpush3.bf16.msra.mxu1 %v13549_v3 }
0x1616   : > { %13169 = vmatprep.subr.bf16.mxu0 %v13878_v1  ;;  %13177 = vmatprep.subr.bf16.mxu1 %v13878_v1 }
0x1618   : > { %13158 = vmatmul.mubr.msk.bf16.vlgmr.msra.gmra.mxu0 %vm1034_vm2, %v14786_v38  ;;  %13166 = vmatmul.mubr.msk.bf16.vlgmr.msra.gmra.mxu1 %vm1034_vm2, %v14786_v38 }
0x1619   : > { %13170 = vmatpush3.bf16.msra.mxu0 %v13550_v5  ;;  %13178 = vmatpush3.bf16.msra.mxu1 %v13551_v6 }
0x161a   : > { %13171 = vmatprep.subr.bf16.mxu0 %v13878_v1  ;;  %13179 = vmatprep.subr.bf16.mxu1 %v13878_v1 }
0x161b   : > { %13173 = vmatprep.mubr.msk.bf16.mxu0 %vm13879_vm0, %v13878_v1  ;;  %13181 = vmatprep.mubr.msk.bf16.mxu1 %vm13879_vm0, %v13878_v1 }
0x161d   : > { %13172 = vmatpush3.bf16.msra.mxu0 %v13552_v7  ;;  %13180 = vmatpush3.bf16.msra.mxu1 %v13553_v10  ;;  %v11483_v10 = vld [vmem:[%s15540_s11 + $0x4] ss:$0 sm:$0xff] }
0x161e   : > { %13185 = vmatprep.subr.bf16.mxu0 %v13878_v1  ;;  %13191 = vmatprep.subr.bf16.mxu1 %v13878_v1 }
0x1620   : > { %13174 = vmatmul.mubr.msk.bf16.vlgmr.msra.gmra.mxu0 %vm1034_vm2, %v14786_v38  ;;  %13182 = vmatmul.mubr.msk.bf16.vlgmr.msra.gmra.mxu1 %vm1034_vm2, %v14786_v38 }
0x1621   : > { %13187 = vmatprep.mubr.msk.bf16.mxu0 %vm13879_vm0, %v13878_v1  ;;  %13193 = vmatprep.mubr.msk.bf16.mxu1 %vm13879_vm0, %v13878_v1 }
0x16b8   : > { %v7383_v17 = vpop.f32.mrf.mxu0  ;;  %v7435_v19 = vpop.f32.mrf.mxu1 }
0x16b9   : > { %v7384_v56 = vadd.f32 %v11451_v13, %v7383_v17  ;;  %v7436_v47 = vadd.f32 %v11452_v46, %v7435_v19  ;;  %v11484_v17 = vld [vmem:[%s15540_s11 + $0x5] ss:$0 sm:$0xff] }
0x16ba   : > { %v13095_v20 = vpop.f32.mrf.mxu0  ;;  %v13103_v34 = vpop.f32.mrf.mxu1 }
0x16bb   : > { %v8009_v61 = vpack.c.bf16 %v7384_v56, %v7384_v56  ;;  %v8010_v62 = vpack.c.bf16 %v7436_v47, %v7436_v47 }
0x16bc   : > { %v7386_v23 = vpop.f32.mrf.mxu0  ;;  %v7438_v24 = vpop.f32.mrf.mxu1 }
0x16be   : > { %v13096_v26 = vpop.f32.mrf.mxu0  ;;  %v13104_v27 = vpop.f32.mrf.mxu1 }
0x16c0   : > { %v7487_v28 = vpop.f32.mrf.mxu0  ;;  %v7539_v29 = vpop.f32.mrf.mxu1 }
0x16c1   : > { %v7488_v19 = vadd.f32 %v11453_v59, %v7487_v28  ;;  %v7540_v20 = vadd.f32 %v11454_v60, %v7539_v29 }
0x16c2   : > { %v13111_v30 = vpop.f32.mrf.mxu0  ;;  %v13119_v38 = vpop.f32.mrf.mxu1 }
0x16c3   : > { %v8011_v38 = vpack.c.bf16 %v7488_v19, %v7488_v19 }
0x16c4   : > { %v7490_v31 = vpop.f32.mrf.mxu0  ;;  %v7542_v32 = vpop.f32.mrf.mxu1 }
0x16c5   : > { %v8012_v31 = vpack.c.bf16 %v7540_v20, %v7540_v20 }
0x16c6   : > { %v13112_v8 = vpop.f32.mrf.mxu0  ;;  %v13120_v9 = vpop.f32.mrf.mxu1 }
0x16c8   : > { %v7615_v25 = vpop.f32.mrf.mxu0  ;;  %v7667_v39 = vpop.f32.mrf.mxu1 }
0x16c9   : > { %v7616_v40 = vadd.f32 %v11467_v36, %v7615_v25  ;;  %v7668_v41 = vadd.f32 %v11468_v37, %v7667_v39 }
0x16ca   : > { %v13127_v42 = vpop.f32.mrf.mxu0  ;;  %v13135_v45 = vpop.f32.mrf.mxu1 }
0x16cb   : > { %v8013_v16 = vpack.c.bf16 %v7616_v40, %v7616_v40  ;;  %v8014_v12 = vpack.c.bf16 %v7668_v41, %v7668_v41 }
0x16cc   : > { %v7618_v33 = vpop.f32.mrf.mxu0  ;;  %v7670_v43 = vpop.f32.mrf.mxu1 }
0x16cd   : > { %v8021_v49 = vsel %vm1706_vm3, %v8013_v16, 0  ;;  %v8067_v44 = vsel %vm1706_vm3, %v8014_v12, 0 }
0x16ce   : > { %v13128_v51 = vpop.f32.mrf.mxu0  ;;  %v13136_v53 = vpop.f32.mrf.mxu1  ;;  %13186 = vmatpush3.bf16.xpose.msra.mxu0 %v8021_v49  ;;  %13192 = vmatpush3.bf16.xpose.msra.mxu1 %v8067_v44 }
0x16cf   : > { %13197 = vmatprep.subr.bf16.mxu0 %v13878_v1  ;;  %13203 = vmatprep.subr.bf16.mxu1 %v13878_v1 }
0x16d0   : > { %v7719_v57 = vpop.f32.mrf.mxu0  ;;  %v7771_v35 = vpop.f32.mrf.mxu1 }
0x16d1   : > { %v7720_v48 = vadd.f32 %v11469_v54, %v7719_v57  ;;  %v7772_v50 = vadd.f32 %v11470_v4, %v7771_v35 }
0x16d2   : > { %v13143_v58 = vpop.f32.mrf.mxu0  ;;  %v13151_v52 = vpop.f32.mrf.mxu1 }
0x16d3   : > { %v8015_v63 = vpack.c.bf16 %v7720_v48, %v7720_v48  ;;  %v8016_v11 = vpack.c.bf16 %v7772_v50, %v7772_v50 }
0x16d4   : > { %v7722_v0 = vpop.f32.mrf.mxu0  ;;  %v7774_v2 = vpop.f32.mrf.mxu1 }
0x16d5   : > { %v8113_v3 = vsel %vm1706_vm3, %v8015_v63, 0  ;;  %v8159_v5 = vsel %vm1706_vm3, %v8016_v11, 0  ;;  %13188 = vmatmul.mubr.msk.bf16.vlgmr.msra.gmra.mxu0 %vm1706_vm3, %v8009_v61  ;;  %13194 = vmatmul.mubr.msk.bf16.vlgmr.msra.gmra.mxu1 %vm1706_vm3, %v8010_v62 }
0x16d6   : > { %v13144_v6 = vpop.f32.mrf.mxu0  ;;  %v13152_v7 = vpop.f32.mrf.mxu1  ;;  %13198 = vmatpush3.bf16.xpose.msra.mxu0 %v8113_v3  ;;  %13204 = vmatpush3.bf16.xpose.msra.mxu1 %v8159_v5 }
0x16d7   : > { %13199 = vmatprep.mubr.msk.bf16.mxu0 %vm13879_vm0, %v13878_v1  ;;  %13205 = vmatprep.mubr.msk.bf16.mxu1 %vm13879_vm0, %v13878_v1 }
0x16d8   : > { %v7847_v34 = vpop.f32.mrf.mxu0  ;;  %v7899_v23 = vpop.f32.mrf.mxu1  ;;  %13209 = vmatprep.subr.bf16.mxu0 %v13878_v1  ;;  %13215 = vmatprep.subr.bf16.mxu1 %v13878_v1 }
0x16d9   : > { %v7848_v24 = vadd.f32 %v11483_v10, %v7847_v34  ;;  %v7900_v26 = vadd.f32 %v11484_v17, %v7899_v23 }
0x16da   : > { %v13159_v27 = vpop.f32.mrf.mxu0  ;;  %v13167_v30 = vpop.f32.mrf.mxu1 }
0x16db   : > { %v8253_v28 = vpack.c.bf16 %v7848_v24, %v7848_v24  ;;  %v8254_v29 = vpack.c.bf16 %v7900_v26, %v7900_v26 }
0x16dc   : > { %v7850_v32 = vpop.f32.mrf.mxu0  ;;  %v7902_v8 = vpop.f32.mrf.mxu1 }
0x16dd   : > { %v8261_v9 = vsel %vm1950_vm4, %v8253_v28, 0  ;;  %v8307_v36 = vsel %vm1950_vm4, %v8254_v29, 0  ;;  %13200 = vmatmul.mubr.msk.bf16.vlgmr.msra.gmra.mxu0 %vm1706_vm3, %v8011_v38  ;;  %13206 = vmatmul.mubr.msk.bf16.vlgmr.msra.gmra.mxu1 %vm1706_vm3, %v8012_v31 }
0x16de   : > { %v13160_v37 = vpop.f32.mrf.mxu0  ;;  %v13168_v25 = vpop.f32.mrf.mxu1  ;;  %13210 = vmatpush3.bf16.msra.mxu0 %v8261_v9  ;;  %13216 = vmatpush3.bf16.msra.mxu1 %v8307_v36  ;;  %v11486_v36 = vld [vmem:[%s15540_s11 + $0x7] ss:$0 sm:$0xff] }
0x16df   : > { %13211 = vmatprep.mubr.msk.bf16.mxu0 %vm13879_vm0, %v13878_v1  ;;  %13217 = vmatprep.mubr.msk.bf16.mxu1 %vm13879_vm0, %v13878_v1  ;;  %v11485_v25 = vld [vmem:[%s15540_s11 + $0x6] ss:$0 sm:$0xff] }
0x16e0   : > { %v15102_v39 = vpop.f32.mrf.mxu0  ;;  %v15104_v40 = vpop.f32.mrf.mxu1  ;;  %13221 = vmatprep.subr.bf16.mxu0 %v13878_v1  ;;  %13227 = vmatprep.subr.bf16.mxu1 %v13878_v1 }
0x16e2   : > { %v13175_v41 = vpop.f32.mrf.mxu0  ;;  %v13183_v42 = vpop.f32.mrf.mxu1 }
0x16e3   : > { %v8004_v42 = vadd.f32 %v11486_v36, %v15104_v40  ;;  %v11448_v40 = vld [vmem:[%s15541_s15 + $0x14] sm:$0xf] }
0x16e4   : > { %v7954_v45 = vpop.f32.mrf.mxu0  ;;  %v8006_v16 = vpop.f32.mrf.mxu1 }
0x16e5   : > { %v7952_v45 = vadd.f32 %v11485_v25, %v15102_v39 }
0x16e6   : > { %v13176_v12 = vpop.f32.mrf.mxu0  ;;  %v13184_v13 = vpop.f32.mrf.mxu1 }
0x16e7   : > { %v8256_v13 = vpack.c.bf16 %v8004_v42, %v8004_v42 }
0x1795   : > { %v8057_v46 = vpop.f32.mrf.mxu0  ;;  %v8103_v33 = vpop.f32.mrf.mxu1 }
0x1796   : > { %v8201_v43 = vmul.f32 0.35355338, %v8057_v46  ;;  %v8202_v49 = vmul.f32 0.35355338, %v8103_v33  ;;  %v8255_v33 = vpack.c.bf16 %v7952_v45, %v7952_v45 }
0x1797   : > { %v13189_v44 = vpop.f32.mrf.mxu0  ;;  %v13195_v51 = vpop.f32.mrf.mxu1 }
0x1798   : > { %v8208_v53 = vsel %vm1706_vm3, %v8202_v49, -inf  ;;  %v8205_v54 = vsel %vm1706_vm3, %v8201_v43, -inf  ;;  %v8399_v51 = vsel %vm1950_vm4, %v8256_v13, 0 }
0x1799   : > { %8209 = vmax.xlane.f32.xlu1 %v8208_v53  ;;  %v8106_v4 = vpop.f32.mrf.mxu1  ;;  %8206 = vmax.xlane.f32.xlu0 %v8205_v54  ;;  %v8060_v56 = vpop.f32.mrf.mxu0  ;;  %v8353_v53 = vsel %vm1950_vm4, %v8255_v33, 0 }
0x179a   : > { %v11447_v56 = vld [vmem:[%s15541_s15 + $0x10] sm:$0xf] }
0x179b   : > { %v13190_v47 = vpop.f32.mrf.mxu0  ;;  %v13196_v57 = vpop.f32.mrf.mxu1 }
0x179d   : > { %v8149_v35 = vpop.f32.mrf.mxu0  ;;  %v8195_v48 = vpop.f32.mrf.mxu1 }
0x179e   : > { %v8203_v50 = vmul.f32 0.35355338, %v8149_v35  ;;  %v8204_v58 = vmul.f32 0.35355338, %v8195_v48  ;;  %v8495_v35 = vsel %vm1950_vm4, %v11448_v40, 0 }
0x179f   : > { %v13201_v52 = vpop.f32.mrf.mxu0  ;;  %v13207_v61 = vpop.f32.mrf.mxu1 }
0x17a0   : > { %v8214_v62 = vsel %vm1706_vm3, %v8204_v58, -inf  ;;  %v8211_v63 = vsel %vm1706_vm3, %v8203_v50, -inf  ;;  %v11449_v52 = vld [vmem:[%s15541_s15 + $0x18] sm:$0xf] }
0x17a1   : > { %8215 = vmax.xlane.f32.xlu1 %v8214_v62  ;;  %v8198_v11 = vpop.f32.mrf.mxu1  ;;  %8212 = vmax.xlane.f32.xlu0 %v8211_v63  ;;  %v8152_v59 = vpop.f32.mrf.mxu0 }
0x17a3   : > { %v13202_v60 = vpop.f32.mrf.mxu0  ;;  %v13208_v0 = vpop.f32.mrf.mxu1 }
0x17a4   : > { %v8541_v0 = vsel %vm1950_vm4, %v11449_v52, 0 }
0x1822   : > { %v8210_v2 = vpop.xlane.xlu1 %8209  ;;  %v8207_v3 = vpop.xlane.xlu0 %8206 }
0x1823   : > { %v8218_v5 = vsub.f32 %v8202_v49, %v8210_v2  ;;  %v8217_v6 = vsub.f32 %v8201_v43, %v8207_v3 }
0x1825   : > { %v8223_v7 = vmul.f32 1.442695, %v8218_v5  ;;  %v8221_v10 = vmul.f32 1.442695, %v8217_v6 }
0x1827   : > { %13750 = vpow2.f32 %v8223_v7 }
0x1828   : > { %13752 = vpow2.f32 %v8221_v10 }
0x182a   : > { %v8216_v17 = vpop.xlane.xlu1 %8215  ;;  %v8213_v19 = vpop.xlane.xlu0 %8212 }
0x182b   : > { %v8220_v20 = vsub.f32 %v8204_v58, %v8216_v17  ;;  %v8219_v34 = vsub.f32 %v8203_v50, %v8213_v19  ;;  %v8449_v50 = vsel %vm1950_vm4, %v11447_v56, 0  ;;  %v11450_v58 = vld [vmem:[%s15541_s15 + $0x1c] sm:$0xf] }
0x182c   : > { %v8587_v11 = vsel %vm1950_vm4, %v11450_v58, 0  ;;  %v11519_v58 = vld [vmem:[%s15543_s28 + $0x188] sm:$0xff] }
0x182d   : > { %v8227_v23 = vmul.f32 1.442695, %v8220_v20  ;;  %v8225_v24 = vmul.f32 1.442695, %v8219_v34 }
0x182f   : > { %13754 = vpow2.f32 %v8227_v23 }
0x1830   : > { %13756 = vpow2.f32 %v8225_v24 }
0x1834   : > { %v13751_v26 = vpop.eup %13750 }
0x1835   : > { %v13753_v27 = vpop.eup %13752  ;;  %v8232_v30 = vsel %vm1706_vm3, %v13751_v26, 0.0 }
0x1836   : > { %8233 = vadd.xlane.f32.xlu1 %v8232_v30  ;;  %v8229_v38 = vsel %vm1706_vm3, %v13753_v27, 0.0 }
0x1837   : > { %8230 = vadd.xlane.f32.xlu0 %v8229_v38 }
0x183c   : > { %v13755_v31 = vpop.eup %13754 }
0x183d   : > { %v13757_v28 = vpop.eup %13756  ;;  %v8238_v29 = vsel %vm1706_vm3, %v13755_v31, 0.0 }
0x183e   : > { %8239 = vadd.xlane.f32.xlu1 %v8238_v29  ;;  %v8235_v32 = vsel %vm1706_vm3, %v13757_v28, 0.0 }
0x183f   : > { %8236 = vadd.xlane.f32.xlu0 %v8235_v32 }
0x18bf   : > { %v8234_v8 = vpop.xlane.xlu1 %8233 }
0x18c0   : > { %13758 = vrcp.f32 %v8234_v8  ;;  %v8231_v9 = vpop.xlane.xlu0 %8230 }
0x18c1   : > { %13760 = vrcp.f32 %v8231_v9 }
0x18c7   : > { %v8240_v37 = vpop.xlane.xlu1 %8239 }
0x18c8   : > { %13762 = vrcp.f32 %v8240_v37  ;;  %v8237_v41 = vpop.xlane.xlu0 %8236 }
0x18c9   : > { %13764 = vrcp.f32 %v8237_v41 }
0x18cd   : > { %v13759_v16 = vpop.eup %13758 }
0x18ce   : > { %v13761_v12 = vpop.eup %13760  ;;  %v8246_v46 = vmul.f32 %v13759_v16, %v13751_v26 }
0x18cf   : > { %v8245_v43 = vmul.f32 %v13761_v12, %v13753_v27 }
0x18d0   : > { %v8250_v49 = vpack.c.bf16 %v8246_v46, %v8246_v46  ;;  %v11511_v46 = vld [vmem:[%s15542_s5 + $0x1] ss:$0 sm:$0xff] }
0x18d1   : > { %v8249_v44 = vpack.c.bf16 %v8245_v43, %v8245_v43 }
0x18d2   : > { %13218 = vmatmul.mubr.msk.bf16.vlgmr.msra.gmra.mxu1 %vm1706_vm3, %v8250_v49 }
0x18d3   : > { %13212 = vmatmul.mubr.msk.bf16.vlgmr.msra.gmra.mxu0 %vm1706_vm3, %v8249_v44  ;;  %13228 = vmatpush3.bf16.msra.mxu1 %v8399_v51 }
0x18d4   : > { %13222 = vmatpush3.bf16.msra.mxu0 %v8353_v53  ;;  %13223 = vmatprep.mubr.msk.bf16.mxu0 %vm13879_vm0, %v13878_v1 }
0x18d5   : > { %v13763_v39 = vpop.eup %13762  ;;  %13229 = vmatprep.mubr.msk.bf16.mxu1 %vm13879_vm0, %v13878_v1  ;;  %13233 = vmatprep.subr.bf16.mxu0 %v13878_v1 }
0x18d6   : > { %v13765_v54 = vpop.eup %13764  ;;  %v8248_v4 = vmul.f32 %v13763_v39, %v13755_v31  ;;  %13239 = vmatprep.subr.bf16.mxu1 %v13878_v1 }
0x18d7   : > { %v8247_v47 = vmul.f32 %v13765_v54, %v13757_v28 }
0x18d8   : > { %v8252_v57 = vpack.c.bf16 %v8248_v4, %v8248_v4 }
0x18d9   : > { %v8251_v48 = vpack.c.bf16 %v8247_v47, %v8247_v47 }
0x18da   : > { %13230 = vmatmul.mubr.msk.bf16.vlgmr.msra.gmra.mxu1 %vm1706_vm3, %v8252_v57 }
0x18db   : > { %13224 = vmatmul.mubr.msk.bf16.vlgmr.msra.gmra.mxu0 %vm1706_vm3, %v8251_v48  ;;  %13240 = vmatpush3.bf16.msra.mxu1 %v8495_v35  ;;  %v11518_v48 = vld [vmem:[%s15543_s28 + $0x180] sm:$0xff] }
0x18dc   : > { %13234 = vmatpush3.bf16.msra.mxu0 %v8449_v50  ;;  %13235 = vmatprep.mubr.msk.bf16.mxu0 %vm13879_vm0, %v13878_v1  ;;  %v11520_v50 = vld [vmem:[%s15543_s28 + $0x1c0] sm:$0xff] }
0x18dd   : > { %13241 = vmatprep.mubr.msk.bf16.mxu1 %vm13879_vm0, %v13878_v1  ;;  %13245 = vmatprep.subr.bf16.mxu0 %v13878_v1  ;;  %v11528_v52 = vcombine.high %v11518_v48, %v11520_v50 }
0x18de   : > { %13251 = vmatprep.subr.bf16.mxu1 %v13878_v1 }
0x1992   : > { %v8343_v61 = vpop.f32.mrf.mxu1 }
0x1993   : > { %v8297_v62 = vpop.f32.mrf.mxu0  ;;  %v8442_v63 = vpack.c.bf16 %v8343_v61, %v8343_v61  ;;  %v11521_v61 = vld [vmem:[%s15543_s28 + $0x1c8] sm:$0xff] }
0x1994   : > { %v8441_v59 = vpack.c.bf16 %v8297_v62, %v8297_v62  ;;  %v13219_v60 = vpop.f32.mrf.mxu1  ;;  %v11529_v62 = vcombine.low %v11519_v58, %v11521_v61 }
0x1995   : > { %v13213_v2 = vpop.f32.mrf.mxu0  ;;  %13242 = vmatmul.mubr.msk.bf16.vlgmr.msra.gmra.mxu1 %vm1706_vm3, %v8442_v63  ;;  %v11530_v63 = vcombine.high %v11519_v58, %v11521_v61  ;;  %v11515_v60 = vld [vmem:[%s15543_s28 + $0x108] sm:$0xff]  ;;  %v13573_v58 = vld [vmem:[%s15546_s2 + $0x598] sm:$0xff]   ;;  %v13575_v61 = vld [vmem:[%s15546_s2 + $0x5d0] sm:$0xff]  }
0x1996   : > { %13236 = vmatmul.mubr.msk.bf16.vlgmr.msra.gmra.mxu0 %vm1706_vm3, %v8441_v59  ;;  %v8346_v3 = vpop.f32.mrf.mxu1  ;;  %13252 = vmatpush3.bf16.msra.mxu1 %v8587_v11  ;;  %v11514_v11 = vld [vmem:[%s15543_s28 + $0x100] sm:$0xff]  ;;  %v11517_v2 = vld [vmem:[%s15543_s28 + $0x148] sm:$0xff] }
0x1997   : > { %v8300_v5 = vpop.f32.mrf.mxu0  ;;  %13246 = vmatpush3.bf16.msra.mxu0 %v8541_v0  ;;  %13247 = vmatprep.mubr.msk.bf16.mxu0 %vm13879_vm0, %v13878_v1  ;;  %v11516_v59 = vld [vmem:[%s15543_s28 + $0x140] sm:$0xff] }
0x1998   : > { %v13220_v6 = vpop.f32.mrf.mxu1  ;;  %13253 = vmatprep.mubr.msk.bf16.mxu1 %vm13879_vm0, %v13878_v1  ;;  %8755 = vmatprep.subr.bf16.mxu0 %v11528_v52  ;;  %v11524_v0 = vcombine.high %v11514_v11, %v11516_v59  ;;  %v11523_v3 = vcombine.low %v11514_v11, %v11516_v59  ;;  %v11525_v5 = vcombine.low %v11515_v60, %v11517_v2  ;;  %v13574_v52 = vld [vmem:[%s15546_s2 + $0x550] sm:$0xff]   ;;  %v13579_v11 = vld [vmem:[%s15546_s2 + $0x5c8] sm:$0xff]  }
0x1999   : > { %v13214_v7 = vpop.f32.mrf.mxu0  ;;  %8796 = vmatprep.subr.bf16.mxu1 %v11530_v63  ;;  %v11526_v6 = vcombine.high %v11515_v60, %v11517_v2  ;;  %v13578_v63 = vld [vmem:[%s15546_s2 + $0x548] sm:$0xff]   ;;  %v13583_v2 = vld [vmem:[%s15546_s2 + $0x5c0] sm:$0xff]  }
0x199a   : > { %v8435_v10 = vpop.f32.mrf.mxu1  ;;  %v11601_v7 = vld [vmem:[%s15543_s28 + $0x190] sm:$0xff]  ;;  %v13580_v59 = vld [vmem:[%s15546_s2 + $0x508] sm:$0xff]  }
0x199b   : > { %v8389_v17 = vpop.f32.mrf.mxu0  ;;  %v8444_v19 = vpack.c.bf16 %v8435_v10, %v8435_v10  ;;  %v11603_v10 = vld [vmem:[%s15543_s28 + $0x1d0] sm:$0xff]  ;;  %v13581_v60 = vld [vmem:[%s15546_s2 + $0x588] sm:$0xff]  }
0x199c   : > { %v8443_v20 = vpack.c.bf16 %v8389_v17, %v8389_v17  ;;  %v13231_v34 = vpop.f32.mrf.mxu1  ;;  %v11602_v17 = vld [vmem:[%s15543_s28 + $0x198] sm:$0xff] }
0x199d   : > { %v13225_v23 = vpop.f32.mrf.mxu0  ;;  %13254 = vmatmul.mubr.msk.bf16.vlgmr.msra.gmra.mxu1 %vm1706_vm3, %v8444_v19  ;;  %v11611_v19 = vcombine.high %v11601_v7, %v11603_v10  ;;  %v11610_v34 = vcombine.low %v11601_v7, %v11603_v10  ;;  %v13587_v7 = vld [vmem:[%s15546_s2 + $0x4f8] sm:$0xff]  }
0x199e   : > { %13248 = vmatmul.mubr.msk.bf16.vlgmr.msra.gmra.mxu0 %vm1706_vm3, %v8443_v20  ;;  %v8438_v24 = vpop.f32.mrf.mxu1  ;;  %8816 = vmatprep.mubr.bf16.mxu1 %v13880_v15  ;;  %v11604_v20 = vld [vmem:[%s15543_s28 + $0x1d8] sm:$0xff] }
0x199f   : > { %v8392_v26 = vpop.f32.mrf.mxu0  ;;  %8775 = vmatprep.mubr.bf16.mxu0 %v13880_v15  ;;  %8797 = vmatpush1.bf16.msra.mxu1 %v11529_v62  ;;  %v11612_v23 = vcombine.low %v11602_v17, %v11604_v20  ;;  %v11613_v24 = vcombine.high %v11602_v17, %v11604_v20  ;;  %v13577_v62 = vld [vmem:[%s15546_s2 + $0x590] sm:$0xff]  }
0x19a0   : > { %v13232_v27 = vpop.f32.mrf.mxu1  ;;  %8798 = vmatprep.subr.bf16.mxu1 %v11526_v6  ;;  %v13586_v6 = vld [vmem:[%s15546_s2 + $0x478] sm:$0xff]  }
0x19a1   : > { %v13226_v30 = vpop.f32.mrf.mxu0 }
0x19a3   : > { %8799 = vmatpush1.bf16.msra.mxu1 %v11525_v5  ;;  %v13585_v5 = vld [vmem:[%s15546_s2 + $0x580] sm:$0xff]  }
0x19a4   : > { %9022 = vmatprep.subr.bf16.mxu1 %v11613_v24 }
0x1a55   : > { %v8531_v1 = vpop.f32.mrf.mxu1 }
0x1a56   : > { %v8485_v38 = vpop.f32.mrf.mxu0  ;;  %v8630_v9 = vsel %vm1034_vm2, %v8531_v1, 0.0 }
0x1a57   : > { %v13243_v31 = vpop.f32.mrf.mxu1  ;;  %v8629_v8 = vsel %vm1034_vm2, %v8485_v38, 0.0  ;;  %v11512_v38 = vld [vmem:[%s15544_s22 + $0x1] ss:$0 sm:$0xff] }
0x1a58   : > { %v13237_v28 = vpop.f32.mrf.mxu0  ;;  %v8631_v41 = vadd.f32 %v8630_v9, %v8629_v8  ;;  %v11599_v8 = vld [vmem:[%s15543_s28 + $0x150] sm:$0xff]  ;;  %v11598_v9 = vld [vmem:[%s15543_s28 + $0x118] sm:$0xff] }
0x1a59   : > { %v8534_v29 = vpop.f32.mrf.mxu1  ;;  %v11513_v28 = vld [vmem:[%s15545_s10 + $0x1] ss:$0 sm:$0xff] }
0x1a5a   : > { %v8488_v32 = vpop.f32.mrf.mxu0 }
0x1a5b   : > { %v13244_v36 = vpop.f32.mrf.mxu1  ;;  %v11597_v32 = vld [vmem:[%s15543_s28 + $0x110] sm:$0xff] }
0x1a5c   : > { %v13238_v37 = vpop.f32.mrf.mxu0  ;;  %v11600_v36 = vld [vmem:[%s15543_s28 + $0x158] sm:$0xff] }
0x1a5d   : > { %v8623_v25 = vpop.f32.mrf.mxu1 }
0x1a5e   : > { %v8577_v42 = vpop.f32.mrf.mxu0  ;;  %v8634_v33 = vsel %vm1034_vm2, %v8623_v25, 0.0 }
0x1a5f   : > { %v8632_v45 = vsel %vm1034_vm2, %v8577_v42, 0.0  ;;  %v13255_v16 = vpop.f32.mrf.mxu1  ;;  %v11609_v42 = vcombine.high %v11598_v9, %v11600_v36 }
0x1a60   : > { %v8633_v12 = vadd.f32 %v8632_v45, %v8631_v41  ;;  %v13249_v13 = vpop.f32.mrf.mxu0  ;;  %v11607_v41 = vcombine.high %v11597_v32, %v11599_v8  ;;  %v11606_v45 = vcombine.low %v11597_v32, %v11599_v8  ;;  %v11608_v16 = vcombine.low %v11598_v9, %v11600_v36 }
0x1a61   : > { %v8626_v43 = vpop.f32.mrf.mxu1  ;;  %v13555_v13 = vld [vmem:[%s15546_s2 + $0x5f8] sm:$0xff]  }
0x1a62   : > { %v8635_v49 = vadd.f32 %v8634_v33, %v8633_v12  ;;  %v8580_v44 = vpop.f32.mrf.mxu0  ;;  %v13554_v12 = vld [vmem:[%s15546_s2 + $0x578] sm:$0xff]   ;;  %v13558_v43 = vld [vmem:[%s15546_s2 + $0x570] sm:$0xff]  }
0x1a63   : > { %v13256_v51 = vpop.f32.mrf.mxu1  ;;  %v13557_v33 = vld [vmem:[%s15546_s2 + $0x5b8] sm:$0xff]   ;;  %v13560_v44 = vld [vmem:[%s15546_s2 + $0x530] sm:$0xff]  }
0x1a64   : > { %v8640_v53 = vadd.f32 %v11511_v46, %v8635_v49  ;;  %v13250_v39 = vpop.f32.mrf.mxu0  ;;  %v13556_v46 = vld [vmem:[%s15546_s2 + $0x538] sm:$0xff]   ;;  %v13559_v49 = vld [vmem:[%s15546_s2 + $0x5f0] sm:$0xff]  }
0x1a65   : > { %v13561_v51 = vld [vmem:[%s15546_s2 + $0x5b0] sm:$0xff]   ;;  %v13563_v39 = vld [vmem:[%s15546_s2 + $0x5e8] sm:$0xff]  }
0x1a66   : > { %v8643_v40 = vadd.f32 %v8640_v53, %v14982_v55  ;;  %v11527_v55 = vcombine.low %v11518_v48, %v11520_v50  ;;  %v13562_v53 = vld [vmem:[%s15546_s2 + $0x568] sm:$0xff]   ;;  %v13571_v48 = vld [vmem:[%s15546_s2 + $0x5d8] sm:$0xff]  }
0x1a67   : > { %v13572_v50 = vld [vmem:[%s15546_s2 + $0x518] sm:$0xff]  }
0x1a68   : > { %v8644_v54 = vsel %vm1034_vm2, %v8643_v40, 0.0  ;;  %8756 = vmatpush1.bf16.msra.mxu0 %v11527_v55  ;;  %v13576_v55 = vld [vmem:[%s15546_s2 + $0x510] sm:$0xff]  }
0x1a69   : > { %8645 = vadd.xlane.f32.xlu0 %v8644_v54  ;;  %8757 = vmatprep.subr.bf16.mxu0 %v11524_v0  ;;  %v13565_v54 = vld [vmem:[%s15546_s2 + $0x5a8] sm:$0xff]   ;;  %v13582_v0 = vld [vmem:[%s15546_s2 + $0x540] sm:$0xff]  }
0x1a6c   : > { %8758 = vmatpush1.bf16.msra.mxu0 %v11523_v3  ;;  %v13584_v3 = vld [vmem:[%s15546_s2 + $0x500] sm:$0xff]  }
0x1a6d   : > { %8981 = vmatprep.subr.bf16.mxu0 %v11611_v19 }
0x1af2   : > { %v8646_v4 = vpop.xlane.xlu0 %8645 }
0x1af3   : > { %v8647_v56 = vmul.f32 0.03125, %v8646_v4  ;;  %v13566_v4 = vld [vmem:[%s15546_s2 + $0x560] sm:$0xff]  }
0x1af5   : > { %v8648_v47 = vsub.f32 %v8643_v40, %v8647_v56  ;;  %v13564_v40 = vld [vmem:[%s15546_s2 + $0x528] sm:$0xff]   ;;  %v13567_v56 = vld [vmem:[%s15546_s2 + $0x5e0] sm:$0xff]  }
0x1af7   : > { %v8649_v57 = vmul.f32 %v8648_v47, %v8648_v47 }
0x1af9   : > { %v8650_v35 = vsel %vm1034_vm2, %v8649_v57, 0.0  ;;  %v13569_v57 = vld [vmem:[%s15546_s2 + $0x5a0] sm:$0xff]  }
0x1afa   : > { %8651 = vadd.xlane.f32.xlu1 %v8650_v35  ;;  %v13570_v35 = vld [vmem:[%s15546_s2 + $0x558] sm:$0xff]  }
0x1b83   : > { %v8652_v26 = vpop.xlane.xlu1 %8651 }
0x1b84   : > { %v8653_v27 = vmul.f32 0.03125, %v8652_v26  ;;  %v15238_v26 = vld [vmem:[%s15547_s26 + $0x1] ss:$2 sm:$0xf] }
0x1b86   : > { %v8654_v30 = vadd.f32 1e-05, %v8653_v27 }
0x1b88   : > { %13766 = vrsqrt.f32 %v8654_v30 }
0x1b95   : > { %v13767_v1 = vpop.eup %13766 }
0x1b96   : > { %v8656_v31 = vmul.f32 %v13767_v1, %v8648_v47  ;;  %v13568_v47 = vld [vmem:[%s15546_s2 + $0x520] sm:$0xff]   ;;  %v8687_v1 = vrot.slane %v15238_v26, %v14583_v14 }
0x1b98   : > { %v8661_v29 = vmul.f32 %v11512_v38, %v8656_v31  ;;  %v8695_v38 = vrot.slane %v15238_v26, %v14585_v18 }
0x1b9a   : > { %v15182_v37 = vadd.f32 %v11513_v28, %v8661_v29 }
0x1b9c   : > { %v15186_v25 = vpack.c.bf16 %v15182_v37, %v15182_v37 }
0x1b9e   : > { %11531 = vmatmul.mubr.msk.bf16.vlgmr.msra.gmra.mxu0 %vm1034_vm2, %v15186_v25  ;;  %11532 = vmatmul.mubr.msk.bf16.vlgmr.msra.gmra.mxu1 %vm1034_vm2, %v15186_v25 }
0x1b9f   : > { %8982 = vmatpush1.bf16.msra.mxu0 %v11610_v34  ;;  %9023 = vmatpush1.bf16.msra.mxu1 %v11612_v23  ;;  %v11605_v34 = vld [vmem:[%s15547_s26 + $0x9] ss:$2 sm:$0xf] }
0x1ba0   : > { %8983 = vmatprep.subr.bf16.mxu0 %v11607_v41  ;;  %9024 = vmatprep.subr.bf16.mxu1 %v11609_v42  ;;  %v8912_v27 = vrot.slane %v11605_v34, %v14588_v21  ;;  %v8920_v30 = vrot.slane %v11605_v34, %v14590_v22  ;;  %v8916_v29 = vrot.slane %v11605_v34, %v14583_v14 }
0x1ba1   : > { %9001 = vmatprep.mubr.bf16.mxu0 %v13880_v15  ;;  %9042 = vmatprep.mubr.bf16.mxu1 %v13880_v15  ;;  %v8924_v32 = vrot.slane %v11605_v34, %v14585_v18  ;;  %v13605_v34 = vld [vmem:[%s15546_s2 + $0x498] sm:$0xff]  }
0x1ba3   : > { %8984 = vmatpush1.bf16.msra.mxu0 %v11606_v45  ;;  %9025 = vmatpush1.bf16.msra.mxu1 %v11608_v16 }
0x1ba4   : > { %12409 = vmatprep.subr.bf16.mxu0 %v13554_v12  ;;  %12431 = vmatprep.subr.bf16.mxu1 %v13555_v13 }
0x1ba6   : > { %11614 = vmatmul.mubr.msk.bf16.vlgmr.msra.gmra.mxu0 %vm1034_vm2, %v15186_v25  ;;  %11615 = vmatmul.mubr.msk.bf16.vlgmr.msra.gmra.mxu1 %vm1034_vm2, %v15186_v25 }
0x1ba7   : > { %12410 = vmatpush3.bf16.msra.mxu0 %v13556_v46  ;;  %12432 = vmatpush3.bf16.msra.mxu1 %v13557_v33 }
0x1ba8   : > { %12411 = vmatprep.subr.bf16.mxu0 %v13558_v43  ;;  %12433 = vmatprep.subr.bf16.mxu1 %v13559_v49 }
0x1bab   : > { %12412 = vmatpush3.bf16.msra.mxu0 %v13560_v44  ;;  %12434 = vmatpush3.bf16.msra.mxu1 %v13561_v51 }
0x1bac   : > { %12413 = vmatprep.subr.bf16.mxu0 %v13562_v53  ;;  %12435 = vmatprep.subr.bf16.mxu1 %v13563_v39 }
0x1baf   : > { %12414 = vmatpush3.bf16.msra.mxu0 %v13564_v40  ;;  %12436 = vmatpush3.bf16.msra.mxu1 %v13565_v54 }
0x1bb0   : > { %12415 = vmatprep.subr.bf16.mxu0 %v13566_v4  ;;  %12437 = vmatprep.subr.bf16.mxu1 %v13567_v56 }
0x1bb3   : > { %12416 = vmatpush3.bf16.msra.mxu0 %v13568_v47  ;;  %12438 = vmatpush3.bf16.msra.mxu1 %v13569_v57  ;;  %v13588_v57 = vld [vmem:[%s15546_s2 + $0x438] sm:$0xff]  }
0x1bb4   : > { %12417 = vmatprep.subr.bf16.mxu0 %v13570_v35  ;;  %12439 = vmatprep.subr.bf16.mxu1 %v13571_v48  ;;  %v13589_v35 = vld [vmem:[%s15546_s2 + $0x4b8] sm:$0xff]  }
0x1bb7   : > { %12418 = vmatpush3.bf16.msra.mxu0 %v13572_v50  ;;  %12440 = vmatpush3.bf16.msra.mxu1 %v13573_v58  ;;  %v13590_v58 = vld [vmem:[%s15546_s2 + $0x470] sm:$0xff]  }
0x1bb8   : > { %12419 = vmatprep.subr.bf16.mxu0 %v13574_v52  ;;  %12441 = vmatprep.subr.bf16.mxu1 %v13575_v61  ;;  %v13591_v52 = vld [vmem:[%s15546_s2 + $0x4f0] sm:$0xff]  }
0x1bbb   : > { %12420 = vmatpush3.bf16.msra.mxu0 %v13576_v55  ;;  %12442 = vmatpush3.bf16.msra.mxu1 %v13577_v62  ;;  %v13592_v62 = vld [vmem:[%s15546_s2 + $0x430] sm:$0xff]  }
0x1bbc   : > { %12421 = vmatprep.subr.bf16.mxu0 %v13578_v63  ;;  %12443 = vmatprep.subr.bf16.mxu1 %v13579_v11  ;;  %v13593_v63 = vld [vmem:[%s15546_s2 + $0x4b0] sm:$0xff]   ;;  %v13594_v11 = vld [vmem:[%s15546_s2 + $0x468] sm:$0xff]  }
0x1bbf   : > { %12422 = vmatpush3.bf16.msra.mxu0 %v13580_v59  ;;  %12444 = vmatpush3.bf16.msra.mxu1 %v13581_v60  ;;  %v13595_v59 = vld [vmem:[%s15546_s2 + $0x4e8] sm:$0xff]  }
0x1bc0   : > { %12423 = vmatprep.subr.bf16.mxu0 %v13582_v0  ;;  %12445 = vmatprep.subr.bf16.mxu1 %v13583_v2  ;;  %v13596_v60 = vld [vmem:[%s15546_s2 + $0x428] sm:$0xff]   ;;  %v13598_v2 = vld [vmem:[%s15546_s2 + $0x460] sm:$0xff]  }
0x1bc1   : > { %v13597_v0 = vld [vmem:[%s15546_s2 + $0x4a8] sm:$0xff]  }
0x1bc3   : > { %12424 = vmatpush3.bf16.msra.mxu0 %v13584_v3  ;;  %12446 = vmatpush3.bf16.msra.mxu1 %v13585_v5  ;;  %v13599_v3 = vld [vmem:[%s15546_s2 + $0x4e0] sm:$0xff]  }
0x1bc4   : > { %12453 = vmatprep.subr.bf16.mxu0 %v13586_v6  ;;  %12475 = vmatprep.subr.bf16.mxu1 %v13587_v7  ;;  %v13600_v5 = vld [vmem:[%s15546_s2 + $0x420] sm:$0xff]   ;;  %v13602_v7 = vld [vmem:[%s15546_s2 + $0x458] sm:$0xff]  }
0x1bc5   : > { %v13601_v6 = vld [vmem:[%s15546_s2 + $0x4a0] sm:$0xff]  }
0x1c5e   : > { %v15232_v10 = vpop.f32.mrf.mxu0  ;;  %v15234_v17 = vpop.f32.mrf.mxu1 }
0x1c60   : > { %v8779_v19 = vpop.f32.mrf.mxu0  ;;  %v8820_v20 = vpop.f32.mrf.mxu1 }
0x1c61   : > { %v8780_v42 = vadd.f32 %v8779_v19, %v8687_v1  ;;  %v8821_v45 = vadd.f32 %v8820_v20, %v8695_v38  ;;  %v13603_v19 = vld [vmem:[%s15546_s2 + $0x4d8] sm:$0xff]   ;;  %v8683_v1 = vrot.slane %v15238_v26, %v14588_v21  ;;  %v8691_v38 = vrot.slane %v15238_v26, %v14590_v22  ;;  %v13614_v26 = vld [vmem:[%s15546_s2 + $0x440] sm:$0xff]  }
0x1c62   : > { %v8781_v23 = vpop.f32.mrf.mxu0  ;;  %v8822_v24 = vpop.f32.mrf.mxu1  ;;  %v13604_v20 = vld [vmem:[%s15546_s2 + $0x418] sm:$0xff]  }
0x1c63   : > { %v8826_v39 = vmax.f32 %v8780_v42, 0.0  ;;  %v8828_v40 = vmax.f32 %v8821_v45, 0.0  ;;  %v13606_v23 = vld [vmem:[%s15546_s2 + $0x450] sm:$0xff]   ;;  %v11750_v42 = vld [vmem:[%s15543_s28 + $0x1e0] sm:$0xff]  ;;  %v11749_v45 = vld [vmem:[%s15543_s28 + $0x1a8] sm:$0xff] }
0x1c64   : > { %v8782_v31 = vpop.f32.mrf.mxu0  ;;  %v8823_v28 = vpop.f32.mrf.mxu1  ;;  %v13607_v24 = vld [vmem:[%s15546_s2 + $0x4d0] sm:$0xff]  }
0x1c65   : > { %v8830_v61 = vpack.c.bf16 %v8826_v39, %v8826_v39  ;;  %v8832_v55 = vpack.c.bf16 %v8828_v40, %v8828_v40  ;;  %v13610_v31 = vld [vmem:[%s15546_s2 + $0x448] sm:$0xff]  }
0x1c66   : > { %v9003_v8 = vpop.f32.mrf.mxu0  ;;  %v9044_v9 = vpop.f32.mrf.mxu1  ;;  %v13611_v28 = vld [vmem:[%s15546_s2 + $0x4c8] sm:$0xff]  }
0x1c67   : > { %v9004_v36 = vadd.f32 %v9003_v8, %v8912_v27  ;;  %v9045_v41 = vadd.f32 %v9044_v9, %v8920_v30  ;;  %v13608_v27 = vld [vmem:[%s15546_s2 + $0x410] sm:$0xff]   ;;  %v8778_v8 = vadd.f32 %v15232_v10, %v8683_v1  ;;  %v8819_v9 = vadd.f32 %v15234_v17, %v8691_v38  ;;  %v13643_v1 = vld [vmem:[%s15546_s2 + $0x6c8] sm:$0xff]  }
0x1c68   : > { %v9005_v16 = vpop.f32.mrf.mxu0  ;;  %v9046_v12 = vpop.f32.mrf.mxu1  ;;  %v13609_v30 = vld [vmem:[%s15546_s2 + $0x490] sm:$0xff]   ;;  %v13644_v38 = vld [vmem:[%s15546_s2 + $0x608] sm:$0xff]  }
0x1c69   : > { %v9006_v13 = vadd.f32 %v9005_v16, %v8916_v29  ;;  %v9047_v46 = vadd.f32 %v9046_v12, %v8924_v32  ;;  %v9051_v33 = vmax.f32 %v9004_v36, 0.0  ;;  %v9053_v43 = vmax.f32 %v9045_v41, 0.0  ;;  %v13612_v29 = vld [vmem:[%s15546_s2 + $0x408] sm:$0xff]   ;;  %v13615_v36 = vld [vmem:[%s15546_s2 + $0x4c0] sm:$0xff]  }
0x1c6a   : > { %v9007_v49 = vpop.f32.mrf.mxu0  ;;  %v9048_v44 = vpop.f32.mrf.mxu1  ;;  %v13613_v32 = vld [vmem:[%s15546_s2 + $0x488] sm:$0xff]   ;;  %v11748_v41 = vld [vmem:[%s15543_s28 + $0x1a0] sm:$0xff]  ;;  %v8827_v10 = vmax.f32 %v8819_v9, 0.0  ;;  %v15331_v9 = vld [vmem:[%s15543_s28 + $0x1b0] sm:$0xff] }
0x1c6b   : > { %v9052_v51 = vmax.f32 %v9006_v13, 0.0  ;;  %v9054_v53 = vmax.f32 %v9047_v46, 0.0  ;;  %v9055_v48 = vpack.c.bf16 %v9051_v33, %v9051_v33  ;;  %v9057_v50 = vpack.c.bf16 %v9053_v43, %v9053_v43  ;;  %v11751_v16 = vld [vmem:[%s15543_s28 + $0x1e8] sm:$0xff]  ;;  %v13616_v12 = vld [vmem:[%s15546_s2 + $0x400] sm:$0xff]  }
0x1c6c   : > { %v9008_v54 = vpop.f32.mrf.mxu0  ;;  %v9049_v4 = vpop.f32.mrf.mxu1  ;;  %v13617_v13 = vld [vmem:[%s15546_s2 + $0x480] sm:$0xff]   ;;  %v8825_v46 = vmax.f32 %v8778_v8, 0.0  ;;  %v11758_v17 = vcombine.high %v11748_v41, %v11750_v42  ;;  %v11760_v33 = vcombine.high %v11749_v45, %v11751_v16  ;;  %v11745_v44 = vld [vmem:[%s15543_s28 + $0x128] sm:$0xff]  ;;  %v11759_v39 = vcombine.low %v11749_v45, %v11751_v16 }
0x1c6d   : > { %v9056_v56 = vpack.c.bf16 %v9052_v51, %v9052_v51  ;;  %v9058_v47 = vpack.c.bf16 %v9054_v53, %v9054_v53  ;;  %v11744_v43 = vld [vmem:[%s15543_s28 + $0x120] sm:$0xff]  ;;  %v11747_v51 = vld [vmem:[%s15543_s28 + $0x168] sm:$0xff]  ;;  %v11757_v53 = vcombine.low %v11748_v41, %v11750_v42  ;;  %v8831_v4 = vpack.c.bf16 %v8827_v10, %v8827_v10  ;;  %v15342_v42 = vld [vmem:[%s15543_s28 + $0x1f8] sm:$0xff] }
0x1c6e   : > { %v11746_v49 = vld [vmem:[%s15543_s28 + $0x160] sm:$0xff]  ;;  %v8829_v54 = vpack.c.bf16 %v8825_v46, %v8825_v46 }
0x1c6f   : > { %9347 = vmatprep.mubr.bf16.mxu0 %v9056_v56  ;;  %9387 = vmatprep.mubr.bf16.mxu1 %v9058_v47  ;;  %v11754_v40 = vcombine.high %v11744_v43, %v11746_v49  ;;  %v11756_v56 = vcombine.high %v11745_v44, %v11747_v51  ;;  %v11753_v47 = vcombine.low %v11744_v43, %v11746_v49  ;;  %v13649_v8 = vld [vmem:[%s15546_s2 + $0x680] sm:$0xff]  }
0x1c70   : > { %9348 = vmatmul.mubr.bf16.vlgmr.msra.gmra.mxu0 %v9055_v48  ;;  %9388 = vmatmul.mubr.bf16.vlgmr.msra.gmra.mxu1 %v9057_v50  ;;  %v13619_v48 = vld [vmem:[%s15546_s2 + $0x6f8] sm:$0xff]  }
0x1c71   : > { %12454 = vmatpush3.bf16.msra.mxu0 %v13588_v57  ;;  %12476 = vmatpush3.bf16.msra.mxu1 %v13589_v35  ;;  %v11755_v57 = vcombine.low %v11745_v44, %v11747_v51  ;;  %v13618_v35 = vld [vmem:[%s15546_s2 + $0x678] sm:$0xff]  }
0x1c72   : > { %9619 = vmatprep.mubr.bf16.mxu0 %v8830_v61  ;;  %9659 = vmatprep.mubr.bf16.mxu1 %v8832_v55  ;;  %v13620_v50 = vld [vmem:[%s15546_s2 + $0x638] sm:$0xff]   ;;  %v13623_v61 = vld [vmem:[%s15546_s2 + $0x6f0] sm:$0xff]  }
0x1c73   : > { %12455 = vmatprep.subr.bf16.mxu0 %v13590_v58  ;;  %12477 = vmatprep.subr.bf16.mxu1 %v13591_v52  ;;  %v13621_v58 = vld [vmem:[%s15546_s2 + $0x6b8] sm:$0xff]   ;;  %v13622_v52 = vld [vmem:[%s15546_s2 + $0x670] sm:$0xff]  }
0x1c74   : > { %v13624_v55 = vld [vmem:[%s15546_s2 + $0x630] sm:$0xff]  }
0x1c75   : > { %12456 = vmatpush3.bf16.msra.mxu0 %v13592_v62  ;;  %12478 = vmatpush3.bf16.msra.mxu1 %v13593_v63  ;;  %v13625_v62 = vld [vmem:[%s15546_s2 + $0x6b0] sm:$0xff]   ;;  %v13626_v63 = vld [vmem:[%s15546_s2 + $0x668] sm:$0xff]  }
0x1c76   : > { %12457 = vmatprep.subr.bf16.mxu0 %v13594_v11  ;;  %12479 = vmatprep.subr.bf16.mxu1 %v13595_v59  ;;  %v13627_v11 = vld [vmem:[%s15546_s2 + $0x6e8] sm:$0xff]  }
0x1c77   : > { %v13628_v59 = vld [vmem:[%s15546_s2 + $0x628] sm:$0xff]  }
0x1c79   : > { %12458 = vmatpush3.bf16.msra.mxu0 %v13596_v60  ;;  %12480 = vmatpush3.bf16.msra.mxu1 %v13597_v0  ;;  %v13629_v60 = vld [vmem:[%s15546_s2 + $0x6a8] sm:$0xff]   ;;  %v13630_v0 = vld [vmem:[%s15546_s2 + $0x660] sm:$0xff]  }
0x1c7a   : > { %12459 = vmatprep.subr.bf16.mxu0 %v13598_v2  ;;  %12481 = vmatprep.subr.bf16.mxu1 %v13599_v3  ;;  %v13631_v2 = vld [vmem:[%s15546_s2 + $0x6e0] sm:$0xff]  }
0x1c7b   : > { %v13632_v3 = vld [vmem:[%s15546_s2 + $0x620] sm:$0xff]  }
0x1c7d   : > { %12460 = vmatpush3.bf16.msra.mxu0 %v13600_v5  ;;  %12482 = vmatpush3.bf16.msra.mxu1 %v13601_v6  ;;  %v13633_v5 = vld [vmem:[%s15546_s2 + $0x6a0] sm:$0xff]   ;;  %v13634_v6 = vld [vmem:[%s15546_s2 + $0x658] sm:$0xff]  }
0x1c7e   : > { %12461 = vmatprep.subr.bf16.mxu0 %v13602_v7  ;;  %12483 = vmatprep.subr.bf16.mxu1 %v13603_v19  ;;  %v13635_v7 = vld [vmem:[%s15546_s2 + $0x6d8] sm:$0xff]  }
0x1c7f   : > { %v13636_v19 = vld [vmem:[%s15546_s2 + $0x618] sm:$0xff]  }
0x1c81   : > { %12462 = vmatpush3.bf16.msra.mxu0 %v13604_v20  ;;  %12484 = vmatpush3.bf16.msra.mxu1 %v13605_v34  ;;  %v13637_v20 = vld [vmem:[%s15546_s2 + $0x698] sm:$0xff]   ;;  %v13638_v34 = vld [vmem:[%s15546_s2 + $0x650] sm:$0xff]  }
0x1c82   : > { %12463 = vmatprep.subr.bf16.mxu0 %v13606_v23  ;;  %12485 = vmatprep.subr.bf16.mxu1 %v13607_v24  ;;  %v13639_v23 = vld [vmem:[%s15546_s2 + $0x6d0] sm:$0xff]  }
0x1c83   : > { %v13640_v24 = vld [vmem:[%s15546_s2 + $0x610] sm:$0xff]  }
0x1c85   : > { %12464 = vmatpush3.bf16.msra.mxu0 %v13608_v27  ;;  %12486 = vmatpush3.bf16.msra.mxu1 %v13609_v30  ;;  %v13641_v27 = vld [vmem:[%s15546_s2 + $0x690] sm:$0xff]   ;;  %v13642_v30 = vld [vmem:[%s15546_s2 + $0x648] sm:$0xff]  }
0x1c86   : > { %12465 = vmatprep.subr.bf16.mxu0 %v13610_v31  ;;  %12487 = vmatprep.subr.bf16.mxu1 %v13611_v28  ;;  %v13645_v31 = vld [vmem:[%s15546_s2 + $0x688] sm:$0xff]   ;;  %v13646_v28 = vld [vmem:[%s15546_s2 + $0x640] sm:$0xff]  }
0x1c89   : > { %12466 = vmatpush3.bf16.msra.mxu0 %v13612_v29  ;;  %12488 = vmatpush3.bf16.msra.mxu1 %v13613_v32  ;;  %v13647_v29 = vld [vmem:[%s15546_s2 + $0x6c0] sm:$0xff]  }
0x1c8a   : > { %12467 = vmatprep.subr.bf16.mxu0 %v13614_v26  ;;  %12489 = vmatprep.subr.bf16.mxu1 %v13615_v36  ;;  %v13648_v32 = vld [vmem:[%s15546_s2 + $0x600] sm:$0xff]   ;;  %v15334_v26 = vld [vmem:[%s15543_s28 + $0x1f0] sm:$0xff]  ;;  %v15337_v36 = vld [vmem:[%s15543_s28 + $0x1b8] sm:$0xff] }
0x1c8b   : > { %v11873_v41 = vcombine.high %v15331_v9, %v15334_v26  ;;  %v11872_v45 = vcombine.low %v15331_v9, %v15334_v26  ;;  %v11874_v16 = vcombine.low %v15337_v36, %v15342_v42 }
0x1c8d   : > { %12468 = vmatpush3.bf16.msra.mxu0 %v13616_v12  ;;  %12490 = vmatpush3.bf16.msra.mxu1 %v13617_v13  ;;  %v11875_v12 = vcombine.high %v15337_v36, %v15342_v42 }
0x1c8e   : > { %9750 = vmatprep.subr.bf16.mxu0 %v11758_v17  ;;  %9791 = vmatprep.subr.bf16.mxu1 %v11760_v33 }
0x1c90   : > { %9620 = vmatmul.mubr.bf16.vlgmr.msra.gmra.mxu0 %v8829_v54  ;;  %9660 = vmatmul.mubr.bf16.vlgmr.msra.gmra.mxu1 %v8831_v4 }
0x1c91   : > { %9751 = vmatpush1.bf16.msra.mxu0 %v11757_v53  ;;  %9792 = vmatpush1.bf16.msra.mxu1 %v11759_v39 }
0x1c92   : > { %9752 = vmatprep.subr.bf16.mxu0 %v11754_v40  ;;  %9793 = vmatprep.subr.bf16.mxu1 %v11756_v56 }
0x1c93   : > { %9770 = vmatprep.mubr.bf16.mxu0 %v13880_v15  ;;  %9811 = vmatprep.mubr.bf16.mxu1 %v13880_v15 }
0x1c95   : > { %9753 = vmatpush1.bf16.msra.mxu0 %v11753_v47  ;;  %9794 = vmatpush1.bf16.msra.mxu1 %v11755_v57  ;;  %v11752_v47 = vld [vmem:[%s15547_s26 + $0x11] ss:$2 sm:$0xf] }
0x1c96   : > { %12497 = vmatprep.subr.bf16.mxu0 %v13618_v35  ;;  %12519 = vmatprep.subr.bf16.mxu1 %v13619_v48 }
0x1c98   : > { %11761 = vmatmul.mubr.msk.bf16.vlgmr.msra.gmra.mxu0 %vm1034_vm2, %v15186_v25  ;;  %11762 = vmatmul.mubr.msk.bf16.vlgmr.msra.gmra.mxu1 %vm1034_vm2, %v15186_v25 }
0x1c99   : > { %12498 = vmatpush3.bf16.msra.mxu0 %v13620_v50  ;;  %12520 = vmatpush3.bf16.msra.mxu1 %v13621_v58 }
0x1c9a   : > { %12499 = vmatprep.subr.bf16.mxu0 %v13622_v52  ;;  %12521 = vmatprep.subr.bf16.mxu1 %v13623_v61  ;;  %v9681_v52 = vrot.slane %v11752_v47, %v14588_v21  ;;  %v9689_v61 = vrot.slane %v11752_v47, %v14590_v22 }
0x1c9d   : > { %12500 = vmatpush3.bf16.msra.mxu0 %v13624_v55  ;;  %12522 = vmatpush3.bf16.msra.mxu1 %v13625_v62 }
0x1c9e   : > { %12501 = vmatprep.subr.bf16.mxu0 %v13626_v63  ;;  %12523 = vmatprep.subr.bf16.mxu1 %v13627_v11  ;;  %v9685_v11 = vrot.slane %v11752_v47, %v14583_v14 }
0x1ca1   : > { %12502 = vmatpush3.bf16.msra.mxu0 %v13628_v59  ;;  %12524 = vmatpush3.bf16.msra.mxu1 %v13629_v60  ;;  %v9693_v59 = vrot.slane %v11752_v47, %v14585_v18  ;;  %v13667_v47 = vld [vmem:[%s15546_s2 + $0x7d8] sm:$0xff]  }
0x1ca2   : > { %12503 = vmatprep.subr.bf16.mxu0 %v13630_v0  ;;  %12525 = vmatprep.subr.bf16.mxu1 %v13631_v2 }
0x1ca5   : > { %12504 = vmatpush3.bf16.msra.mxu0 %v13632_v3  ;;  %12526 = vmatpush3.bf16.msra.mxu1 %v13633_v5 }
0x1ca6   : > { %12505 = vmatprep.subr.bf16.mxu0 %v13634_v6  ;;  %12527 = vmatprep.subr.bf16.mxu1 %v13635_v7 }
0x1ca9   : > { %12506 = vmatpush3.bf16.msra.mxu0 %v13636_v19  ;;  %12528 = vmatpush3.bf16.msra.mxu1 %v13637_v20 }
0x1caa   : > { %12507 = vmatprep.subr.bf16.mxu0 %v13638_v34  ;;  %12529 = vmatprep.subr.bf16.mxu1 %v13639_v23 }
0x1cad   : > { %12508 = vmatpush3.bf16.msra.mxu0 %v13640_v24  ;;  %12530 = vmatpush3.bf16.msra.mxu1 %v13641_v27  ;;  %v11859_v27 = vld [vmem:[%s15543_s28 + $0x130] sm:$0xff] }
0x1cae   : > { %12509 = vmatprep.subr.bf16.mxu0 %v13642_v30  ;;  %12531 = vmatprep.subr.bf16.mxu1 %v13643_v1 }
0x1cb1   : > { %12510 = vmatpush3.bf16.msra.mxu0 %v13644_v38  ;;  %12532 = vmatpush3.bf16.msra.mxu1 %v13645_v31  ;;  %v11861_v38 = vld [vmem:[%s15543_s28 + $0x170] sm:$0xff]  ;;  %v11860_v31 = vld [vmem:[%s15543_s28 + $0x138] sm:$0xff] }
0x1cb2   : > { %12511 = vmatprep.subr.bf16.mxu0 %v13646_v28  ;;  %12533 = vmatprep.subr.bf16.mxu1 %v13647_v29  ;;  %v11862_v28 = vld [vmem:[%s15543_s28 + $0x178] sm:$0xff] }
0x1cb3   : > { %v11871_v42 = vcombine.high %v11860_v31, %v11862_v28 }
0x1cb5   : > { %12512 = vmatpush3.bf16.msra.mxu0 %v13648_v32  ;;  %12534 = vmatpush3.bf16.msra.mxu1 %v13649_v8 }
0x1cb6   : > { %10248 = vmatprep.subr.bf16.mxu0 %v11873_v41  ;;  %10289 = vmatprep.subr.bf16.mxu1 %v11875_v12  ;;  %v11869_v41 = vcombine.high %v11859_v27, %v11861_v38  ;;  %v11868_v12 = vcombine.low %v11859_v27, %v11861_v38 }
0x1d30   : > { %v12425_v13 = vpop.f32.mrf.mxu0  ;;  %v12447_v46 = vpop.f32.mrf.mxu1 }
0x1d32   : > { %v12426_v10 = vpop.f32.mrf.mxu0  ;;  %v12448_v17 = vpop.f32.mrf.mxu1 }
0x1d33   : > { %v12427_v33 = vadd.f32 %v12426_v10, %v12425_v13  ;;  %v12449_v43 = vadd.f32 %v12448_v17, %v12447_v46  ;;  %v11870_v13 = vcombine.low %v11860_v31, %v11862_v28  ;;  %v13650_v46 = vld [vmem:[%s15546_s2 + $0x778] sm:$0xff]  }
0x1d34   : > { %v12428_v49 = vpop.f32.mrf.mxu0  ;;  %v12450_v44 = vpop.f32.mrf.mxu1  ;;  %v13651_v10 = vld [vmem:[%s15546_s2 + $0x7f8] sm:$0xff]  }
0x1d35   : > { %v9390_v51 = vadd.f32 %v12449_v43, %v12427_v33  ;;  %v13653_v17 = vld [vmem:[%s15546_s2 + $0x7b8] sm:$0xff]   ;;  %v13655_v33 = vld [vmem:[%s15546_s2 + $0x7f0] sm:$0xff]   ;;  %v13658_v44 = vld [vmem:[%s15546_s2 + $0x768] sm:$0xff]  }
0x1d36   : > { %v12429_v53 = vpop.f32.mrf.mxu0  ;;  %v12451_v39 = vpop.f32.mrf.mxu1  ;;  %v13656_v43 = vld [vmem:[%s15546_s2 + $0x730] sm:$0xff]  }
0x1d37   : > { %v13657_v49 = vld [vmem:[%s15546_s2 + $0x7b0] sm:$0xff]   ;;  %v13660_v53 = vld [vmem:[%s15546_s2 + $0x728] sm:$0xff]  }
0x1d38   : > { %v13661_v39 = vld [vmem:[%s15546_s2 + $0x7a8] sm:$0xff]  }
0x1d50   : > { %v12469_v40 = vpop.f32.mrf.mxu0  ;;  %v12491_v54 = vpop.f32.mrf.mxu1 }
0x1d52   : > { %v12470_v4 = vpop.f32.mrf.mxu0  ;;  %v12492_v56 = vpop.f32.mrf.mxu1 }
0x1d53   : > { %v12471_v57 = vadd.f32 %v12470_v4, %v12469_v40  ;;  %v12493_v35 = vadd.f32 %v12492_v56, %v12491_v54  ;;  %v13663_v40 = vld [vmem:[%s15546_s2 + $0x7e0] sm:$0xff]   ;;  %v13666_v56 = vld [vmem:[%s15546_s2 + $0x758] sm:$0xff]  }
0x1d54   : > { %v12472_v48 = vpop.f32.mrf.mxu0  ;;  %v12494_v50 = vpop.f32.mrf.mxu1  ;;  %v13664_v54 = vld [vmem:[%s15546_s2 + $0x720] sm:$0xff]  }
0x1d55   : > { %v9622_v58 = vadd.f32 %v12471_v57, %v9390_v51  ;;  %v13659_v51 = vld [vmem:[%s15546_s2 + $0x7e8] sm:$0xff]   ;;  %v13665_v4 = vld [vmem:[%s15546_s2 + $0x7a0] sm:$0xff]   ;;  %v13668_v57 = vld [vmem:[%s15546_s2 + $0x718] sm:$0xff]  }
0x1d56   : > { %v12473_v55 = vpop.f32.mrf.mxu0  ;;  %v12495_v62 = vpop.f32.mrf.mxu1  ;;  %v13670_v48 = vld [vmem:[%s15546_s2 + $0x750] sm:$0xff]  }
0x1d57   : > { %v15353_v63 = vadd.f32 %v12493_v35, %v9622_v58  ;;  %v13669_v35 = vld [vmem:[%s15546_s2 + $0x798] sm:$0xff]   ;;  %v13671_v50 = vld [vmem:[%s15546_s2 + $0x7d0] sm:$0xff]   ;;  %v13675_v55 = vld [vmem:[%s15546_s2 + $0x7c8] sm:$0xff]  }
0x1d58   : > { %v9772_v60 = vpop.f32.mrf.mxu0  ;;  %v9813_v0 = vpop.f32.mrf.mxu1  ;;  %v13672_v58 = vld [vmem:[%s15546_s2 + $0x710] sm:$0xff]   ;;  %v13676_v62 = vld [vmem:[%s15546_s2 + $0x708] sm:$0xff]  }
0x1d59   : > { %v9773_v2 = vadd.f32 %v9772_v60, %v9681_v52  ;;  %v9814_v3 = vadd.f32 %v9813_v0, %v9689_v61  ;;  %v13673_v52 = vld [vmem:[%s15546_s2 + $0x790] sm:$0xff]   ;;  %v13674_v61 = vld [vmem:[%s15546_s2 + $0x748] sm:$0xff]   ;;  %v13679_v60 = vld [vmem:[%s15546_s2 + $0x7c0] sm:$0xff]  }
0x1d5a   : > { %v9774_v5 = vpop.f32.mrf.mxu0  ;;  %v9815_v6 = vpop.f32.mrf.mxu1  ;;  %v13680_v0 = vld [vmem:[%s15546_s2 + $0x700] sm:$0xff]  }
0x1d5b   : > { %v9775_v7 = vadd.f32 %v9774_v5, %v9685_v11  ;;  %v9816_v19 = vadd.f32 %v9815_v6, %v9693_v59  ;;  %v9820_v20 = vmax.f32 %v9773_v2, 0.0  ;;  %v9822_v34 = vmax.f32 %v9814_v3, 0.0  ;;  %v13677_v11 = vld [vmem:[%s15546_s2 + $0x788] sm:$0xff]   ;;  %v13678_v59 = vld [vmem:[%s15546_s2 + $0x740] sm:$0xff]  }
0x1d5c   : > { %v9776_v23 = vpop.f32.mrf.mxu0  ;;  %v9817_v24 = vpop.f32.mrf.mxu1  ;;  %v13681_v2 = vld [vmem:[%s15546_s2 + $0x780] sm:$0xff]  }
0x1d5d   : > { %v9821_v30 = vmax.f32 %v9775_v7, 0.0  ;;  %v9823_v1 = vmax.f32 %v9816_v19, 0.0  ;;  %v9824_v26 = vpack.c.bf16 %v9820_v20, %v9820_v20  ;;  %v9826_v36 = vpack.c.bf16 %v9822_v34, %v9822_v34  ;;  %v11867_v19 = vld [vmem:[%s15547_s26 + $0x19] ss:$2 sm:$0xf] }
0x1d5e   : > { %v9777_v29 = vpop.f32.mrf.mxu0  ;;  %v9818_v32 = vpop.f32.mrf.mxu1 }
0x1d5f   : > { %v9825_v8 = vpack.c.bf16 %v9821_v30, %v9821_v30  ;;  %v9827_v9 = vpack.c.bf16 %v9823_v1, %v9823_v1  ;;  %v10179_v30 = vrot.slane %v11867_v19, %v14588_v21  ;;  %v10187_v1 = vrot.slane %v11867_v19, %v14590_v22 }
0x1d60   : > { %v10183_v29 = vrot.slane %v11867_v19, %v14583_v14  ;;  %v10191_v32 = vrot.slane %v11867_v19, %v14585_v18  ;;  %v13691_v19 = vld [vmem:[%s15523_s1 + $0x8] ss:$16 sps:$4 sm:$0xff]  }
0x1d61   : > { %10116 = vmatprep.mubr.bf16.mxu0 %v9825_v8  ;;  %10156 = vmatprep.mubr.bf16.mxu1 %v9827_v9 }
0x1d62   : > { %10117 = vmatmul.mubr.bf16.vlgmr.msra.gmra.mxu0 %v9824_v26  ;;  %10157 = vmatmul.mubr.bf16.vlgmr.msra.gmra.mxu1 %v9826_v36 }
0x1d63   : > { %10249 = vmatpush1.bf16.msra.mxu0 %v11872_v45  ;;  %10290 = vmatpush1.bf16.msra.mxu1 %v11874_v16  ;;  %v13652_v45 = vld [vmem:[%s15546_s2 + $0x738] sm:$0xff]   ;;  %v13654_v16 = vld [vmem:[%s15546_s2 + $0x770] sm:$0xff]  }
0x1d64   : > { %10250 = vmatprep.subr.bf16.mxu0 %v11869_v41  ;;  %10291 = vmatprep.subr.bf16.mxu1 %v11871_v42 }
0x1d65   : > { %10268 = vmatprep.mubr.bf16.mxu0 %v13880_v15  ;;  %10309 = vmatprep.mubr.bf16.mxu1 %v13880_v15 }
0x1d67   : > { %10251 = vmatpush1.bf16.msra.mxu0 %v11868_v12  ;;  %10292 = vmatpush1.bf16.msra.mxu1 %v11870_v13 }
0x1d68   : > { %12541 = vmatprep.subr.bf16.mxu0 %v13650_v46  ;;  %12563 = vmatprep.subr.bf16.mxu1 %v13651_v10 }
0x1d6a   : > { %11876 = vmatmul.mubr.msk.bf16.vlgmr.msra.gmra.mxu0 %vm1034_vm2, %v15186_v25  ;;  %11877 = vmatmul.mubr.msk.bf16.vlgmr.msra.gmra.mxu1 %vm1034_vm2, %v15186_v25  ;;  %v13662_v25 = vld [vmem:[%s15546_s2 + $0x760] sm:$0xff]   ;;  %s15555_s2 = sld [smem:[#allocation27_spill]] }
0x1d6b   : > { %12542 = vmatpush3.bf16.msra.mxu0 %v13652_v45  ;;  %12564 = vmatpush3.bf16.msra.mxu1 %v13653_v17 }
0x1d6c   : > { %12543 = vmatprep.subr.bf16.mxu0 %v13654_v16  ;;  %12565 = vmatprep.subr.bf16.mxu1 %v13655_v33 }
0x1d6f   : > { %12544 = vmatpush3.bf16.msra.mxu0 %v13656_v43  ;;  %12566 = vmatpush3.bf16.msra.mxu1 %v13657_v49 }
0x1d70   : > { %12545 = vmatprep.subr.bf16.mxu0 %v13658_v44  ;;  %12567 = vmatprep.subr.bf16.mxu1 %v13659_v51 }
0x1d73   : > { %12546 = vmatpush3.bf16.msra.mxu0 %v13660_v53  ;;  %12568 = vmatpush3.bf16.msra.mxu1 %v13661_v39 }
0x1d74   : > { %12547 = vmatprep.subr.bf16.mxu0 %v13662_v25  ;;  %12569 = vmatprep.subr.bf16.mxu1 %v13663_v40 }
0x1d77   : > { %12548 = vmatpush3.bf16.msra.mxu0 %v13664_v54  ;;  %12570 = vmatpush3.bf16.msra.mxu1 %v13665_v4 }
0x1d78   : > { %12549 = vmatprep.subr.bf16.mxu0 %v13666_v56  ;;  %12571 = vmatprep.subr.bf16.mxu1 %v13667_v47 }
0x1d7b   : > { %12550 = vmatpush3.bf16.msra.mxu0 %v13668_v57  ;;  %12572 = vmatpush3.bf16.msra.mxu1 %v13669_v35 }
0x1d7c   : > { %12551 = vmatprep.subr.bf16.mxu0 %v13670_v48  ;;  %12573 = vmatprep.subr.bf16.mxu1 %v13671_v50 }
0x1d7f   : > { %12552 = vmatpush3.bf16.msra.mxu0 %v13672_v58  ;;  %12574 = vmatpush3.bf16.msra.mxu1 %v13673_v52  ;;  %v11974_v58 = vld [vmem:[%s14025_s23 + $0x1] ss:$0 sm:$0xff] }
0x1d80   : > { %12553 = vmatprep.subr.bf16.mxu0 %v13674_v61  ;;  %12575 = vmatprep.subr.bf16.mxu1 %v13675_v55 }
0x1d83   : > { %12554 = vmatpush3.bf16.msra.mxu0 %v13676_v62  ;;  %12576 = vmatpush3.bf16.msra.mxu1 %v13677_v11 }
0x1d84   : > { %12555 = vmatprep.subr.bf16.mxu0 %v13678_v59  ;;  %12577 = vmatprep.subr.bf16.mxu1 %v13679_v60 }
0x1d87   : > { %12556 = vmatpush3.bf16.msra.mxu0 %v13680_v0  ;;  %12578 = vmatpush3.bf16.msra.mxu1 %v13681_v2  ;;  %v13684_v2 = vld [vmem:[%s15523_s1 + $0x24] ss:$16 sps:$4 sm:$0xff]  }
0x1d88   : > { %10781 = vmatprep.subr.bf16.mxu0 %v13684_v2 }
0x1e22   : > { %v12513_v3 = vpop.f32.mrf.mxu0  ;;  %v12535_v5 = vpop.f32.mrf.mxu1 }
0x1e24   : > { %v12514_v6 = vpop.f32.mrf.mxu0  ;;  %v12536_v7 = vpop.f32.mrf.mxu1 }
0x1e25   : > { %v12515_v20 = vadd.f32 %v12514_v6, %v12513_v3  ;;  %v12537_v34 = vadd.f32 %v12536_v7, %v12535_v5  ;;  %v13687_v3 = vld [vmem:[%s15523_s1 + $0x2c] ss:$16 sps:$4 sm:$0xff]   ;;  %v13682_v5 = vld [vmem:[%s15523_s1 + $0x20] ss:$16 sps:$4 sm:$0xff]   ;;  %v13685_v6 = vld [vmem:[%s15523_s1 + $0x28] ss:$16 sps:$4 sm:$0xff]  }
0x1e26   : > { %v12516_v23 = vpop.f32.mrf.mxu0  ;;  %v12538_v24 = vpop.f32.mrf.mxu1  ;;  %10822 = vmatprep.subr.bf16.mxu1 %v13687_v3  ;;  %v13690_v7 = vld [vmem:[%s15523_s1 + $0x4] ss:$16 sps:$4 sm:$0xff]  }
0x1e27   : > { %v10159_v27 = vadd.f32 %v12537_v34, %v12515_v20  ;;  %v13693_v20 = vld [vmem:[%s15523_s1 + $0xc] ss:$16 sps:$4 sm:$0xff]  }
0x1e28   : > { %v12517_v38 = vpop.f32.mrf.mxu0  ;;  %v12539_v31 = vpop.f32.mrf.mxu1 }
0x1e29   : > { %v10164_v28 = vadd.f32 %v10159_v27, %v15353_v63  ;;  %v11976_v38 = vld [vmem:[%s15551_s9 + $0x1] ss:$0 sm:$0xff] }
0x1e2a   : > { %v10270_v8 = vpop.f32.mrf.mxu0  ;;  %v10311_v9 = vpop.f32.mrf.mxu1 }
0x1e2b   : > { %v10271_v26 = vadd.f32 %v10270_v8, %v10179_v30  ;;  %v10312_v36 = vadd.f32 %v10311_v9, %v10187_v1  ;;  %v11975_v30 = vld [vmem:[%s15549_s4 + $0x1] ss:$0 sm:$0xff] }
0x1e2c   : > { %v10272_v41 = vpop.f32.mrf.mxu0  ;;  %v10313_v42 = vpop.f32.mrf.mxu1 }
0x1e2d   : > { %v10273_v12 = vadd.f32 %v10272_v41, %v10183_v29  ;;  %v10314_v13 = vadd.f32 %v10313_v42, %v10191_v32  ;;  %v10318_v46 = vmax.f32 %v10271_v26, 0.0  ;;  %v10320_v10 = vmax.f32 %v10312_v36, 0.0  ;;  %v10704_v32 = vld [vmem:[%s15553_s16] sm:$0xf]  ;;  %s15431_s16 = scalar_lea.hbm %s15555_s2, %s11992_s3  ;;  %s13787_s3 = sshll.u32 %s13881_s6, 4  ;;  %s13788_s3 = int_to_ptr.vmem [resolvable:$false] %s13787_s3 }
0x1e2e   : > { %v10274_v45 = vpop.f32.mrf.mxu0  ;;  %v10315_v17 = vpop.f32.mrf.mxu1  ;;  %v10709_v8 = vrot.slane %v10704_v32, %v14588_v21  ;;  %v10717_v9 = vrot.slane %v10704_v32, %v14590_v22  ;;  %v10713_v26 = vrot.slane %v10704_v32, %v14583_v14  ;;  %v10721_v36 = vrot.slane %v10704_v32, %v14585_v18  ;;  %s13789_s7 = scalar_lea.vmem %s13788_s3, 1024 }
0x1e2f   : > { %v10319_v16 = vmax.f32 %v10273_v12, 0.0  ;;  %v10321_v33 = vmax.f32 %v10314_v13, 0.0  ;;  %v10322_v51 = vpack.c.bf16 %v10318_v46, %v10318_v46  ;;  %v10324_v53 = vpack.c.bf16 %v10320_v10, %v10320_v10 }
0x1e30   : > { %v10275_v43 = vpop.f32.mrf.mxu0  ;;  %v10316_v63 = vpop.f32.mrf.mxu1 }
0x1e31   : > { %v10323_v49 = vpack.c.bf16 %v10319_v16, %v10319_v16  ;;  %v10325_v44 = vpack.c.bf16 %v10321_v33, %v10321_v33 }
0x1e33   : > { %10614 = vmatprep.mubr.bf16.mxu0 %v10323_v49  ;;  %10654 = vmatprep.mubr.bf16.mxu1 %v10325_v44 }
0x1e34   : > { %10615 = vmatmul.mubr.bf16.vlgmr.msra.gmra.mxu0 %v10322_v51  ;;  %10655 = vmatmul.mubr.bf16.vlgmr.msra.gmra.mxu1 %v10324_v53 }
0x1e35   : > { %10801 = vmatprep.mubr.bf16.mxu0 %v13880_v15  ;;  %10842 = vmatprep.mubr.bf16.mxu1 %v13880_v15 }
0x1e36   : > { %10782 = vmatpush1.bf16.msra.mxu0 %v13682_v5  ;;  %10823 = vmatpush1.bf16.msra.mxu1 %v13685_v6 }
0x1e37   : > { %10783 = vmatprep.subr.bf16.mxu0 %v13690_v7  ;;  %10824 = vmatprep.subr.bf16.mxu1 %v13693_v20 }
0x1e3a   : > { %10825 = vmatpush1.bf16.msra.mxu1 %v13691_v19 }
0x1ef4   : > { %v12557_v39 = vpop.f32.mrf.mxu0  ;;  %v12579_v25 = vpop.f32.mrf.mxu1 }
0x1ef6   : > { %v12558_v40 = vpop.f32.mrf.mxu0  ;;  %v12580_v54 = vpop.f32.mrf.mxu1 }
0x1ef7   : > { %v12559_v4 = vadd.f32 %v12558_v40, %v12557_v39  ;;  %v12581_v56 = vadd.f32 %v12580_v54, %v12579_v25 }
0x1ef8   : > { %v12560_v47 = vpop.f32.mrf.mxu0  ;;  %v12582_v57 = vpop.f32.mrf.mxu1 }
0x1ef9   : > { %v10657_v35 = vadd.f32 %v12581_v56, %v12559_v4 }
0x1efa   : > { %v12561_v48 = vpop.f32.mrf.mxu0  ;;  %v12583_v50 = vpop.f32.mrf.mxu1 }
0x1efb   : > { %v10662_v52 = vadd.f32 %v10657_v35, %v10164_v28 }
0x1efd   : > { %v10668_v61 = vadd.f32 %v11974_v58, %v10662_v52 }
0x1eff   : > { %v10671_v15 = vadd.f32 %v10668_v61, %v15182_v37  ;;  %v13688_v37 = vld [vmem:[%s15523_s1] ss:$16 sps:$4 sm:$0xff]   ;;  %s10958_s1 = sshll.u32 %s886_s0, 5 }
0x1f00   : > { %10784 = vmatpush1.bf16.msra.mxu0 %v13688_v37  ;;  %s888_s4 = scalar_lea.vmem [#allocation5], %s10958_s1  ;;  %s10856_s1 = scalar_lea.sflag [#allocation6], %s886_s0 }
0x1f01   : > { %v10672_v55 = vsel %vm1034_vm2, %v10671_v15, 0.0  ;;  %s10870_s5 = sshll.u32 %s888_s4, 4  ;;  %s15433_s5 = int_to_ptr.vmem [resolvable:$true] %s10870_s5 }
0x1f02   : > { %10673 = vadd.xlane.f32.xlu0 %v10672_v55  ;;  %s13783_s12 = scalar_lea.vmem %s15433_s5, 512  ;;  %p13790_p4 = scmp.lt.s32.totalorder %s15433_s5, %s13788_s3 }
0x1f03   : > { %p13784_p1 = scmp.ne.s32.totalorder %s15433_s5, %s13783_s12  ;;  %p13791_p5 = scmp.lt.s32.totalorder %s13789_s7, %s13783_s12 }
0x1f05   : > { %p13785_p2 = pnand %p13784_p1, %p14081_p10  ;;  %p13792_p6 = por %p13791_p5, %p13790_p4 }
0x1f07   : > { %p13786_p3 = pneg %p13785_p2 }
0x1f09   : > { %p13793_p7 = pnand %p13792_p6, %p13786_p3 }
0x1f8b   : > { %v10674_v62 = vpop.xlane.xlu0 %10673 }
0x1f8c   : > { %v10675_v11 = vmul.f32 0.03125, %v10674_v62 }
0x1f8e   : > { %v10676_v59 = vsub.f32 %v10671_v15, %v10675_v11 }
0x1f90   : > { %v10677_v60 = vmul.f32 %v10676_v59, %v10676_v59 }
0x1f92   : > { %v10678_v0 = vsel %vm1034_vm2, %v10677_v60, 0.0 }
0x1f93   : > { %10679 = vadd.xlane.f32.xlu1 %v10678_v0 }
0x201c   : > { %v10680_v34 = vpop.xlane.xlu1 %10679 }
0x201d   : > { %v10681_v23 = vmul.f32 0.03125, %v10680_v34 }
0x201f   : > { %v10682_v24 = vadd.f32 1e-05, %v10681_v23 }
0x2021   : > { %13768 = vrsqrt.f32 %v10682_v24 }
0x202e   : > { %v13769_v27 = vpop.eup %13768 }
0x202f   : > { %v10684_v1 = vmul.f32 %v13769_v27, %v10676_v59 }
0x2031   : > { %v10689_v31 = vmul.f32 %v11975_v30, %v10684_v1 }
0x2033   : > { %v10694_v28 = vadd.f32 %v11976_v38, %v10689_v31 }
0x2035   : > { %v10703_v29 = vpack.c.bf16 %v10694_v28, %v10694_v28 }
0x2037   : > { %11985 = vmatmul.mubr.msk.bf16.vlgmr.msra.gmra.mxu0 %vm1034_vm2, %v10703_v29  ;;  %11986 = vmatmul.mubr.msk.bf16.vlgmr.msra.gmra.mxu1 %vm1034_vm2, %v10703_v29 }
0x20f7   : > { %v10803_v41 = vpop.f32.mrf.mxu0  ;;  %v10844_v42 = vpop.f32.mrf.mxu1 }
0x20f8   : > { %v10804_v12 = vadd.f32 %v10803_v41, %v10709_v8  ;;  %v10845_v13 = vadd.f32 %v10844_v42, %v10717_v9 }
0x20f9   : > { %v10805_v46 = vpop.f32.mrf.mxu0  ;;  %v10846_v10 = vpop.f32.mrf.mxu1 }
0x20fa   : > { %10851 = vst [vmem:[%s888_s4] sm:$0xff] %v10804_v12  ;;  %10853 = vst [vmem:[%s888_s4 + $0x10] sm:$0xff] %v10845_v13  ;;  %v10806_v21 = vadd.f32 %v10805_v46, %v10713_v26  ;;  %v10847_v45 = vadd.f32 %v10846_v10, %v10721_v36 }
0x20fb   : > { %v10807_v14 = vpop.f32.mrf.mxu0  ;;  %v10848_v18 = vpop.f32.mrf.mxu1 }
0x20fc   : > { %10852 = vst [vmem:[%s888_s4 + $0x8] sm:$0xff] %v10806_v21  ;;  %10854 = vst [vmem:[%s888_s4 + $0x18] sm:$0xff] %v10847_v45 }
0x20fd   : > { %v10808_v22 = vpop.f32.mrf.mxu0  ;;  %v10849_v17 = vpop.f32.mrf.mxu1 }
0x20fe   : > { %13796 = shalt.err (!%p13793_p7)
}
0x20ff   : > { %s13797_s4 = scalar_lea.hbm %s15431_s16, 512  ;;  %s13801_s0 = scalar_lea.hbm %s15555_s2, 1024 }
0x2100   : > { %p13798_p8 = scmp.ne.s32.totalorder %s15431_s16, %s13797_s4  ;;  %p13802_p13 = scmp.lt.s32.totalorder %s15431_s16, %s15555_s2 }
0x2101   : > { %p13803_p0 = scmp.lt.s32.totalorder %s13801_s0, %s13797_s4 }
0x2102   : > { %p13799_p9 = pnand %p13798_p8, %p14081_p10 }
0x2103   : > { %p13804_p1 = por %p13803_p0, %p13802_p13 }
0x2104   : > { %p13800_p12 = pneg %p13799_p9 }
0x2106   : > { %p13805_p2 = pnand %p13804_p1, %p13800_p12 }
0x2108   : > { %13808 = shalt.err (!%p13805_p2)
}
0x2109   : > { %13257 = dma.vmem_to_hbm [thread:$0]  (%p14081_p10), %s15433_s5, 512, %s15431_s16, %s10856_s1  }
0x210a PF: > { %s15557_s7 = sld [smem:[#allocation31_spill]] }
0x210b   : > { %s15558_s6 = sld [smem:[#allocation28_spill]] }
0x2110   : > { %p13263_p3 = scmp.ge.s32.totalorder %s15557_s7, 2 }
0x2111   : > { %s10882_s3 = sand.u32 1, %s15558_s6  }
0x2112   : > { %p13260_p4 = pnand %p13263_p3, %p14085_p11  ;;  %s10883_s8 = scalar_lea.sflag [#allocation6], %s10882_s3 }
0x2114   : > { %p13261_p5 = pneg %p13260_p4 }
0x2116   : > { %13828 = dma.done.wait (%p13261_p5), %s10883_s8, 512  }
0x2117   : > { %13830 = vsyncadd (%p13261_p5), %s10883_s8, 4294966784  ;;  %s15560_s16 = sld [smem:[#allocation33_spill]] }
0x2118   : > { %s15561_s12 = sld [smem:[#allocation29_spill]] }
0x2119   : > { %s15562_s18 = sld [smem:[#allocation30_spill]] }
0x211a   : > { %s15563_s0 = sld [smem:[#allocation34_spill]] }
0x211d   : > { %p77_p6 = scmp.ge.s32.totalorder %s15560_s16, 4  }
0x211f   :  { %79 = sbr.rel (!%p77_p6) target bundleno = 62 (0x3e), region = 229 }
0x2124   :  { %10888 = vsyncpa [#allocation6], 1 }
0x2125   :  { %10890 = vsyncpa [#allocation6 + $0x1], 1 }

</bundles_post_ra>
